<compile_context>
chip_gen: v5e
topology: v5e:2x2
jax: 0.10.0
libtpu: 0.0.40
codegen_flags: <defaults>
</compile_context>

<pallas_src>
import math

import jax
import jax.numpy as jnp
from jax.experimental import pallas as pl
from jax.experimental.pallas import tpu as pltpu

# ----------------------------- hyperparameters -----------------------------
VOCAB = 50        # vocab_size
EMB = 32          # embedding_dim
HID = 32          # hidden_dim
OUT = 5           # output_dim
N_LAYERS = 2      # n_layers
HID2 = 64         # hidden_size2
PAD_IDX = 0
B = 2             # batch
S = 8             # sequence length

H2 = 2 * HID      # 64  : bidirectional feature / fused cell-state width
G = 8 * HID       # 256 : fused gate width (4 gates x 2 directions)

_VMEM = pl.BlockSpec(memory_space=pltpu.MemorySpace.VMEM)


# ------------------------------ fused Pallas kernel ------------------------------
def fused_forward_kernel(ids_ref, emb_ref,
                         wf0_ref, wb0_ref, b0_ref, whh0_ref,
                         wf1_ref, wb1_ref, b1_ref, whh1_ref,
                         watt_ref, fc1w_ref, fc1b_ref, fcw_ref, fcb_ref,
                         out_ref):
    """Whole RNN_ATTs forward in one kernel.

    ids_ref : (S*B, 1) int32   time-major flattened token ids (row = t*B + b)
    emb_ref : (VOCAB, EMB) f32 embedding table (pad row is zero)
    per LSTM layer L (L = 0, 1), gate-major fused layout over G = 8*HID columns
      wfL : (Din, G) bf16  W_ih forward,  placed in the fwd column blocks (zeros elsewhere)
      wbL : (Din, G) bf16  W_ih backward, placed in the bwd column blocks (zeros elsewhere)
      bL  : (1, G)  f32    combined bias (b_ih + b_hh) for both directions
      whhL: (2H, G) bf16   block-diagonal recurrent weights ([h_f | h_b] rows)
    watt : (1, 2H) f32   attention vector
    fc1w : (2H, HID2) bf16, fc1b: (1, HID2) f32
    fcw  : (HID2, OUT) bf16, fcb: (1, OUT) f32
    out_ref : (B, OUT) f32
    """
    SB = S * B

    # ---- embedding lookup as an exact one-hot matmul (one nonzero per row) ----
    vocab_lane = jax.lax.broadcasted_iota(jnp.int32, (SB, VOCAB), 1)
    onehot = (ids_ref[...] == vocab_lane).astype(jnp.float32)                 # (SB, VOCAB)
    x0 = jnp.dot(onehot, emb_ref[...], preferred_element_type=jnp.float32)    # (SB, EMB)

    # lane mask selecting the `g` gate (tanh) in the fused gate-major layout
    lane = jax.lax.broadcasted_iota(jnp.int32, (B, G), 1)
    g_mask = (lane >= 4 * HID) & (lane < 6 * HID)

    def bidir_lstm_layer(x_all, wf, wb, bias, whh):
        # x_all: (SB, Din) f32, time-major flattened (row = t*B + b)
        xb = x_all.astype(jnp.bfloat16)
        # hoisted input projections for both directions (done once, outside recurrence)
        xp_f = jnp.dot(xb, wf, preferred_element_type=jnp.float32) + bias     # (SB, G)
        xp_b = jnp.dot(xb, wb, preferred_element_type=jnp.float32)            # (SB, G)

        h = jnp.zeros((B, H2), jnp.float32)       # [h_fwd | h_bwd]
        c = jnp.zeros((B, H2), jnp.float32)       # [c_fwd | c_bwd]
        outs_f = [None] * S
        outs_b = [None] * S
        for t in range(S):                        # fully unrolled (S = 8, static)
            tb = S - 1 - t                        # backward direction's time index
            gates = (xp_f[t * B:(t + 1) * B, :]
                     + xp_b[tb * B:(tb + 1) * B, :]
                     + jnp.dot(h.astype(jnp.bfloat16), whh,
                               preferred_element_type=jnp.float32))           # (B, G)
            # full-vreg activations + one lane-mask select (g -> tanh, i/f/o -> sigmoid)
            acts = jnp.where(g_mask, jnp.tanh(gates), jax.nn.sigmoid(gates))
            i_g = acts[:, 0 * H2:1 * H2]
            f_g = acts[:, 1 * H2:2 * H2]
            g_g = acts[:, 2 * H2:3 * H2]
            o_g = acts[:, 3 * H2:4 * H2]
            c = f_g * c + i_g * g_g
            h = o_g * jnp.tanh(c)
            outs_f[t] = h[:, :HID]                # forward output for time t
            outs_b[tb] = h[:, HID:]               # backward output for time S-1-t
        # per-time rows: [h_fwd(t) | h_bwd(t)]  (matches PyTorch bidirectional concat)
        return [jnp.concatenate([outs_f[t], outs_b[t]], axis=1) for t in range(S)]

    rows0 = bidir_lstm_layer(x0, wf0_ref[...], wb0_ref[...], b0_ref[...], whh0_ref[...])
    h1_all = jnp.concatenate(rows0, axis=0)                                   # (SB, 2H)
    rows1 = bidir_lstm_layer(h1_all, wf1_ref[...], wb1_ref[...], b1_ref[...], whh1_ref[...])

    # ---- tanh attention over the sequence, then relu -> fc1 -> fc ----
    w_att = watt_ref[...]                                                     # (1, 2H)
    scores = [jnp.sum(jnp.tanh(r) * w_att, axis=-1, keepdims=True) for r in rows1]
    s_all = jnp.concatenate(scores, axis=1)                                   # (B, S)
    s_all = s_all - jnp.max(s_all, axis=1, keepdims=True)
    e = jnp.exp(s_all)
    alpha = e / jnp.sum(e, axis=1, keepdims=True)                             # softmax over seq
    ctx = jnp.zeros((B, H2), jnp.float32)
    for t in range(S):
        ctx = ctx + rows1[t] * alpha[:, t:t + 1]                              # sum_s H * alpha
    ctx = jnp.maximum(ctx, 0.0)                                               # relu
    h_fc1 = (jnp.dot(ctx.astype(jnp.bfloat16), fc1w_ref[...],
                     preferred_element_type=jnp.float32) + fc1b_ref[...])     # fc1
    out = (jnp.dot(h_fc1.astype(jnp.bfloat16), fcw_ref[...],
                   preferred_element_type=jnp.float32) + fcb_ref[...])        # fc
    out_ref[...] = out


# --------------------------------- params -----------------------------------
def init_params(key):
    """Per-direction LSTM params in the PyTorch-convention layout (transposed weights)."""
    ks = jax.random.split(key, 16)

    def uni(k, shape, scale):
        return jax.random.uniform(k, shape, jnp.float32, -scale, scale)

    emb = jax.random.normal(ks[0], (VOCAB, EMB), jnp.float32) * 0.1
    emb = emb.at[PAD_IDX].set(0.0)                    # padding_idx row is zero
    params = {'embedding': emb}

    lstm = []
    scale = 1.0 / math.sqrt(HID)
    din = EMB
    ki = 1
    for _layer in range(N_LAYERS):
        layer_p = []
        for _direction in range(2):                   # forward, backward
            wih = uni(ks[ki], (din, 4 * HID), scale); ki += 1   # columns [i, f, g, o]
            whh = uni(ks[ki], (HID, 4 * HID), scale); ki += 1
            b = uni(ks[ki], (1, 4 * HID), scale); ki += 1       # b_ih + b_hh combined
            layer_p.append((wih, whh, b))
        lstm.append(tuple(layer_p))
        din = 2 * HID
    params['lstm'] = lstm

    # Attention vector is nn.Parameter(torch.zeros(2H)) in PyTorch (uniform attention);
    # small random values here so the attention path is exercised non-trivially.
    params['w'] = jax.random.normal(ks[13], (1, 2 * HID), jnp.float32) * 0.1
    params['fc1_w'] = uni(ks[14], (2 * HID, HID2), 1.0 / math.sqrt(2 * HID))
    params['fc1_b'] = jnp.zeros((1, HID2), jnp.float32)
    params['fc_w'] = uni(ks[15], (HID2, OUT), 1.0 / math.sqrt(HID2))
    params['fc_b'] = jnp.zeros((1, OUT), jnp.float32)
    return params


def prepare_fused_params(params):
    """Rearrange per-direction LSTM weights into the fused gate-major layout the
    kernel consumes (done once, on host).

    Column layout over G = 8*HID: [i_f, i_b, f_f, f_b, g_f, g_b, o_f, o_b] (HID each).
    """
    fp = {'embedding': params['embedding']}
    for layer in range(N_LAYERS):
        (wih_f, whh_f, b_f), (wih_b, whh_b, b_b) = params['lstm'][layer]
        din = wih_f.shape[0]
        wf = jnp.zeros((din, G), jnp.float32)
        wb = jnp.zeros((din, G), jnp.float32)
        bias = jnp.zeros((1, G), jnp.float32)
        whh = jnp.zeros((H2, G), jnp.float32)
        for k in range(4):                       # gate index in (i, f, g, o)
            src = slice(k * HID, (k + 1) * HID)
            cf = slice(k * H2, k * H2 + HID)          # fwd column block
            cb = slice(k * H2 + HID, (k + 1) * H2)    # bwd column block
            wf = wf.at[:, cf].set(wih_f[:, src])
            wb = wb.at[:, cb].set(wih_b[:, src])
            bias = bias.at[:, cf].set(b_f[:, src])
            bias = bias.at[:, cb].set(b_b[:, src])
            whh = whh.at[:HID, cf].set(whh_f[:, src])     # h_fwd rows -> fwd gates
            whh = whh.at[HID:, cb].set(whh_b[:, src])     # h_bwd rows -> bwd gates
        fp[f'wf{layer}'] = wf.astype(jnp.bfloat16)
        fp[f'wb{layer}'] = wb.astype(jnp.bfloat16)
        fp[f'b{layer}'] = bias
        fp[f'whh{layer}'] = whh.astype(jnp.bfloat16)
    fp['w_att'] = params['w']
    fp['fc1_w'] = params['fc1_w'].astype(jnp.bfloat16)
    fp['fc1_b'] = params['fc1_b']
    fp['fc_w'] = params['fc_w'].astype(jnp.bfloat16)
    fp['fc_b'] = params['fc_b']
    return fp


# --------------------------------- forward ----------------------------------
@jax.jit
def rnn_atts_forward(x_tokens, fp):
    # time-major flattened token ids: row t*B + b  <-  x[b, t]
    ids_tm = x_tokens.T.reshape(S * B, 1).astype(jnp.int32)
    return pl.pallas_call(
        fused_forward_kernel,
        out_shape=jax.ShapeDtypeStruct((B, OUT), jnp.float32),
        in_specs=[_VMEM] * 15,
        out_specs=_VMEM,
        compiler_params=pltpu.CompilerParams(vmem_limit_bytes=8 * 1024 * 1024),
    )(ids_tm, fp['embedding'],
      fp['wf0'], fp['wb0'], fp['b0'], fp['whh0'],
      fp['wf1'], fp['wb1'], fp['b1'], fp['whh1'],
      fp['w_att'], fp['fc1_w'], fp['fc1_b'], fp['fc_w'], fp['fc_b'])


if __name__ == "__main__":
    key = jax.random.PRNGKey(0)
    pkey, xkey = jax.random.split(key)
    params = init_params(pkey)
    fused = prepare_fused_params(params)
    x = jax.random.randint(xkey, (B, S), 0, VOCAB, dtype=jnp.int32)

    out = rnn_atts_forward(x, fused)
    out = jax.block_until_ready(out)
    assert out.shape == (B, OUT) and out.dtype == jnp.float32
    assert bool(jnp.all(jnp.isfinite(out)))
    print("KERNEL_OK")
</pallas_src>

<mosaic_0001>
module attributes {stable_mosaic.version = 11 : i64} {
  func.func @fused_forward_kernel(%arg0: memref<16x1xi32, #tpu.memory_space<vmem>>, %arg1: memref<50x32xf32, #tpu.memory_space<vmem>>, %arg2: memref<32x256xbf16, #tpu.memory_space<vmem>>, %arg3: memref<32x256xbf16, #tpu.memory_space<vmem>>, %arg4: memref<1x256xf32, #tpu.memory_space<vmem>>, %arg5: memref<64x256xbf16, #tpu.memory_space<vmem>>, %arg6: memref<64x256xbf16, #tpu.memory_space<vmem>>, %arg7: memref<64x256xbf16, #tpu.memory_space<vmem>>, %arg8: memref<1x256xf32, #tpu.memory_space<vmem>>, %arg9: memref<64x256xbf16, #tpu.memory_space<vmem>>, %arg10: memref<1x64xf32, #tpu.memory_space<vmem>>, %arg11: memref<64x64xbf16, #tpu.memory_space<vmem>>, %arg12: memref<1x64xf32, #tpu.memory_space<vmem>>, %arg13: memref<64x5xbf16, #tpu.memory_space<vmem>>, %arg14: memref<1x5xf32, #tpu.memory_space<vmem>>, %arg15: memref<2x5xf32, #tpu.memory_space<vmem>>) attributes {dimension_semantics = [], scalar_prefetch = 0 : i64, scratch_operands = 0 : i64, tpu.core_type = #tpu.core_type<tc>} {
    %0 = tpu.iota {dimensions = array<i32: 1>} : vector<16x50xi32>
    %c0 = arith.constant 0 : index
    %c0_0 = arith.constant 0 : index
    %1 = vector.load %arg0[%c0, %c0_0] : memref<16x1xi32, #tpu.memory_space<vmem>>, vector<16x1xi32>
    %2 = vector.broadcast %1 : vector<16x1xi32> to vector<16x50xi32>
    %3 = arith.cmpi eq, %2, %0 : vector<16x50xi32>
    %4 = arith.extui %3 : vector<16x50xi1> to vector<16x50xi32>
    %5 = arith.sitofp %4 : vector<16x50xi32> to vector<16x50xf32>
    %c0_1 = arith.constant 0 : index
    %c0_2 = arith.constant 0 : index
    %6 = vector.load %arg1[%c0_1, %c0_2] : memref<50x32xf32, #tpu.memory_space<vmem>>, vector<50x32xf32>
    %cst = arith.constant dense<0.000000e+00> : vector<16x32xf32>
    %7 = tpu.matmul %5, %6, %cst {dimension_numbers = #tpu.dot_dimension_numbers<[1], [0], [0], [1], [0, 0, 1, 1], [], []>} : vector<16x50xf32>, vector<50x32xf32>, vector<16x32xf32> -> vector<16x32xf32>
    %8 = tpu.iota {dimensions = array<i32: 1>} : vector<2x256xi32>
    %c128_i32 = arith.constant 128 : i32
    %9 = vector.broadcast %c128_i32 : i32 to vector<2x256xi32>
    %10 = arith.cmpi sge, %8, %9 : vector<2x256xi32>
    %c192_i32 = arith.constant 192 : i32
    %11 = vector.broadcast %c192_i32 : i32 to vector<2x256xi32>
    %12 = arith.cmpi slt, %8, %11 : vector<2x256xi32>
    %13 = arith.andi %10, %12 : vector<2x256xi1>
    %c0_3 = arith.constant 0 : index
    %c0_4 = arith.constant 0 : index
    %14 = vector.load %arg2[%c0_3, %c0_4] : memref<32x256xbf16, #tpu.memory_space<vmem>>, vector<32x256xbf16>
    %c0_5 = arith.constant 0 : index
    %c0_6 = arith.constant 0 : index
    %15 = vector.load %arg3[%c0_5, %c0_6] : memref<32x256xbf16, #tpu.memory_space<vmem>>, vector<32x256xbf16>
    %c0_7 = arith.constant 0 : index
    %c0_8 = arith.constant 0 : index
    %16 = vector.load %arg4[%c0_7, %c0_8] : memref<1x256xf32, #tpu.memory_space<vmem>>, vector<1x256xf32>
    %c0_9 = arith.constant 0 : index
    %c0_10 = arith.constant 0 : index
    %17 = vector.load %arg5[%c0_9, %c0_10] : memref<64x256xbf16, #tpu.memory_space<vmem>>, vector<64x256xbf16>
    %18 = arith.truncf %7 : vector<16x32xf32> to vector<16x32xbf16>
    %cst_11 = arith.constant dense<0.000000e+00> : vector<16x256xf32>
    %19 = tpu.matmul %18, %14, %cst_11 {dimension_numbers = #tpu.dot_dimension_numbers<[1], [0], [0], [1], [0, 0, 1, 1], [], []>} : vector<16x32xbf16>, vector<32x256xbf16>, vector<16x256xf32> -> vector<16x256xf32>
    %20 = vector.broadcast %16 : vector<1x256xf32> to vector<16x256xf32>
    %21 = arith.addf %19, %20 : vector<16x256xf32>
    %cst_12 = arith.constant dense<0.000000e+00> : vector<16x256xf32>
    %22 = tpu.matmul %18, %15, %cst_12 {dimension_numbers = #tpu.dot_dimension_numbers<[1], [0], [0], [1], [0, 0, 1, 1], [], []>} : vector<16x32xbf16>, vector<32x256xbf16>, vector<16x256xf32> -> vector<16x256xf32>
    %cst_13 = arith.constant 0.000000e+00 : f32
    %23 = vector.broadcast %cst_13 : f32 to vector<2x64xf32>
    %cst_14 = arith.constant 0.000000e+00 : f32
    %24 = vector.broadcast %cst_14 : f32 to vector<2x64xf32>
    %25 = vector.extract_strided_slice %21 {offsets = [0, 0], sizes = [2, 256], strides = [1, 1]} : vector<16x256xf32> to vector<2x256xf32>
    %26 = vector.extract_strided_slice %22 {offsets = [14, 0], sizes = [2, 256], strides = [1, 1]} : vector<16x256xf32> to vector<2x256xf32>
    %27 = arith.addf %25, %26 : vector<2x256xf32>
    %28 = arith.truncf %23 : vector<2x64xf32> to vector<2x64xbf16>
    %cst_15 = arith.constant dense<0.000000e+00> : vector<2x256xf32>
    %29 = tpu.matmul %28, %17, %cst_15 {dimension_numbers = #tpu.dot_dimension_numbers<[1], [0], [0], [1], [0, 0, 1, 1], [], []>} : vector<2x64xbf16>, vector<64x256xbf16>, vector<2x256xf32> -> vector<2x256xf32>
    %30 = arith.addf %27, %29 : vector<2x256xf32>
    %31 = math.tanh %30 : vector<2x256xf32>
    %32 = arith.negf %30 : vector<2x256xf32>
    %33 = math.exp %32 : vector<2x256xf32>
    %cst_16 = arith.constant 1.000000e+00 : f32
    %34 = vector.broadcast %cst_16 : f32 to vector<2x256xf32>
    %35 = arith.addf %34, %33 : vector<2x256xf32>
    %36 = arith.divf %34, %35 : vector<2x256xf32>
    %37 = arith.select %13, %31, %36 : vector<2x256xi1>, vector<2x256xf32>
    %38 = vector.extract_strided_slice %37 {offsets = [0, 0], sizes = [2, 64], strides = [1, 1]} : vector<2x256xf32> to vector<2x64xf32>
    %39 = vector.extract_strided_slice %37 {offsets = [0, 64], sizes = [2, 64], strides = [1, 1]} : vector<2x256xf32> to vector<2x64xf32>
    %40 = vector.extract_strided_slice %37 {offsets = [0, 128], sizes = [2, 64], strides = [1, 1]} : vector<2x256xf32> to vector<2x64xf32>
    %41 = vector.extract_strided_slice %37 {offsets = [0, 192], sizes = [2, 64], strides = [1, 1]} : vector<2x256xf32> to vector<2x64xf32>
    %42 = arith.mulf %39, %24 : vector<2x64xf32>
    %43 = arith.mulf %38, %40 : vector<2x64xf32>
    %44 = arith.addf %42, %43 : vector<2x64xf32>
    %45 = math.tanh %44 : vector<2x64xf32>
    %46 = arith.mulf %41, %45 : vector<2x64xf32>
    %47 = vector.extract_strided_slice %46 {offsets = [0, 0], sizes = [2, 32], strides = [1, 1]} : vector<2x64xf32> to vector<2x32xf32>
    %48 = vector.extract_strided_slice %46 {offsets = [0, 32], sizes = [2, 32], strides = [1, 1]} : vector<2x64xf32> to vector<2x32xf32>
    %49 = vector.extract_strided_slice %21 {offsets = [2, 0], sizes = [2, 256], strides = [1, 1]} : vector<16x256xf32> to vector<2x256xf32>
    %50 = vector.extract_strided_slice %22 {offsets = [12, 0], sizes = [2, 256], strides = [1, 1]} : vector<16x256xf32> to vector<2x256xf32>
    %51 = arith.addf %49, %50 : vector<2x256xf32>
    %52 = arith.truncf %46 : vector<2x64xf32> to vector<2x64xbf16>
    %cst_17 = arith.constant dense<0.000000e+00> : vector<2x256xf32>
    %53 = tpu.matmul %52, %17, %cst_17 {dimension_numbers = #tpu.dot_dimension_numbers<[1], [0], [0], [1], [0, 0, 1, 1], [], []>} : vector<2x64xbf16>, vector<64x256xbf16>, vector<2x256xf32> -> vector<2x256xf32>
    %54 = arith.addf %51, %53 : vector<2x256xf32>
    %55 = math.tanh %54 : vector<2x256xf32>
    %56 = arith.negf %54 : vector<2x256xf32>
    %57 = math.exp %56 : vector<2x256xf32>
    %cst_18 = arith.constant 1.000000e+00 : f32
    %58 = vector.broadcast %cst_18 : f32 to vector<2x256xf32>
    %59 = arith.addf %58, %57 : vector<2x256xf32>
    %60 = arith.divf %58, %59 : vector<2x256xf32>
    %61 = arith.select %13, %55, %60 : vector<2x256xi1>, vector<2x256xf32>
    %62 = vector.extract_strided_slice %61 {offsets = [0, 0], sizes = [2, 64], strides = [1, 1]} : vector<2x256xf32> to vector<2x64xf32>
    %63 = vector.extract_strided_slice %61 {offsets = [0, 64], sizes = [2, 64], strides = [1, 1]} : vector<2x256xf32> to vector<2x64xf32>
    %64 = vector.extract_strided_slice %61 {offsets = [0, 128], sizes = [2, 64], strides = [1, 1]} : vector<2x256xf32> to vector<2x64xf32>
    %65 = vector.extract_strided_slice %61 {offsets = [0, 192], sizes = [2, 64], strides = [1, 1]} : vector<2x256xf32> to vector<2x64xf32>
    %66 = arith.mulf %63, %44 : vector<2x64xf32>
    %67 = arith.mulf %62, %64 : vector<2x64xf32>
    %68 = arith.addf %66, %67 : vector<2x64xf32>
    %69 = math.tanh %68 : vector<2x64xf32>
    %70 = arith.mulf %65, %69 : vector<2x64xf32>
    %71 = vector.extract_strided_slice %70 {offsets = [0, 0], sizes = [2, 32], strides = [1, 1]} : vector<2x64xf32> to vector<2x32xf32>
    %72 = vector.extract_strided_slice %70 {offsets = [0, 32], sizes = [2, 32], strides = [1, 1]} : vector<2x64xf32> to vector<2x32xf32>
    %73 = vector.extract_strided_slice %21 {offsets = [4, 0], sizes = [2, 256], strides = [1, 1]} : vector<16x256xf32> to vector<2x256xf32>
    %74 = vector.extract_strided_slice %22 {offsets = [10, 0], sizes = [2, 256], strides = [1, 1]} : vector<16x256xf32> to vector<2x256xf32>
    %75 = arith.addf %73, %74 : vector<2x256xf32>
    %76 = arith.truncf %70 : vector<2x64xf32> to vector<2x64xbf16>
    %cst_19 = arith.constant dense<0.000000e+00> : vector<2x256xf32>
    %77 = tpu.matmul %76, %17, %cst_19 {dimension_numbers = #tpu.dot_dimension_numbers<[1], [0], [0], [1], [0, 0, 1, 1], [], []>} : vector<2x64xbf16>, vector<64x256xbf16>, vector<2x256xf32> -> vector<2x256xf32>
    %78 = arith.addf %75, %77 : vector<2x256xf32>
    %79 = math.tanh %78 : vector<2x256xf32>
    %80 = arith.negf %78 : vector<2x256xf32>
    %81 = math.exp %80 : vector<2x256xf32>
    %cst_20 = arith.constant 1.000000e+00 : f32
    %82 = vector.broadcast %cst_20 : f32 to vector<2x256xf32>
    %83 = arith.addf %82, %81 : vector<2x256xf32>
    %84 = arith.divf %82, %83 : vector<2x256xf32>
    %85 = arith.select %13, %79, %84 : vector<2x256xi1>, vector<2x256xf32>
    %86 = vector.extract_strided_slice %85 {offsets = [0, 0], sizes = [2, 64], strides = [1, 1]} : vector<2x256xf32> to vector<2x64xf32>
    %87 = vector.extract_strided_slice %85 {offsets = [0, 64], sizes = [2, 64], strides = [1, 1]} : vector<2x256xf32> to vector<2x64xf32>
    %88 = vector.extract_strided_slice %85 {offsets = [0, 128], sizes = [2, 64], strides = [1, 1]} : vector<2x256xf32> to vector<2x64xf32>
    %89 = vector.extract_strided_slice %85 {offsets = [0, 192], sizes = [2, 64], strides = [1, 1]} : vector<2x256xf32> to vector<2x64xf32>
    %90 = arith.mulf %87, %68 : vector<2x64xf32>
    %91 = arith.mulf %86, %88 : vector<2x64xf32>
    %92 = arith.addf %90, %91 : vector<2x64xf32>
    %93 = math.tanh %92 : vector<2x64xf32>
    %94 = arith.mulf %89, %93 : vector<2x64xf32>
    %95 = vector.extract_strided_slice %94 {offsets = [0, 0], sizes = [2, 32], strides = [1, 1]} : vector<2x64xf32> to vector<2x32xf32>
    %96 = vector.extract_strided_slice %94 {offsets = [0, 32], sizes = [2, 32], strides = [1, 1]} : vector<2x64xf32> to vector<2x32xf32>
    %97 = vector.extract_strided_slice %21 {offsets = [6, 0], sizes = [2, 256], strides = [1, 1]} : vector<16x256xf32> to vector<2x256xf32>
    %98 = vector.extract_strided_slice %22 {offsets = [8, 0], sizes = [2, 256], strides = [1, 1]} : vector<16x256xf32> to vector<2x256xf32>
    %99 = arith.addf %97, %98 : vector<2x256xf32>
    %100 = arith.truncf %94 : vector<2x64xf32> to vector<2x64xbf16>
    %cst_21 = arith.constant dense<0.000000e+00> : vector<2x256xf32>
    %101 = tpu.matmul %100, %17, %cst_21 {dimension_numbers = #tpu.dot_dimension_numbers<[1], [0], [0], [1], [0, 0, 1, 1], [], []>} : vector<2x64xbf16>, vector<64x256xbf16>, vector<2x256xf32> -> vector<2x256xf32>
    %102 = arith.addf %99, %101 : vector<2x256xf32>
    %103 = math.tanh %102 : vector<2x256xf32>
    %104 = arith.negf %102 : vector<2x256xf32>
    %105 = math.exp %104 : vector<2x256xf32>
    %cst_22 = arith.constant 1.000000e+00 : f32
    %106 = vector.broadcast %cst_22 : f32 to vector<2x256xf32>
    %107 = arith.addf %106, %105 : vector<2x256xf32>
    %108 = arith.divf %106, %107 : vector<2x256xf32>
    %109 = arith.select %13, %103, %108 : vector<2x256xi1>, vector<2x256xf32>
    %110 = vector.extract_strided_slice %109 {offsets = [0, 0], sizes = [2, 64], strides = [1, 1]} : vector<2x256xf32> to vector<2x64xf32>
    %111 = vector.extract_strided_slice %109 {offsets = [0, 64], sizes = [2, 64], strides = [1, 1]} : vector<2x256xf32> to vector<2x64xf32>
    %112 = vector.extract_strided_slice %109 {offsets = [0, 128], sizes = [2, 64], strides = [1, 1]} : vector<2x256xf32> to vector<2x64xf32>
    %113 = vector.extract_strided_slice %109 {offsets = [0, 192], sizes = [2, 64], strides = [1, 1]} : vector<2x256xf32> to vector<2x64xf32>
    %114 = arith.mulf %111, %92 : vector<2x64xf32>
    %115 = arith.mulf %110, %112 : vector<2x64xf32>
    %116 = arith.addf %114, %115 : vector<2x64xf32>
    %117 = math.tanh %116 : vector<2x64xf32>
    %118 = arith.mulf %113, %117 : vector<2x64xf32>
    %119 = vector.extract_strided_slice %118 {offsets = [0, 0], sizes = [2, 32], strides = [1, 1]} : vector<2x64xf32> to vector<2x32xf32>
    %120 = vector.extract_strided_slice %118 {offsets = [0, 32], sizes = [2, 32], strides = [1, 1]} : vector<2x64xf32> to vector<2x32xf32>
    %121 = vector.extract_strided_slice %21 {offsets = [8, 0], sizes = [2, 256], strides = [1, 1]} : vector<16x256xf32> to vector<2x256xf32>
    %122 = vector.extract_strided_slice %22 {offsets = [6, 0], sizes = [2, 256], strides = [1, 1]} : vector<16x256xf32> to vector<2x256xf32>
    %123 = arith.addf %121, %122 : vector<2x256xf32>
    %124 = arith.truncf %118 : vector<2x64xf32> to vector<2x64xbf16>
    %cst_23 = arith.constant dense<0.000000e+00> : vector<2x256xf32>
    %125 = tpu.matmul %124, %17, %cst_23 {dimension_numbers = #tpu.dot_dimension_numbers<[1], [0], [0], [1], [0, 0, 1, 1], [], []>} : vector<2x64xbf16>, vector<64x256xbf16>, vector<2x256xf32> -> vector<2x256xf32>
    %126 = arith.addf %123, %125 : vector<2x256xf32>
    %127 = math.tanh %126 : vector<2x256xf32>
    %128 = arith.negf %126 : vector<2x256xf32>
    %129 = math.exp %128 : vector<2x256xf32>
    %cst_24 = arith.constant 1.000000e+00 : f32
    %130 = vector.broadcast %cst_24 : f32 to vector<2x256xf32>
    %131 = arith.addf %130, %129 : vector<2x256xf32>
    %132 = arith.divf %130, %131 : vector<2x256xf32>
    %133 = arith.select %13, %127, %132 : vector<2x256xi1>, vector<2x256xf32>
    %134 = vector.extract_strided_slice %133 {offsets = [0, 0], sizes = [2, 64], strides = [1, 1]} : vector<2x256xf32> to vector<2x64xf32>
    %135 = vector.extract_strided_slice %133 {offsets = [0, 64], sizes = [2, 64], strides = [1, 1]} : vector<2x256xf32> to vector<2x64xf32>
    %136 = vector.extract_strided_slice %133 {offsets = [0, 128], sizes = [2, 64], strides = [1, 1]} : vector<2x256xf32> to vector<2x64xf32>
    %137 = vector.extract_strided_slice %133 {offsets = [0, 192], sizes = [2, 64], strides = [1, 1]} : vector<2x256xf32> to vector<2x64xf32>
    %138 = arith.mulf %135, %116 : vector<2x64xf32>
    %139 = arith.mulf %134, %136 : vector<2x64xf32>
    %140 = arith.addf %138, %139 : vector<2x64xf32>
    %141 = math.tanh %140 : vector<2x64xf32>
    %142 = arith.mulf %137, %141 : vector<2x64xf32>
    %143 = vector.extract_strided_slice %142 {offsets = [0, 0], sizes = [2, 32], strides = [1, 1]} : vector<2x64xf32> to vector<2x32xf32>
    %144 = vector.extract_strided_slice %142 {offsets = [0, 32], sizes = [2, 32], strides = [1, 1]} : vector<2x64xf32> to vector<2x32xf32>
    %145 = vector.extract_strided_slice %21 {offsets = [10, 0], sizes = [2, 256], strides = [1, 1]} : vector<16x256xf32> to vector<2x256xf32>
    %146 = vector.extract_strided_slice %22 {offsets = [4, 0], sizes = [2, 256], strides = [1, 1]} : vector<16x256xf32> to vector<2x256xf32>
    %147 = arith.addf %145, %146 : vector<2x256xf32>
    %148 = arith.truncf %142 : vector<2x64xf32> to vector<2x64xbf16>
    %cst_25 = arith.constant dense<0.000000e+00> : vector<2x256xf32>
    %149 = tpu.matmul %148, %17, %cst_25 {dimension_numbers = #tpu.dot_dimension_numbers<[1], [0], [0], [1], [0, 0, 1, 1], [], []>} : vector<2x64xbf16>, vector<64x256xbf16>, vector<2x256xf32> -> vector<2x256xf32>
    %150 = arith.addf %147, %149 : vector<2x256xf32>
    %151 = math.tanh %150 : vector<2x256xf32>
    %152 = arith.negf %150 : vector<2x256xf32>
    %153 = math.exp %152 : vector<2x256xf32>
    %cst_26 = arith.constant 1.000000e+00 : f32
    %154 = vector.broadcast %cst_26 : f32 to vector<2x256xf32>
    %155 = arith.addf %154, %153 : vector<2x256xf32>
    %156 = arith.divf %154, %155 : vector<2x256xf32>
    %157 = arith.select %13, %151, %156 : vector<2x256xi1>, vector<2x256xf32>
    %158 = vector.extract_strided_slice %157 {offsets = [0, 0], sizes = [2, 64], strides = [1, 1]} : vector<2x256xf32> to vector<2x64xf32>
    %159 = vector.extract_strided_slice %157 {offsets = [0, 64], sizes = [2, 64], strides = [1, 1]} : vector<2x256xf32> to vector<2x64xf32>
    %160 = vector.extract_strided_slice %157 {offsets = [0, 128], sizes = [2, 64], strides = [1, 1]} : vector<2x256xf32> to vector<2x64xf32>
    %161 = vector.extract_strided_slice %157 {offsets = [0, 192], sizes = [2, 64], strides = [1, 1]} : vector<2x256xf32> to vector<2x64xf32>
    %162 = arith.mulf %159, %140 : vector<2x64xf32>
    %163 = arith.mulf %158, %160 : vector<2x64xf32>
    %164 = arith.addf %162, %163 : vector<2x64xf32>
    %165 = math.tanh %164 : vector<2x64xf32>
    %166 = arith.mulf %161, %165 : vector<2x64xf32>
    %167 = vector.extract_strided_slice %166 {offsets = [0, 0], sizes = [2, 32], strides = [1, 1]} : vector<2x64xf32> to vector<2x32xf32>
    %168 = vector.extract_strided_slice %166 {offsets = [0, 32], sizes = [2, 32], strides = [1, 1]} : vector<2x64xf32> to vector<2x32xf32>
    %169 = vector.extract_strided_slice %21 {offsets = [12, 0], sizes = [2, 256], strides = [1, 1]} : vector<16x256xf32> to vector<2x256xf32>
    %170 = vector.extract_strided_slice %22 {offsets = [2, 0], sizes = [2, 256], strides = [1, 1]} : vector<16x256xf32> to vector<2x256xf32>
    %171 = arith.addf %169, %170 : vector<2x256xf32>
    %172 = arith.truncf %166 : vector<2x64xf32> to vector<2x64xbf16>
    %cst_27 = arith.constant dense<0.000000e+00> : vector<2x256xf32>
    %173 = tpu.matmul %172, %17, %cst_27 {dimension_numbers = #tpu.dot_dimension_numbers<[1], [0], [0], [1], [0, 0, 1, 1], [], []>} : vector<2x64xbf16>, vector<64x256xbf16>, vector<2x256xf32> -> vector<2x256xf32>
    %174 = arith.addf %171, %173 : vector<2x256xf32>
    %175 = math.tanh %174 : vector<2x256xf32>
    %176 = arith.negf %174 : vector<2x256xf32>
    %177 = math.exp %176 : vector<2x256xf32>
    %cst_28 = arith.constant 1.000000e+00 : f32
    %178 = vector.broadcast %cst_28 : f32 to vector<2x256xf32>
    %179 = arith.addf %178, %177 : vector<2x256xf32>
    %180 = arith.divf %178, %179 : vector<2x256xf32>
    %181 = arith.select %13, %175, %180 : vector<2x256xi1>, vector<2x256xf32>
    %182 = vector.extract_strided_slice %181 {offsets = [0, 0], sizes = [2, 64], strides = [1, 1]} : vector<2x256xf32> to vector<2x64xf32>
    %183 = vector.extract_strided_slice %181 {offsets = [0, 64], sizes = [2, 64], strides = [1, 1]} : vector<2x256xf32> to vector<2x64xf32>
    %184 = vector.extract_strided_slice %181 {offsets = [0, 128], sizes = [2, 64], strides = [1, 1]} : vector<2x256xf32> to vector<2x64xf32>
    %185 = vector.extract_strided_slice %181 {offsets = [0, 192], sizes = [2, 64], strides = [1, 1]} : vector<2x256xf32> to vector<2x64xf32>
    %186 = arith.mulf %183, %164 : vector<2x64xf32>
    %187 = arith.mulf %182, %184 : vector<2x64xf32>
    %188 = arith.addf %186, %187 : vector<2x64xf32>
    %189 = math.tanh %188 : vector<2x64xf32>
    %190 = arith.mulf %185, %189 : vector<2x64xf32>
    %191 = vector.extract_strided_slice %190 {offsets = [0, 0], sizes = [2, 32], strides = [1, 1]} : vector<2x64xf32> to vector<2x32xf32>
    %192 = vector.extract_strided_slice %190 {offsets = [0, 32], sizes = [2, 32], strides = [1, 1]} : vector<2x64xf32> to vector<2x32xf32>
    %193 = vector.extract_strided_slice %21 {offsets = [14, 0], sizes = [2, 256], strides = [1, 1]} : vector<16x256xf32> to vector<2x256xf32>
    %194 = vector.extract_strided_slice %22 {offsets = [0, 0], sizes = [2, 256], strides = [1, 1]} : vector<16x256xf32> to vector<2x256xf32>
    %195 = arith.addf %193, %194 : vector<2x256xf32>
    %196 = arith.truncf %190 : vector<2x64xf32> to vector<2x64xbf16>
    %cst_29 = arith.constant dense<0.000000e+00> : vector<2x256xf32>
    %197 = tpu.matmul %196, %17, %cst_29 {dimension_numbers = #tpu.dot_dimension_numbers<[1], [0], [0], [1], [0, 0, 1, 1], [], []>} : vector<2x64xbf16>, vector<64x256xbf16>, vector<2x256xf32> -> vector<2x256xf32>
    %198 = arith.addf %195, %197 : vector<2x256xf32>
    %199 = math.tanh %198 : vector<2x256xf32>
    %200 = arith.negf %198 : vector<2x256xf32>
    %201 = math.exp %200 : vector<2x256xf32>
    %cst_30 = arith.constant 1.000000e+00 : f32
    %202 = vector.broadcast %cst_30 : f32 to vector<2x256xf32>
    %203 = arith.addf %202, %201 : vector<2x256xf32>
    %204 = arith.divf %202, %203 : vector<2x256xf32>
    %205 = arith.select %13, %199, %204 : vector<2x256xi1>, vector<2x256xf32>
    %206 = vector.extract_strided_slice %205 {offsets = [0, 0], sizes = [2, 64], strides = [1, 1]} : vector<2x256xf32> to vector<2x64xf32>
    %207 = vector.extract_strided_slice %205 {offsets = [0, 64], sizes = [2, 64], strides = [1, 1]} : vector<2x256xf32> to vector<2x64xf32>
    %208 = vector.extract_strided_slice %205 {offsets = [0, 128], sizes = [2, 64], strides = [1, 1]} : vector<2x256xf32> to vector<2x64xf32>
    %209 = vector.extract_strided_slice %205 {offsets = [0, 192], sizes = [2, 64], strides = [1, 1]} : vector<2x256xf32> to vector<2x64xf32>
    %210 = arith.mulf %207, %188 : vector<2x64xf32>
    %211 = arith.mulf %206, %208 : vector<2x64xf32>
    %212 = arith.addf %210, %211 : vector<2x64xf32>
    %213 = math.tanh %212 : vector<2x64xf32>
    %214 = arith.mulf %209, %213 : vector<2x64xf32>
    %215 = vector.extract_strided_slice %214 {offsets = [0, 0], sizes = [2, 32], strides = [1, 1]} : vector<2x64xf32> to vector<2x32xf32>
    %216 = vector.extract_strided_slice %214 {offsets = [0, 32], sizes = [2, 32], strides = [1, 1]} : vector<2x64xf32> to vector<2x32xf32>
    %217 = tpu.concatenate %47, %216 in 1 : vector<2x32xf32>, vector<2x32xf32> -> vector<2x64xf32>
    %218 = tpu.concatenate %71, %192 in 1 : vector<2x32xf32>, vector<2x32xf32> -> vector<2x64xf32>
    %219 = tpu.concatenate %95, %168 in 1 : vector<2x32xf32>, vector<2x32xf32> -> vector<2x64xf32>
    %220 = tpu.concatenate %119, %144 in 1 : vector<2x32xf32>, vector<2x32xf32> -> vector<2x64xf32>
    %221 = tpu.concatenate %143, %120 in 1 : vector<2x32xf32>, vector<2x32xf32> -> vector<2x64xf32>
    %222 = tpu.concatenate %167, %96 in 1 : vector<2x32xf32>, vector<2x32xf32> -> vector<2x64xf32>
    %223 = tpu.concatenate %191, %72 in 1 : vector<2x32xf32>, vector<2x32xf32> -> vector<2x64xf32>
    %224 = tpu.concatenate %215, %48 in 1 : vector<2x32xf32>, vector<2x32xf32> -> vector<2x64xf32>
    %225 = tpu.concatenate %217, %218, %219, %220, %221, %222, %223, %224 in 0 : vector<2x64xf32>, vector<2x64xf32>, vector<2x64xf32>, vector<2x64xf32>, vector<2x64xf32>, vector<2x64xf32>, vector<2x64xf32>, vector<2x64xf32> -> vector<16x64xf32>
    %c0_31 = arith.constant 0 : index
    %c0_32 = arith.constant 0 : index
    %226 = vector.load %arg6[%c0_31, %c0_32] : memref<64x256xbf16, #tpu.memory_space<vmem>>, vector<64x256xbf16>
    %c0_33 = arith.constant 0 : index
    %c0_34 = arith.constant 0 : index
    %227 = vector.load %arg7[%c0_33, %c0_34] : memref<64x256xbf16, #tpu.memory_space<vmem>>, vector<64x256xbf16>
    %c0_35 = arith.constant 0 : index
    %c0_36 = arith.constant 0 : index
    %228 = vector.load %arg8[%c0_35, %c0_36] : memref<1x256xf32, #tpu.memory_space<vmem>>, vector<1x256xf32>
    %c0_37 = arith.constant 0 : index
    %c0_38 = arith.constant 0 : index
    %229 = vector.load %arg9[%c0_37, %c0_38] : memref<64x256xbf16, #tpu.memory_space<vmem>>, vector<64x256xbf16>
    %230 = arith.truncf %225 : vector<16x64xf32> to vector<16x64xbf16>
    %cst_39 = arith.constant dense<0.000000e+00> : vector<16x256xf32>
    %231 = tpu.matmul %230, %226, %cst_39 {dimension_numbers = #tpu.dot_dimension_numbers<[1], [0], [0], [1], [0, 0, 1, 1], [], []>} : vector<16x64xbf16>, vector<64x256xbf16>, vector<16x256xf32> -> vector<16x256xf32>
    %232 = vector.broadcast %228 : vector<1x256xf32> to vector<16x256xf32>
    %233 = arith.addf %231, %232 : vector<16x256xf32>
    %cst_40 = arith.constant dense<0.000000e+00> : vector<16x256xf32>
    %234 = tpu.matmul %230, %227, %cst_40 {dimension_numbers = #tpu.dot_dimension_numbers<[1], [0], [0], [1], [0, 0, 1, 1], [], []>} : vector<16x64xbf16>, vector<64x256xbf16>, vector<16x256xf32> -> vector<16x256xf32>
    %cst_41 = arith.constant 0.000000e+00 : f32
    %235 = vector.broadcast %cst_41 : f32 to vector<2x64xf32>
    %cst_42 = arith.constant 0.000000e+00 : f32
    %236 = vector.broadcast %cst_42 : f32 to vector<2x64xf32>
    %237 = vector.extract_strided_slice %233 {offsets = [0, 0], sizes = [2, 256], strides = [1, 1]} : vector<16x256xf32> to vector<2x256xf32>
    %238 = vector.extract_strided_slice %234 {offsets = [14, 0], sizes = [2, 256], strides = [1, 1]} : vector<16x256xf32> to vector<2x256xf32>
    %239 = arith.addf %237, %238 : vector<2x256xf32>
    %240 = arith.truncf %235 : vector<2x64xf32> to vector<2x64xbf16>
    %cst_43 = arith.constant dense<0.000000e+00> : vector<2x256xf32>
    %241 = tpu.matmul %240, %229, %cst_43 {dimension_numbers = #tpu.dot_dimension_numbers<[1], [0], [0], [1], [0, 0, 1, 1], [], []>} : vector<2x64xbf16>, vector<64x256xbf16>, vector<2x256xf32> -> vector<2x256xf32>
    %242 = arith.addf %239, %241 : vector<2x256xf32>
    %243 = math.tanh %242 : vector<2x256xf32>
    %244 = arith.negf %242 : vector<2x256xf32>
    %245 = math.exp %244 : vector<2x256xf32>
    %cst_44 = arith.constant 1.000000e+00 : f32
    %246 = vector.broadcast %cst_44 : f32 to vector<2x256xf32>
    %247 = arith.addf %246, %245 : vector<2x256xf32>
    %248 = arith.divf %246, %247 : vector<2x256xf32>
    %249 = arith.select %13, %243, %248 : vector<2x256xi1>, vector<2x256xf32>
    %250 = vector.extract_strided_slice %249 {offsets = [0, 0], sizes = [2, 64], strides = [1, 1]} : vector<2x256xf32> to vector<2x64xf32>
    %251 = vector.extract_strided_slice %249 {offsets = [0, 64], sizes = [2, 64], strides = [1, 1]} : vector<2x256xf32> to vector<2x64xf32>
    %252 = vector.extract_strided_slice %249 {offsets = [0, 128], sizes = [2, 64], strides = [1, 1]} : vector<2x256xf32> to vector<2x64xf32>
    %253 = vector.extract_strided_slice %249 {offsets = [0, 192], sizes = [2, 64], strides = [1, 1]} : vector<2x256xf32> to vector<2x64xf32>
    %254 = arith.mulf %251, %236 : vector<2x64xf32>
    %255 = arith.mulf %250, %252 : vector<2x64xf32>
    %256 = arith.addf %254, %255 : vector<2x64xf32>
    %257 = math.tanh %256 : vector<2x64xf32>
    %258 = arith.mulf %253, %257 : vector<2x64xf32>
    %259 = vector.extract_strided_slice %258 {offsets = [0, 0], sizes = [2, 32], strides = [1, 1]} : vector<2x64xf32> to vector<2x32xf32>
    %260 = vector.extract_strided_slice %258 {offsets = [0, 32], sizes = [2, 32], strides = [1, 1]} : vector<2x64xf32> to vector<2x32xf32>
    %261 = vector.extract_strided_slice %233 {offsets = [2, 0], sizes = [2, 256], strides = [1, 1]} : vector<16x256xf32> to vector<2x256xf32>
    %262 = vector.extract_strided_slice %234 {offsets = [12, 0], sizes = [2, 256], strides = [1, 1]} : vector<16x256xf32> to vector<2x256xf32>
    %263 = arith.addf %261, %262 : vector<2x256xf32>
    %264 = arith.truncf %258 : vector<2x64xf32> to vector<2x64xbf16>
    %cst_45 = arith.constant dense<0.000000e+00> : vector<2x256xf32>
    %265 = tpu.matmul %264, %229, %cst_45 {dimension_numbers = #tpu.dot_dimension_numbers<[1], [0], [0], [1], [0, 0, 1, 1], [], []>} : vector<2x64xbf16>, vector<64x256xbf16>, vector<2x256xf32> -> vector<2x256xf32>
    %266 = arith.addf %263, %265 : vector<2x256xf32>
    %267 = math.tanh %266 : vector<2x256xf32>
    %268 = arith.negf %266 : vector<2x256xf32>
    %269 = math.exp %268 : vector<2x256xf32>
    %cst_46 = arith.constant 1.000000e+00 : f32
    %270 = vector.broadcast %cst_46 : f32 to vector<2x256xf32>
    %271 = arith.addf %270, %269 : vector<2x256xf32>
    %272 = arith.divf %270, %271 : vector<2x256xf32>
    %273 = arith.select %13, %267, %272 : vector<2x256xi1>, vector<2x256xf32>
    %274 = vector.extract_strided_slice %273 {offsets = [0, 0], sizes = [2, 64], strides = [1, 1]} : vector<2x256xf32> to vector<2x64xf32>
    %275 = vector.extract_strided_slice %273 {offsets = [0, 64], sizes = [2, 64], strides = [1, 1]} : vector<2x256xf32> to vector<2x64xf32>
    %276 = vector.extract_strided_slice %273 {offsets = [0, 128], sizes = [2, 64], strides = [1, 1]} : vector<2x256xf32> to vector<2x64xf32>
    %277 = vector.extract_strided_slice %273 {offsets = [0, 192], sizes = [2, 64], strides = [1, 1]} : vector<2x256xf32> to vector<2x64xf32>
    %278 = arith.mulf %275, %256 : vector<2x64xf32>
    %279 = arith.mulf %274, %276 : vector<2x64xf32>
    %280 = arith.addf %278, %279 : vector<2x64xf32>
    %281 = math.tanh %280 : vector<2x64xf32>
    %282 = arith.mulf %277, %281 : vector<2x64xf32>
    %283 = vector.extract_strided_slice %282 {offsets = [0, 0], sizes = [2, 32], strides = [1, 1]} : vector<2x64xf32> to vector<2x32xf32>
    %284 = vector.extract_strided_slice %282 {offsets = [0, 32], sizes = [2, 32], strides = [1, 1]} : vector<2x64xf32> to vector<2x32xf32>
    %285 = vector.extract_strided_slice %233 {offsets = [4, 0], sizes = [2, 256], strides = [1, 1]} : vector<16x256xf32> to vector<2x256xf32>
    %286 = vector.extract_strided_slice %234 {offsets = [10, 0], sizes = [2, 256], strides = [1, 1]} : vector<16x256xf32> to vector<2x256xf32>
    %287 = arith.addf %285, %286 : vector<2x256xf32>
    %288 = arith.truncf %282 : vector<2x64xf32> to vector<2x64xbf16>
    %cst_47 = arith.constant dense<0.000000e+00> : vector<2x256xf32>
    %289 = tpu.matmul %288, %229, %cst_47 {dimension_numbers = #tpu.dot_dimension_numbers<[1], [0], [0], [1], [0, 0, 1, 1], [], []>} : vector<2x64xbf16>, vector<64x256xbf16>, vector<2x256xf32> -> vector<2x256xf32>
    %290 = arith.addf %287, %289 : vector<2x256xf32>
    %291 = math.tanh %290 : vector<2x256xf32>
    %292 = arith.negf %290 : vector<2x256xf32>
    %293 = math.exp %292 : vector<2x256xf32>
    %cst_48 = arith.constant 1.000000e+00 : f32
    %294 = vector.broadcast %cst_48 : f32 to vector<2x256xf32>
    %295 = arith.addf %294, %293 : vector<2x256xf32>
    %296 = arith.divf %294, %295 : vector<2x256xf32>
    %297 = arith.select %13, %291, %296 : vector<2x256xi1>, vector<2x256xf32>
    %298 = vector.extract_strided_slice %297 {offsets = [0, 0], sizes = [2, 64], strides = [1, 1]} : vector<2x256xf32> to vector<2x64xf32>
    %299 = vector.extract_strided_slice %297 {offsets = [0, 64], sizes = [2, 64], strides = [1, 1]} : vector<2x256xf32> to vector<2x64xf32>
    %300 = vector.extract_strided_slice %297 {offsets = [0, 128], sizes = [2, 64], strides = [1, 1]} : vector<2x256xf32> to vector<2x64xf32>
    %301 = vector.extract_strided_slice %297 {offsets = [0, 192], sizes = [2, 64], strides = [1, 1]} : vector<2x256xf32> to vector<2x64xf32>
    %302 = arith.mulf %299, %280 : vector<2x64xf32>
    %303 = arith.mulf %298, %300 : vector<2x64xf32>
    %304 = arith.addf %302, %303 : vector<2x64xf32>
    %305 = math.tanh %304 : vector<2x64xf32>
    %306 = arith.mulf %301, %305 : vector<2x64xf32>
    %307 = vector.extract_strided_slice %306 {offsets = [0, 0], sizes = [2, 32], strides = [1, 1]} : vector<2x64xf32> to vector<2x32xf32>
    %308 = vector.extract_strided_slice %306 {offsets = [0, 32], sizes = [2, 32], strides = [1, 1]} : vector<2x64xf32> to vector<2x32xf32>
    %309 = vector.extract_strided_slice %233 {offsets = [6, 0], sizes = [2, 256], strides = [1, 1]} : vector<16x256xf32> to vector<2x256xf32>
    %310 = vector.extract_strided_slice %234 {offsets = [8, 0], sizes = [2, 256], strides = [1, 1]} : vector<16x256xf32> to vector<2x256xf32>
    %311 = arith.addf %309, %310 : vector<2x256xf32>
    %312 = arith.truncf %306 : vector<2x64xf32> to vector<2x64xbf16>
    %cst_49 = arith.constant dense<0.000000e+00> : vector<2x256xf32>
    %313 = tpu.matmul %312, %229, %cst_49 {dimension_numbers = #tpu.dot_dimension_numbers<[1], [0], [0], [1], [0, 0, 1, 1], [], []>} : vector<2x64xbf16>, vector<64x256xbf16>, vector<2x256xf32> -> vector<2x256xf32>
    %314 = arith.addf %311, %313 : vector<2x256xf32>
    %315 = math.tanh %314 : vector<2x256xf32>
    %316 = arith.negf %314 : vector<2x256xf32>
    %317 = math.exp %316 : vector<2x256xf32>
    %cst_50 = arith.constant 1.000000e+00 : f32
    %318 = vector.broadcast %cst_50 : f32 to vector<2x256xf32>
    %319 = arith.addf %318, %317 : vector<2x256xf32>
    %320 = arith.divf %318, %319 : vector<2x256xf32>
    %321 = arith.select %13, %315, %320 : vector<2x256xi1>, vector<2x256xf32>
    %322 = vector.extract_strided_slice %321 {offsets = [0, 0], sizes = [2, 64], strides = [1, 1]} : vector<2x256xf32> to vector<2x64xf32>
    %323 = vector.extract_strided_slice %321 {offsets = [0, 64], sizes = [2, 64], strides = [1, 1]} : vector<2x256xf32> to vector<2x64xf32>
    %324 = vector.extract_strided_slice %321 {offsets = [0, 128], sizes = [2, 64], strides = [1, 1]} : vector<2x256xf32> to vector<2x64xf32>
    %325 = vector.extract_strided_slice %321 {offsets = [0, 192], sizes = [2, 64], strides = [1, 1]} : vector<2x256xf32> to vector<2x64xf32>
    %326 = arith.mulf %323, %304 : vector<2x64xf32>
    %327 = arith.mulf %322, %324 : vector<2x64xf32>
    %328 = arith.addf %326, %327 : vector<2x64xf32>
    %329 = math.tanh %328 : vector<2x64xf32>
    %330 = arith.mulf %325, %329 : vector<2x64xf32>
    %331 = vector.extract_strided_slice %330 {offsets = [0, 0], sizes = [2, 32], strides = [1, 1]} : vector<2x64xf32> to vector<2x32xf32>
    %332 = vector.extract_strided_slice %330 {offsets = [0, 32], sizes = [2, 32], strides = [1, 1]} : vector<2x64xf32> to vector<2x32xf32>
    %333 = vector.extract_strided_slice %233 {offsets = [8, 0], sizes = [2, 256], strides = [1, 1]} : vector<16x256xf32> to vector<2x256xf32>
    %334 = vector.extract_strided_slice %234 {offsets = [6, 0], sizes = [2, 256], strides = [1, 1]} : vector<16x256xf32> to vector<2x256xf32>
    %335 = arith.addf %333, %334 : vector<2x256xf32>
    %336 = arith.truncf %330 : vector<2x64xf32> to vector<2x64xbf16>
    %cst_51 = arith.constant dense<0.000000e+00> : vector<2x256xf32>
    %337 = tpu.matmul %336, %229, %cst_51 {dimension_numbers = #tpu.dot_dimension_numbers<[1], [0], [0], [1], [0, 0, 1, 1], [], []>} : vector<2x64xbf16>, vector<64x256xbf16>, vector<2x256xf32> -> vector<2x256xf32>
    %338 = arith.addf %335, %337 : vector<2x256xf32>
    %339 = math.tanh %338 : vector<2x256xf32>
    %340 = arith.negf %338 : vector<2x256xf32>
    %341 = math.exp %340 : vector<2x256xf32>
    %cst_52 = arith.constant 1.000000e+00 : f32
    %342 = vector.broadcast %cst_52 : f32 to vector<2x256xf32>
    %343 = arith.addf %342, %341 : vector<2x256xf32>
    %344 = arith.divf %342, %343 : vector<2x256xf32>
    %345 = arith.select %13, %339, %344 : vector<2x256xi1>, vector<2x256xf32>
    %346 = vector.extract_strided_slice %345 {offsets = [0, 0], sizes = [2, 64], strides = [1, 1]} : vector<2x256xf32> to vector<2x64xf32>
    %347 = vector.extract_strided_slice %345 {offsets = [0, 64], sizes = [2, 64], strides = [1, 1]} : vector<2x256xf32> to vector<2x64xf32>
    %348 = vector.extract_strided_slice %345 {offsets = [0, 128], sizes = [2, 64], strides = [1, 1]} : vector<2x256xf32> to vector<2x64xf32>
    %349 = vector.extract_strided_slice %345 {offsets = [0, 192], sizes = [2, 64], strides = [1, 1]} : vector<2x256xf32> to vector<2x64xf32>
    %350 = arith.mulf %347, %328 : vector<2x64xf32>
    %351 = arith.mulf %346, %348 : vector<2x64xf32>
    %352 = arith.addf %350, %351 : vector<2x64xf32>
    %353 = math.tanh %352 : vector<2x64xf32>
    %354 = arith.mulf %349, %353 : vector<2x64xf32>
    %355 = vector.extract_strided_slice %354 {offsets = [0, 0], sizes = [2, 32], strides = [1, 1]} : vector<2x64xf32> to vector<2x32xf32>
    %356 = vector.extract_strided_slice %354 {offsets = [0, 32], sizes = [2, 32], strides = [1, 1]} : vector<2x64xf32> to vector<2x32xf32>
    %357 = vector.extract_strided_slice %233 {offsets = [10, 0], sizes = [2, 256], strides = [1, 1]} : vector<16x256xf32> to vector<2x256xf32>
    %358 = vector.extract_strided_slice %234 {offsets = [4, 0], sizes = [2, 256], strides = [1, 1]} : vector<16x256xf32> to vector<2x256xf32>
    %359 = arith.addf %357, %358 : vector<2x256xf32>
    %360 = arith.truncf %354 : vector<2x64xf32> to vector<2x64xbf16>
    %cst_53 = arith.constant dense<0.000000e+00> : vector<2x256xf32>
    %361 = tpu.matmul %360, %229, %cst_53 {dimension_numbers = #tpu.dot_dimension_numbers<[1], [0], [0], [1], [0, 0, 1, 1], [], []>} : vector<2x64xbf16>, vector<64x256xbf16>, vector<2x256xf32> -> vector<2x256xf32>
    %362 = arith.addf %359, %361 : vector<2x256xf32>
    %363 = math.tanh %362 : vector<2x256xf32>
    %364 = arith.negf %362 : vector<2x256xf32>
    %365 = math.exp %364 : vector<2x256xf32>
    %cst_54 = arith.constant 1.000000e+00 : f32
    %366 = vector.broadcast %cst_54 : f32 to vector<2x256xf32>
    %367 = arith.addf %366, %365 : vector<2x256xf32>
    %368 = arith.divf %366, %367 : vector<2x256xf32>
    %369 = arith.select %13, %363, %368 : vector<2x256xi1>, vector<2x256xf32>
    %370 = vector.extract_strided_slice %369 {offsets = [0, 0], sizes = [2, 64], strides = [1, 1]} : vector<2x256xf32> to vector<2x64xf32>
    %371 = vector.extract_strided_slice %369 {offsets = [0, 64], sizes = [2, 64], strides = [1, 1]} : vector<2x256xf32> to vector<2x64xf32>
    %372 = vector.extract_strided_slice %369 {offsets = [0, 128], sizes = [2, 64], strides = [1, 1]} : vector<2x256xf32> to vector<2x64xf32>
    %373 = vector.extract_strided_slice %369 {offsets = [0, 192], sizes = [2, 64], strides = [1, 1]} : vector<2x256xf32> to vector<2x64xf32>
    %374 = arith.mulf %371, %352 : vector<2x64xf32>
    %375 = arith.mulf %370, %372 : vector<2x64xf32>
    %376 = arith.addf %374, %375 : vector<2x64xf32>
    %377 = math.tanh %376 : vector<2x64xf32>
    %378 = arith.mulf %373, %377 : vector<2x64xf32>
    %379 = vector.extract_strided_slice %378 {offsets = [0, 0], sizes = [2, 32], strides = [1, 1]} : vector<2x64xf32> to vector<2x32xf32>
    %380 = vector.extract_strided_slice %378 {offsets = [0, 32], sizes = [2, 32], strides = [1, 1]} : vector<2x64xf32> to vector<2x32xf32>
    %381 = vector.extract_strided_slice %233 {offsets = [12, 0], sizes = [2, 256], strides = [1, 1]} : vector<16x256xf32> to vector<2x256xf32>
    %382 = vector.extract_strided_slice %234 {offsets = [2, 0], sizes = [2, 256], strides = [1, 1]} : vector<16x256xf32> to vector<2x256xf32>
    %383 = arith.addf %381, %382 : vector<2x256xf32>
    %384 = arith.truncf %378 : vector<2x64xf32> to vector<2x64xbf16>
    %cst_55 = arith.constant dense<0.000000e+00> : vector<2x256xf32>
    %385 = tpu.matmul %384, %229, %cst_55 {dimension_numbers = #tpu.dot_dimension_numbers<[1], [0], [0], [1], [0, 0, 1, 1], [], []>} : vector<2x64xbf16>, vector<64x256xbf16>, vector<2x256xf32> -> vector<2x256xf32>
    %386 = arith.addf %383, %385 : vector<2x256xf32>
    %387 = math.tanh %386 : vector<2x256xf32>
    %388 = arith.negf %386 : vector<2x256xf32>
    %389 = math.exp %388 : vector<2x256xf32>
    %cst_56 = arith.constant 1.000000e+00 : f32
    %390 = vector.broadcast %cst_56 : f32 to vector<2x256xf32>
    %391 = arith.addf %390, %389 : vector<2x256xf32>
    %392 = arith.divf %390, %391 : vector<2x256xf32>
    %393 = arith.select %13, %387, %392 : vector<2x256xi1>, vector<2x256xf32>
    %394 = vector.extract_strided_slice %393 {offsets = [0, 0], sizes = [2, 64], strides = [1, 1]} : vector<2x256xf32> to vector<2x64xf32>
    %395 = vector.extract_strided_slice %393 {offsets = [0, 64], sizes = [2, 64], strides = [1, 1]} : vector<2x256xf32> to vector<2x64xf32>
    %396 = vector.extract_strided_slice %393 {offsets = [0, 128], sizes = [2, 64], strides = [1, 1]} : vector<2x256xf32> to vector<2x64xf32>
    %397 = vector.extract_strided_slice %393 {offsets = [0, 192], sizes = [2, 64], strides = [1, 1]} : vector<2x256xf32> to vector<2x64xf32>
    %398 = arith.mulf %395, %376 : vector<2x64xf32>
    %399 = arith.mulf %394, %396 : vector<2x64xf32>
    %400 = arith.addf %398, %399 : vector<2x64xf32>
    %401 = math.tanh %400 : vector<2x64xf32>
    %402 = arith.mulf %397, %401 : vector<2x64xf32>
    %403 = vector.extract_strided_slice %402 {offsets = [0, 0], sizes = [2, 32], strides = [1, 1]} : vector<2x64xf32> to vector<2x32xf32>
    %404 = vector.extract_strided_slice %402 {offsets = [0, 32], sizes = [2, 32], strides = [1, 1]} : vector<2x64xf32> to vector<2x32xf32>
    %405 = vector.extract_strided_slice %233 {offsets = [14, 0], sizes = [2, 256], strides = [1, 1]} : vector<16x256xf32> to vector<2x256xf32>
    %406 = vector.extract_strided_slice %234 {offsets = [0, 0], sizes = [2, 256], strides = [1, 1]} : vector<16x256xf32> to vector<2x256xf32>
    %407 = arith.addf %405, %406 : vector<2x256xf32>
    %408 = arith.truncf %402 : vector<2x64xf32> to vector<2x64xbf16>
    %cst_57 = arith.constant dense<0.000000e+00> : vector<2x256xf32>
    %409 = tpu.matmul %408, %229, %cst_57 {dimension_numbers = #tpu.dot_dimension_numbers<[1], [0], [0], [1], [0, 0, 1, 1], [], []>} : vector<2x64xbf16>, vector<64x256xbf16>, vector<2x256xf32> -> vector<2x256xf32>
    %410 = arith.addf %407, %409 : vector<2x256xf32>
    %411 = math.tanh %410 : vector<2x256xf32>
    %412 = arith.negf %410 : vector<2x256xf32>
    %413 = math.exp %412 : vector<2x256xf32>
    %cst_58 = arith.constant 1.000000e+00 : f32
    %414 = vector.broadcast %cst_58 : f32 to vector<2x256xf32>
    %415 = arith.addf %414, %413 : vector<2x256xf32>
    %416 = arith.divf %414, %415 : vector<2x256xf32>
    %417 = arith.select %13, %411, %416 : vector<2x256xi1>, vector<2x256xf32>
    %418 = vector.extract_strided_slice %417 {offsets = [0, 0], sizes = [2, 64], strides = [1, 1]} : vector<2x256xf32> to vector<2x64xf32>
    %419 = vector.extract_strided_slice %417 {offsets = [0, 64], sizes = [2, 64], strides = [1, 1]} : vector<2x256xf32> to vector<2x64xf32>
    %420 = vector.extract_strided_slice %417 {offsets = [0, 128], sizes = [2, 64], strides = [1, 1]} : vector<2x256xf32> to vector<2x64xf32>
    %421 = vector.extract_strided_slice %417 {offsets = [0, 192], sizes = [2, 64], strides = [1, 1]} : vector<2x256xf32> to vector<2x64xf32>
    %422 = arith.mulf %419, %400 : vector<2x64xf32>
    %423 = arith.mulf %418, %420 : vector<2x64xf32>
    %424 = arith.addf %422, %423 : vector<2x64xf32>
    %425 = math.tanh %424 : vector<2x64xf32>
    %426 = arith.mulf %421, %425 : vector<2x64xf32>
    %427 = vector.extract_strided_slice %426 {offsets = [0, 0], sizes = [2, 32], strides = [1, 1]} : vector<2x64xf32> to vector<2x32xf32>
    %428 = vector.extract_strided_slice %426 {offsets = [0, 32], sizes = [2, 32], strides = [1, 1]} : vector<2x64xf32> to vector<2x32xf32>
    %429 = tpu.concatenate %259, %428 in 1 : vector<2x32xf32>, vector<2x32xf32> -> vector<2x64xf32>
    %430 = tpu.concatenate %283, %404 in 1 : vector<2x32xf32>, vector<2x32xf32> -> vector<2x64xf32>
    %431 = tpu.concatenate %307, %380 in 1 : vector<2x32xf32>, vector<2x32xf32> -> vector<2x64xf32>
    %432 = tpu.concatenate %331, %356 in 1 : vector<2x32xf32>, vector<2x32xf32> -> vector<2x64xf32>
    %433 = tpu.concatenate %355, %332 in 1 : vector<2x32xf32>, vector<2x32xf32> -> vector<2x64xf32>
    %434 = tpu.concatenate %379, %308 in 1 : vector<2x32xf32>, vector<2x32xf32> -> vector<2x64xf32>
    %435 = tpu.concatenate %403, %284 in 1 : vector<2x32xf32>, vector<2x32xf32> -> vector<2x64xf32>
    %436 = tpu.concatenate %427, %260 in 1 : vector<2x32xf32>, vector<2x32xf32> -> vector<2x64xf32>
    %c0_59 = arith.constant 0 : index
    %c0_60 = arith.constant 0 : index
    %437 = vector.load %arg10[%c0_59, %c0_60] : memref<1x64xf32, #tpu.memory_space<vmem>>, vector<1x64xf32>
    %438 = math.tanh %429 : vector<2x64xf32>
    %439 = vector.broadcast %437 : vector<1x64xf32> to vector<2x64xf32>
    %440 = arith.mulf %438, %439 : vector<2x64xf32>
    %cst_61 = arith.constant dense<0.000000e+00> : vector<2xf32>
    %441 = vector.multi_reduction <add>, %440, %cst_61 [1] : vector<2x64xf32> to vector<2xf32>
    %442 = vector.shape_cast %441 : vector<2xf32> to vector<2x1xf32>
    %443 = math.tanh %430 : vector<2x64xf32>
    %444 = vector.broadcast %437 : vector<1x64xf32> to vector<2x64xf32>
    %445 = arith.mulf %443, %444 : vector<2x64xf32>
    %cst_62 = arith.constant dense<0.000000e+00> : vector<2xf32>
    %446 = vector.multi_reduction <add>, %445, %cst_62 [1] : vector<2x64xf32> to vector<2xf32>
    %447 = vector.shape_cast %446 : vector<2xf32> to vector<2x1xf32>
    %448 = math.tanh %431 : vector<2x64xf32>
    %449 = vector.broadcast %437 : vector<1x64xf32> to vector<2x64xf32>
    %450 = arith.mulf %448, %449 : vector<2x64xf32>
    %cst_63 = arith.constant dense<0.000000e+00> : vector<2xf32>
    %451 = vector.multi_reduction <add>, %450, %cst_63 [1] : vector<2x64xf32> to vector<2xf32>
    %452 = vector.shape_cast %451 : vector<2xf32> to vector<2x1xf32>
    %453 = math.tanh %432 : vector<2x64xf32>
    %454 = vector.broadcast %437 : vector<1x64xf32> to vector<2x64xf32>
    %455 = arith.mulf %453, %454 : vector<2x64xf32>
    %cst_64 = arith.constant dense<0.000000e+00> : vector<2xf32>
    %456 = vector.multi_reduction <add>, %455, %cst_64 [1] : vector<2x64xf32> to vector<2xf32>
    %457 = vector.shape_cast %456 : vector<2xf32> to vector<2x1xf32>
    %458 = math.tanh %433 : vector<2x64xf32>
    %459 = vector.broadcast %437 : vector<1x64xf32> to vector<2x64xf32>
    %460 = arith.mulf %458, %459 : vector<2x64xf32>
    %cst_65 = arith.constant dense<0.000000e+00> : vector<2xf32>
    %461 = vector.multi_reduction <add>, %460, %cst_65 [1] : vector<2x64xf32> to vector<2xf32>
    %462 = vector.shape_cast %461 : vector<2xf32> to vector<2x1xf32>
    %463 = math.tanh %434 : vector<2x64xf32>
    %464 = vector.broadcast %437 : vector<1x64xf32> to vector<2x64xf32>
    %465 = arith.mulf %463, %464 : vector<2x64xf32>
    %cst_66 = arith.constant dense<0.000000e+00> : vector<2xf32>
    %466 = vector.multi_reduction <add>, %465, %cst_66 [1] : vector<2x64xf32> to vector<2xf32>
    %467 = vector.shape_cast %466 : vector<2xf32> to vector<2x1xf32>
    %468 = math.tanh %435 : vector<2x64xf32>
    %469 = vector.broadcast %437 : vector<1x64xf32> to vector<2x64xf32>
    %470 = arith.mulf %468, %469 : vector<2x64xf32>
    %cst_67 = arith.constant dense<0.000000e+00> : vector<2xf32>
    %471 = vector.multi_reduction <add>, %470, %cst_67 [1] : vector<2x64xf32> to vector<2xf32>
    %472 = vector.shape_cast %471 : vector<2xf32> to vector<2x1xf32>
    %473 = math.tanh %436 : vector<2x64xf32>
    %474 = vector.broadcast %437 : vector<1x64xf32> to vector<2x64xf32>
    %475 = arith.mulf %473, %474 : vector<2x64xf32>
    %cst_68 = arith.constant dense<0.000000e+00> : vector<2xf32>
    %476 = vector.multi_reduction <add>, %475, %cst_68 [1] : vector<2x64xf32> to vector<2xf32>
    %477 = vector.shape_cast %476 : vector<2xf32> to vector<2x1xf32>
    %478 = tpu.concatenate %442, %447, %452, %457, %462, %467, %472, %477 in 1 : vector<2x1xf32>, vector<2x1xf32>, vector<2x1xf32>, vector<2x1xf32>, vector<2x1xf32>, vector<2x1xf32>, vector<2x1xf32>, vector<2x1xf32> -> vector<2x8xf32>
    %cst_69 = arith.constant dense<0xFF800000> : vector<2xf32>
    %479 = vector.multi_reduction <maximumf>, %478, %cst_69 [1] : vector<2x8xf32> to vector<2xf32>
    %480 = vector.shape_cast %479 : vector<2xf32> to vector<2x1xf32>
    %481 = vector.broadcast %480 : vector<2x1xf32> to vector<2x8xf32>
    %482 = arith.subf %478, %481 : vector<2x8xf32>
    %483 = math.exp %482 : vector<2x8xf32>
    %cst_70 = arith.constant dense<0.000000e+00> : vector<2xf32>
    %484 = vector.multi_reduction <add>, %483, %cst_70 [1] : vector<2x8xf32> to vector<2xf32>
    %485 = vector.shape_cast %484 : vector<2xf32> to vector<2x1xf32>
    %486 = vector.broadcast %485 : vector<2x1xf32> to vector<2x8xf32>
    %487 = arith.divf %483, %486 : vector<2x8xf32>
    %cst_71 = arith.constant 0.000000e+00 : f32
    %488 = vector.broadcast %cst_71 : f32 to vector<2x64xf32>
    %489 = vector.extract_strided_slice %487 {offsets = [0, 0], sizes = [2, 1], strides = [1, 1]} : vector<2x8xf32> to vector<2x1xf32>
    %490 = vector.broadcast %489 : vector<2x1xf32> to vector<2x64xf32>
    %491 = arith.mulf %429, %490 : vector<2x64xf32>
    %492 = arith.addf %488, %491 : vector<2x64xf32>
    %493 = vector.extract_strided_slice %487 {offsets = [0, 1], sizes = [2, 1], strides = [1, 1]} : vector<2x8xf32> to vector<2x1xf32>
    %494 = vector.broadcast %493 : vector<2x1xf32> to vector<2x64xf32>
    %495 = arith.mulf %430, %494 : vector<2x64xf32>
    %496 = arith.addf %492, %495 : vector<2x64xf32>
    %497 = vector.extract_strided_slice %487 {offsets = [0, 2], sizes = [2, 1], strides = [1, 1]} : vector<2x8xf32> to vector<2x1xf32>
    %498 = vector.broadcast %497 : vector<2x1xf32> to vector<2x64xf32>
    %499 = arith.mulf %431, %498 : vector<2x64xf32>
    %500 = arith.addf %496, %499 : vector<2x64xf32>
    %501 = vector.extract_strided_slice %487 {offsets = [0, 3], sizes = [2, 1], strides = [1, 1]} : vector<2x8xf32> to vector<2x1xf32>
    %502 = vector.broadcast %501 : vector<2x1xf32> to vector<2x64xf32>
    %503 = arith.mulf %432, %502 : vector<2x64xf32>
    %504 = arith.addf %500, %503 : vector<2x64xf32>
    %505 = vector.extract_strided_slice %487 {offsets = [0, 4], sizes = [2, 1], strides = [1, 1]} : vector<2x8xf32> to vector<2x1xf32>
    %506 = vector.broadcast %505 : vector<2x1xf32> to vector<2x64xf32>
    %507 = arith.mulf %433, %506 : vector<2x64xf32>
    %508 = arith.addf %504, %507 : vector<2x64xf32>
    %509 = vector.extract_strided_slice %487 {offsets = [0, 5], sizes = [2, 1], strides = [1, 1]} : vector<2x8xf32> to vector<2x1xf32>
    %510 = vector.broadcast %509 : vector<2x1xf32> to vector<2x64xf32>
    %511 = arith.mulf %434, %510 : vector<2x64xf32>
    %512 = arith.addf %508, %511 : vector<2x64xf32>
    %513 = vector.extract_strided_slice %487 {offsets = [0, 6], sizes = [2, 1], strides = [1, 1]} : vector<2x8xf32> to vector<2x1xf32>
    %514 = vector.broadcast %513 : vector<2x1xf32> to vector<2x64xf32>
    %515 = arith.mulf %435, %514 : vector<2x64xf32>
    %516 = arith.addf %512, %515 : vector<2x64xf32>
    %517 = vector.extract_strided_slice %487 {offsets = [0, 7], sizes = [2, 1], strides = [1, 1]} : vector<2x8xf32> to vector<2x1xf32>
    %518 = vector.broadcast %517 : vector<2x1xf32> to vector<2x64xf32>
    %519 = arith.mulf %436, %518 : vector<2x64xf32>
    %520 = arith.addf %516, %519 : vector<2x64xf32>
    %cst_72 = arith.constant 0.000000e+00 : f32
    %521 = vector.broadcast %cst_72 : f32 to vector<2x64xf32>
    %522 = arith.maximumf %520, %521 : vector<2x64xf32>
    %523 = arith.truncf %522 : vector<2x64xf32> to vector<2x64xbf16>
    %c0_73 = arith.constant 0 : index
    %c0_74 = arith.constant 0 : index
    %524 = vector.load %arg11[%c0_73, %c0_74] : memref<64x64xbf16, #tpu.memory_space<vmem>>, vector<64x64xbf16>
    %cst_75 = arith.constant dense<0.000000e+00> : vector<2x64xf32>
    %525 = tpu.matmul %523, %524, %cst_75 {dimension_numbers = #tpu.dot_dimension_numbers<[1], [0], [0], [1], [0, 0, 1, 1], [], []>} : vector<2x64xbf16>, vector<64x64xbf16>, vector<2x64xf32> -> vector<2x64xf32>
    %c0_76 = arith.constant 0 : index
    %c0_77 = arith.constant 0 : index
    %526 = vector.load %arg12[%c0_76, %c0_77] : memref<1x64xf32, #tpu.memory_space<vmem>>, vector<1x64xf32>
    %527 = vector.broadcast %526 : vector<1x64xf32> to vector<2x64xf32>
    %528 = arith.addf %525, %527 : vector<2x64xf32>
    %529 = arith.truncf %528 : vector<2x64xf32> to vector<2x64xbf16>
    %c0_78 = arith.constant 0 : index
    %c0_79 = arith.constant 0 : index
    %530 = vector.load %arg13[%c0_78, %c0_79] : memref<64x5xbf16, #tpu.memory_space<vmem>>, vector<64x5xbf16>
    %cst_80 = arith.constant dense<0.000000e+00> : vector<2x5xf32>
    %531 = tpu.matmul %529, %530, %cst_80 {dimension_numbers = #tpu.dot_dimension_numbers<[1], [0], [0], [1], [0, 0, 1, 1], [], []>} : vector<2x64xbf16>, vector<64x5xbf16>, vector<2x5xf32> -> vector<2x5xf32>
    %c0_81 = arith.constant 0 : index
    %c0_82 = arith.constant 0 : index
    %532 = vector.load %arg14[%c0_81, %c0_82] : memref<1x5xf32, #tpu.memory_space<vmem>>, vector<1x5xf32>
    %533 = vector.broadcast %532 : vector<1x5xf32> to vector<2x5xf32>
    %534 = arith.addf %531, %533 : vector<2x5xf32>
    %c0_83 = arith.constant 0 : index
    %c0_84 = arith.constant 0 : index
    %535 = vector.load %arg15[%c0_83, %c0_84] : memref<2x5xf32, #tpu.memory_space<vmem>>, vector<2x5xf32>
    tpu.vector_store %arg15[%c0_83, %c0_84], %534 {strides = array<i32>} : memref<2x5xf32, #tpu.memory_space<vmem>>, vector<2x5xf32>,
    return
  }
}

</mosaic_0001>

<bundles_post_ra>
// kernel: rnn_atts_forward.1
= control target key start
LH: loop header
LB: loop body
LE: loop exit
PB: predicated region body
PF: predicated region fallthrough
CT: control target
= control target key end

     0   :  { %20 = vsyncpa [#allocation3], 0  ;;  %s4291_s0 = inlined_call_operand.vmem [shape: s32[16,1], index: 0, kind: input, shape index: {}]   ;;  %s4292_s1 = inlined_call_operand.vmem [shape: f32[50,32], index: 1, kind: input, shape index: {}]   ;;  %s4293_s2 = inlined_call_operand.vmem [shape: bf16[32,256], index: 2, kind: input, shape index: {}]   ;;  %s4294_s3 = inlined_call_operand.vmem [shape: bf16[32,256], index: 3, kind: input, shape index: {}]   ;;  %s4295_s4 = inlined_call_operand.hbm [shape: f32[1,256], index: 4, kind: input, shape index: {}]   ;;  %s4296_s5 = inlined_call_operand.vmem [shape: bf16[64,256], index: 5, kind: input, shape index: {}]   ;;  %s4297_s6 = inlined_call_operand.hbm [shape: bf16[64,256], index: 6, kind: input, shape index: {}]   ;;  %s4298_s7 = inlined_call_operand.hbm [shape: bf16[64,256], index: 7, kind: input, shape index: {}]   ;;  %s4299_s8 = inlined_call_operand.hbm [shape: f32[1,256], index: 8, kind: input, shape index: {}]   ;;  %s4300_s9 = inlined_call_operand.hbm [shape: bf16[64,256], index: 9, kind: input, shape index: {}]   ;;  %s4301_s10 = inlined_call_operand.vmem [shape: f32[1,64], index: 10, kind: input, shape index: {}]   ;;  %s4302_s11 = inlined_call_operand.hbm [shape: bf16[64,64], index: 11, kind: input, shape index: {}]   ;;  %s4303_s12 = inlined_call_operand.hbm [shape: f32[1,64], index: 12, kind: input, shape index: {}]   ;;  %s4304_s13 = inlined_call_operand.vmem [shape: bf16[64,5], index: 13, kind: input, shape index: {}]   ;;  %s4305_s14 = inlined_call_operand.hbm [shape: f32[1,5], index: 14, kind: input, shape index: {}]   ;;  %s4306_s15 = inlined_call_operand.hbm [shape: f32[2,5], index: 15, kind: output, shape index: {}]  }
   0x1   :  { %21 = vsyncpa [#allocation6], 0 }
   0x2   :  { %22 = vsyncpa [#allocation9], 0 }
   0x3   :  { %23 = vsyncpa [#allocation12], 0 }
   0x4   :  { %24 = vsyncpa [#allocation15], 0  ;;  %s51_s20 = sshll.u32 %s4297_s6, 4  ;;  %s52_s20 = int_to_ptr.hbm [resolvable:$true] %s51_s20 }
   0x5   :  { %25 = vsyncpa [#allocation4], 0  ;;  %s3442_s21 = smov [#allocation5]   ;;  %s78_s25 = sshll.u32 %s4299_s8, 4  ;;  %s79_s25 = int_to_ptr.hbm [resolvable:$true] %s78_s25 }
   0x6   :  { %s53_s22 = sshll.u32 %s3442_s21, 4  ;;  %s3443_s26 = smov 128   ;;  %s54_s22 = int_to_ptr.vmem [resolvable:$true] %s53_s22 }
   0x7   :  { %s3444_s27 = smov 8   ;;  %s3445_s28 = smov [#allocation8]  }
   0x8   :  { %59 = dma.hbm_to_vmem [thread:$0]  %s52_s20, 1024, %s54_s22, [#allocation6], %s3443_s26, %s3443_s26, %s3444_s27  }
   0x9   :  { %s80_s29 = sshll.u32 %s3445_s28, 4  ;;  %s103_s16 = sshll.u32 %s4302_s11, 4  ;;  %s81_s29 = int_to_ptr.vmem [resolvable:$true] %s80_s29  ;;  %s104_s16 = int_to_ptr.hbm [resolvable:$true] %s103_s16 }
   0xa   :  { %83 = dma.hbm_to_vmem [thread:$0]  %s79_s25, 32, %s81_s29, [#allocation9]  }
   0xb   :  { %s3446_s17 = smov [#allocation11]   ;;  %s39_s21 = sshll.u32 %s4295_s4, 4  ;;  %s40_s21 = int_to_ptr.hbm [resolvable:$true] %s39_s21 }
   0xc   :  { %s105_s18 = sshll.u32 %s3446_s17, 4  ;;  %s3447_s23 = smov 64   ;;  %s106_s18 = int_to_ptr.vmem [resolvable:$true] %s105_s18 }
   0xd   :  { %s3448_s24 = smov 4   ;;  %s3449_s20 = smov [#allocation2]  }
   0xe   :  { %111 = dma.hbm_to_vmem [thread:$0]  %s104_s16, 512, %s106_s18, [#allocation12], %s3447_s23, %s3447_s23, %s3448_s24  }
   0xf   :  { %s41_s22 = sshll.u32 %s3449_s20, 4  ;;  %s64_s30 = sshll.u32 %s4298_s7, 4  ;;  %s42_s22 = int_to_ptr.vmem [resolvable:$true] %s41_s22  ;;  %s65_s30 = int_to_ptr.hbm [resolvable:$true] %s64_s30 }
  0x10   :  { %44 = dma.hbm_to_vmem [thread:$0]  %s40_s21, 32, %s42_s22, [#allocation3]  }
  0x11   :  { %s88_s6 = sshll.u32 %s4300_s9, 4  ;;  %s3450_s4 = smov [#allocation7]   ;;  %s89_s6 = int_to_ptr.hbm [resolvable:$true] %s88_s6 }
  0x12   :  { %s66_s17 = sshll.u32 %s3450_s4, 4  ;;  %s3451_s16 = smov [#allocation10]   ;;  %s67_s17 = int_to_ptr.vmem [resolvable:$true] %s66_s17 }
  0x13   :  { %72 = dma.hbm_to_vmem [thread:$0]  %s65_s30, 1024, %s67_s17, [#allocation6], %s3443_s26, %s3443_s26, %s3444_s27  }
  0x14   :  { %s90_s18 = sshll.u32 %s3451_s16, 4  ;;  %s117_s7 = sshll.u32 %s4303_s12, 4  ;;  %s91_s18 = int_to_ptr.vmem [resolvable:$true] %s90_s18  ;;  %s118_s7 = int_to_ptr.hbm [resolvable:$true] %s117_s7 }
  0x15   :  { %96 = dma.hbm_to_vmem [thread:$0]  %s89_s6, 1024, %s91_s18, [#allocation9], %s3443_s26, %s3443_s26, %s3444_s27  }
  0x16   :  { %s130_s24 = sshll.u32 %s4305_s14, 4  ;;  %s3452_s20 = smov [#allocation13]   ;;  %s131_s24 = int_to_ptr.hbm [resolvable:$true] %s130_s24 }
  0x17   :  { %s119_s22 = sshll.u32 %s3452_s20, 4  ;;  %s3453_s28 = smov [#allocation14]   ;;  %s120_s22 = int_to_ptr.vmem [resolvable:$true] %s119_s22 }
  0x18   :  { %122 = dma.hbm_to_vmem [thread:$0]  %s118_s7, 16, %s120_s22, [#allocation12]  }
  0x19   :  { %s132_s11 = sshll.u32 %s3453_s28, 4  ;;  %s133_s11 = int_to_ptr.vmem [resolvable:$true] %s132_s11 }
  0x1a   :  { %135 = dma.hbm_to_vmem [thread:$0]  %s131_s24, 16, %s133_s11, [#allocation15]  }
  0x1b   :  { %3430 = dma.done.wait [#allocation3], 32  }
  0x1c   :  { %3431 = vsyncadd [#allocation3], 4294967264 }
  0x1d   :  { %3432 = dma.done.wait [#allocation6], 2048  }
  0x1e   :  { %3433 = vsyncadd [#allocation6], 4294965248 }
  0x1f   :  { %3434 = dma.done.wait [#allocation9], 1056  }
  0x20   :  { %3435 = vsyncadd [#allocation9], 4294966240 }
  0x21   :  { %3436 = dma.done.wait [#allocation12], 528  }
  0x22   :  { %3437 = vsyncadd [#allocation12], 4294966768 }
  0x23   :  { %3438 = dma.done.wait [#allocation15], 16  }
  0x24   :  { %3439 = vsyncadd [#allocation15], 4294967280  ;;  %v3454_v0 = vmov 0   ;;  %vm199_vm0 = vcmask 1041408   ;;  %v171_v1 = vld [vmem:[%s4291_s0] sm:$0xff]  ;;  %v190_v3 = vld [vmem:[%s4292_s1 + $0x28] sm:$0xff]  ;;  %v169_v10 = vlaneseq }
  0x25   :  { %2949 = vset.pattern.permute.xlu0 %v3454_v0  ;;  %2992 = vset.pattern.permute.xlu1 %v3454_v0  ;;  %v191_v2 = vld [vmem:[%s4292_s1 + $0x30] sm:$0x3]  ;;  %v189_v4 = vld [vmem:[%s4292_s1 + $0x20] sm:$0xff]  ;;  %v188_v5 = vld [vmem:[%s4292_s1 + $0x18] sm:$0xff]  ;;  %vm192_vm1 = vcmask 408576   ;;  %v3455_v13 = vmov 0.0  }
  0x26   :  { %174 = vperm.xlu0 %2949, %v171_v1   ;;  %2614 = vmatpush.msk.msra.mxu0 %vm199_vm0, %v191_v2  ;;  %v172_v6 = vld [vmem:[%s4291_s0 + $0x8] sm:$0xff]  ;;  %v187_v7 = vld [vmem:[%s4292_s1 + $0x10] sm:$0xff]  ;;  %v185_v9 = vld [vmem:[%s4292_s1] sm:$0xff]  ;;  %v3609_v11 = vand.u32 127, %v169_v10  ;;  %vm276_vm4 = vcmask 261120   ;;  %vm404_vm14 = vcmask 523264  }
  0x27   :  { %v186_v8 = vld [vmem:[%s4292_s1 + $0x8] sm:$0xff]  ;;  %v2627_v17 = vld [vmem:[%s4293_s2 + $0x10] sm:$0xf]  ;;  %v2882_v18 = vld [vmem:[%s4293_s2 + $0x14] sm:$0xf0]  ;;  %s3463_s7 = smov [#allocation16]  }
  0x28   :  { %213 = vmatpush.msra.mxu0 %v190_v3  ;;  %v2881_v19 = vld [vmem:[%s4293_s2 + $0x14] sm:$0xf]  ;;  %v2628_v20 = vor.u32 %v2882_v18, %v2627_v17  ;;  %v2629_v21 = vld [vmem:[%s4293_s2 + $0x18] sm:$0xf0]  ;;  %v2645_v22 = vld [vmem:[%s4294_s3 + $0x10] sm:$0xf] }
  0x29   :  { %v2886_v23 = vld [vmem:[%s4294_s3 + $0x14] sm:$0xf0]  ;;  %v2632_v24 = vor.u32 %v2881_v19, %v2629_v21  ;;  %v2619_v26 = vld [vmem:[%s4293_s2] sm:$0xf]  ;;  %v2880_v27 = vld [vmem:[%s4293_s2 + $0x4] sm:$0xf0] }
  0x2a   :  { %214 = vmatpush.msra.mxu0 %v189_v4  ;;  %v2646_v25 = vor.u32 %v2886_v23, %v2645_v22  ;;  %286 = vmatpush.bf16.msra.mxu1 %v2628_v20  ;;  %v2879_v28 = vld [vmem:[%s4293_s2 + $0x4] sm:$0xf]  ;;  %v2620_v29 = vor.u32 %v2880_v27, %v2619_v26  ;;  %v2621_v30 = vld [vmem:[%s4293_s2 + $0x8] sm:$0xf0]  ;;  %v2637_v31 = vld [vmem:[%s4294_s3] sm:$0xf] }
  0x2b   :  { %300 = vmatpush.bf16.msra.mxu2 %v2632_v24  ;;  %v2884_v32 = vld [vmem:[%s4294_s3 + $0x4] sm:$0xf0]  ;;  %v2624_v33 = vor.u32 %v2879_v28, %v2621_v30  ;;  %v2679_v35 = vld [vmem:[%s4296_s5 + $0x30] sm:$0xf]  ;;  %v2894_v36 = vld [vmem:[%s4296_s5 + $0x34] sm:$0xf0] }
  0x2c   :  { %215 = vmatpush.msra.mxu0 %v188_v5  ;;  %334 = vmatpush.bf16.msra.mxu3 %v2646_v25  ;;  %v2638_v34 = vor.u32 %v2884_v32, %v2637_v31  ;;  %v2893_v37 = vld [vmem:[%s4296_s5 + $0x34] sm:$0xf]  ;;  %v3658_v38 = vor.u32 %v2894_v36, %v2679_v35  ;;  %v2681_v39 = vld [vmem:[%s4296_s5 + $0x38] sm:$0xf0]  ;;  %v2671_v43 = vld [vmem:[%s4296_s5 + $0x20] sm:$0xf] }
  0x2d   :  { %v2885_v40 = vld [vmem:[%s4294_s3 + $0x14] sm:$0xf]  ;;  %v2647_v41 = vld [vmem:[%s4294_s3 + $0x18] sm:$0xf0]  ;;  %v3669_v42 = vor.u32 %v2893_v37, %v2681_v39  ;;  %v2892_v45 = vld [vmem:[%s4296_s5 + $0x24] sm:$0xf0] }
  0x2e   :  { %177 = vperm.xlu0 %2949, %v172_v6   ;;  %216 = vmatpush.msra.mxu0 %v187_v7  ;;  %v2650_v44 = vor.u32 %v2885_v40, %v2647_v41  ;;  %v2891_v46 = vld [vmem:[%s4296_s5 + $0x24] sm:$0xf]  ;;  %v2673_v47 = vld [vmem:[%s4296_s5 + $0x28] sm:$0xf0]  ;;  %v3686_v48 = vor.u32 %v2892_v45, %v2671_v43  ;;  %v2663_v52 = vld [vmem:[%s4296_s5 + $0x10] sm:$0xf] }
  0x2f   :  { %287 = vmatpush.bf16.msra.mxu1 %v2620_v29  ;;  %301 = vmatpush.bf16.msra.mxu2 %v2624_v33  ;;  %v3688_v49 = vor.u32 %v2891_v46, %v2673_v47  ;;  %v2883_v50 = vld [vmem:[%s4294_s3 + $0x4] sm:$0xf]  ;;  %v2639_v51 = vld [vmem:[%s4294_s3 + $0x8] sm:$0xf0]  ;;  %v2890_v54 = vld [vmem:[%s4296_s5 + $0x14] sm:$0xf0] }
  0x30   :  { %217 = vmatpush.msra.mxu0 %v186_v8  ;;  %335 = vmatpush.bf16.msra.mxu3 %v2638_v34  ;;  %v2642_v53 = vor.u32 %v2883_v50, %v2639_v51  ;;  %v2889_v55 = vld [vmem:[%s4296_s5 + $0x14] sm:$0xf]  ;;  %v2665_v56 = vld [vmem:[%s4296_s5 + $0x18] sm:$0xf0]  ;;  %v3709_v57 = vor.u32 %v2890_v54, %v2663_v52  ;;  %v2655_v59 = vld [vmem:[%s4296_s5] sm:$0xf] }
  0x31   :  { %v3713_v58 = vor.u32 %v2889_v55, %v2665_v56  ;;  %v2888_v60 = vld [vmem:[%s4296_s5 + $0x4] sm:$0xf0]  ;;  %v2887_v61 = vld [vmem:[%s4296_s5 + $0x4] sm:$0xf]  ;;  %v2657_v62 = vld [vmem:[%s4296_s5 + $0x8] sm:$0xf0] }
  0x32   :  { %218 = vmatpush.msra.mxu0 %v185_v9  ;;  %v3728_v63 = vor.u32 %v2888_v60, %v2655_v59  ;;  %v3732_v1 = vor.u32 %v2887_v61, %v2657_v62  ;;  %v241_v6 = vld [vmem:[#allocation2] sm:$0x3]  ;;  %v3794_v59 = vadd.s32 128, %v3609_v11  ;;  %s2596_s9 = sshll.u32 %s3463_s7, 4  ;;  %s2598_s0 = sshll.u32 %s4306_s15, 4  ;;  %s2597_s9 = int_to_ptr.vmem [resolvable:$true] %s2596_s9  ;;  %s2599_s0 = int_to_ptr.hbm [resolvable:$true] %s2598_s0 }
  0x33   :  { %412 = vmatpush.bf16.msrb.mxu2 %v3658_v38  ;;  %348 = vmatpush.bf16.msrb.mxu1 %v2650_v44  ;;  %v252_v8 = vperm.slane %v241_v6, 0  ;;  %v253_v17 = vperm.slane %v241_v6, 1 }
  0x34   :  { %504 = vmatpush.bf16.msrb.mxu0 %v3658_v38  ;;  %425 = vmatpush.bf16.msrb.mxu3 %v3669_v42  ;;  %vm230_vm10 = vcmp.lt.s32.totalorder %v3794_v59, 192 }
  0x37   :  { %413 = vmatpush.bf16.msrb.mxu2 %v3686_v48  ;;  %349 = vmatpush.bf16.msrb.mxu1 %v2642_v53 }
  0x38   :  { %505 = vmatpush.bf16.msrb.mxu0 %v3686_v48  ;;  %426 = vmatpush.bf16.msrb.mxu3 %v3688_v49 }
  0x3b   :  { %414 = vmatpush.bf16.msrb.mxu2 %v3709_v57 }
  0x3c   :  { %506 = vmatpush.bf16.msrb.mxu0 %v3709_v57  ;;  %427 = vmatpush.bf16.msrb.mxu3 %v3713_v58 }
  0x3f   :  { %415 = vmatpush.bf16.msrb.mxu2 %v3728_v63 }
  0x40   :  { %507 = vmatpush.bf16.msrb.mxu0 %v3728_v63  ;;  %428 = vmatpush.bf16.msrb.mxu3 %v3732_v1 }
  0x98   :  { %v175_v12 = vpop.permute.xlu0 %174 }
  0x99   :  { %vm179_vm2 = vcmp.eq.s32.totalorder %v175_v12, %v3609_v11 }
  0x9a   :  { %v2612_v14 = vsel %vm179_vm2, 1.0, %v3455_v13 }
  0x9b   :  { %2615 = vmatmul.msk.f32.vlgmr.msra.gmra.mxu0 %vm192_vm1, %v2612_v14 }
  0x9c   :  { %696 = vmatpush.bf16.msra.mxu0 %v3658_v38 }
  0xa0   :  { %v178_v15 = vpop.permute.xlu0 %177  ;;  %697 = vmatpush.bf16.msra.mxu0 %v3686_v48 }
  0xa1   :  { %vm180_vm3 = vcmp.eq.s32.totalorder %v178_v15, %v3609_v11 }
  0xa2   :  { %v2613_v16 = vsel %vm180_vm3, 1.0, %v3455_v13 }
  0xa3   :  { %2616 = vmatmul.msk.f32.gmra.mxu0 %vm192_vm1, %v2613_v16 }
  0xa4   :  { %698 = vmatpush.bf16.msra.mxu0 %v3709_v57 }
  0xa8   :  { %699 = vmatpush.bf16.msra.mxu0 %v3728_v63 }
 0x118   :  { %v220_v2 = vpop.f32.mrf.mxu0 }
 0x120   :  { %v223_v3 = vpop.f32.mrf.mxu0 }
 0x121   :  { %v250_v4 = vpack.c.bf16 %v223_v3, %v220_v2 }
 0x123   :  { %2633 = vmatmul.msk.bf16.vlgmr.msra.gmra.mxu1 %vm276_vm4, %v250_v4  ;;  %2634 = vmatmul.msk.bf16.vlgmr.msra.gmra.mxu2 %vm276_vm4, %v250_v4 }
 0x124   :  { %2651 = vmatmul.msk.bf16.vlgmr.msra.gmra.mxu3 %vm276_vm4, %v250_v4  ;;  %517 = vmatpush.bf16.msra.mxu1 %v3669_v42 }
 0x125   :  { %613 = vmatpush.bf16.msra.mxu3 %v3669_v42  ;;  %600 = vmatpush.bf16.msra.mxu2 %v3658_v38 }
 0x128   :  { %518 = vmatpush.bf16.msra.mxu1 %v3688_v49 }
 0x129   :  { %614 = vmatpush.bf16.msra.mxu3 %v3688_v49  ;;  %601 = vmatpush.bf16.msra.mxu2 %v3686_v48 }
 0x12c   :  { %519 = vmatpush.bf16.msra.mxu1 %v3713_v58 }
 0x12d   :  { %615 = vmatpush.bf16.msra.mxu3 %v3713_v58  ;;  %602 = vmatpush.bf16.msra.mxu2 %v3709_v57 }
 0x130   :  { %520 = vmatpush.bf16.msra.mxu1 %v3732_v1 }
 0x131   :  { %616 = vmatpush.bf16.msra.mxu3 %v3732_v1  ;;  %603 = vmatpush.bf16.msra.mxu2 %v3728_v63 }
 0x133   :  { %2652 = vmatmul.msk.bf16.vlgmr.msrb.gmra.mxu1 %vm276_vm4, %v250_v4  ;;  %416 = vmatmul.bf16.vlgmr.msrb.gmra.mxu2 %v3454_v0 }
 0x134   :  { %429 = vmatmul.bf16.vlgmr.msrb.gmra.mxu3 %v3454_v0  ;;  %709 = vmatpush.bf16.msrb.mxu1 %v3669_v42 }
 0x135   :  { %813 = vmatpush.bf16.msrb.mxu3 %v3669_v42  ;;  %800 = vmatpush.bf16.msrb.mxu2 %v3658_v38 }
 0x138   :  { %710 = vmatpush.bf16.msrb.mxu1 %v3688_v49 }
 0x139   :  { %814 = vmatpush.bf16.msrb.mxu3 %v3688_v49  ;;  %801 = vmatpush.bf16.msrb.mxu2 %v3686_v48 }
 0x13c   :  { %711 = vmatpush.bf16.msrb.mxu1 %v3713_v58 }
 0x13d   :  { %815 = vmatpush.bf16.msrb.mxu3 %v3713_v58  ;;  %802 = vmatpush.bf16.msrb.mxu2 %v3709_v57 }
 0x140   :  { %712 = vmatpush.bf16.msrb.mxu1 %v3732_v1 }
 0x141   :  { %816 = vmatpush.bf16.msrb.mxu3 %v3732_v1  ;;  %803 = vmatpush.bf16.msrb.mxu2 %v3728_v63 }
 0x1a0   :  { %v289_v5 = vpop.f32.mrf.mxu1 }
 0x1a1   :  { %v290_v21 = vadd.f32 %v289_v5, %v252_v8 }
 0x1a6   :  { %v303_v7 = vpop.f32.mrf.mxu2 }
 0x1a7   :  { %v337_v9 = vpop.f32.mrf.mxu3  ;;  %v3786_v35 = vadd.f32 %v303_v7, %v253_v17 }
 0x1a8   :  { %v291_v10 = vpop.f32.mrf.mxu1  ;;  %v782_v12 = vrot.slane %v337_v9, 6  ;;  %v878_v13 = vrot.slane %v337_v9, 2 }
 0x1a9   :  { %v292_v14 = vadd.f32 %v291_v10, %v252_v8 }
 0x1ab   :  { %v3771_v15 = vadd.f32 %v878_v13, %v292_v14  ;;  %v3773_v16 = vadd.f32 %v782_v12, %v292_v14 }
 0x1ae   :  { %v305_v18 = vpop.f32.mrf.mxu2 }
 0x1af   :  { %v306_v19 = vadd.f32 %v305_v18, %v253_v17  ;;  %v339_v20 = vpop.f32.mrf.mxu3 }
 0x1b0   :  { %v487_v22 = vrot.slane %v339_v20, 2  ;;  %v351_v23 = vpop.f32.mrf.mxu1  ;;  %v358_v24 = vrot.slane %v339_v20, 6 }
 0x1b1   :  { %v783_v25 = vrot.slane %v351_v23, 6  ;;  %v879_v26 = vrot.slane %v351_v23, 2 }
 0x1b2   :  { %v3775_v27 = vadd.f32 %v487_v22, %v290_v21  ;;  %v3781_v30 = vadd.f32 %v358_v24, %v290_v21 }
 0x1b3   :  { %v3777_v28 = vadd.f32 %v879_v26, %v306_v19  ;;  %v3779_v29 = vadd.f32 %v783_v25, %v306_v19 }
 0x1b6   :  { %v417_v31 = vpop.f32.mrf.mxu2 }
 0x1b7   :  { %v434_v32 = vadd.f32 %v417_v31, %v3781_v30  ;;  %v430_v33 = vpop.f32.mrf.mxu3 }
 0x1b8   :  { %v3784_v34 = vpop.f32.mrf.mxu1 }
 0x1b9   :  { %v2685_v36 = vmul.f32 -1.442695, %v434_v32  ;;  %v359_v37 = vrot.slane %v3784_v34, 6  ;;  %v488_v25 = vrot.slane %v3784_v34, 2 }
 0x1bb   :  { %3002 = vpow2.f32 %v2685_v36  ;;  %v3790_v39 = vadd.f32 %v359_v37, %v3786_v35  ;;  %v3820_v32 = vadd.f32 %v488_v25, %v3786_v35 }
 0x1bd   :  { %v435_v40 = vadd.f32 %v430_v33, %v3790_v39 }
 0x1be   :  { %v419_v41 = vpop.f32.mrf.mxu2 }
 0x1bf   :  { %v2686_v43 = vmul.f32 -1.442695, %v435_v40  ;;  %v432_v44 = vpop.f32.mrf.mxu3 }
 0x1c1   :  { %v3003_v45 = vpop.eup %3002  ;;  %3004 = vpow2.f32 %v2686_v43 }
 0x1c2   :  { %v444_v46 = vadd.f32 1.0, %v3003_v45 }
 0x1c4   :  { %3006 = vrcp.f32 %v444_v46  ;;  %v457_v2 = vand.u32 2147483648, %v444_v46  ;;  %vm451_vm7 = vweird.f32 %v444_v46  ;;  %v455_v5 = vand.u32 2147483647, %v444_v46 }
 0x1c6   :  { %v458_v8 = vor.u32 1.1754944e-38, %v457_v2  ;;  %vm456_vm13 = vcmp.eq.f32.partialorder %v455_v5, 8.507059e+37 }
 0x1c7   :  { %v3005_v47 = vpop.eup %3004 }
 0x1c8   :  { %v445_v50 = vadd.f32 1.0, %v3005_v47 }
 0x1ca   :  { %v3007_v51 = vpop.eup %3006  ;;  %3008 = vrcp.f32 %v445_v50  ;;  %v472_v62 = vand.u32 2147483648, %v445_v50  ;;  %v470_v4 = vand.u32 2147483647, %v445_v50  ;;  %vm466_vm9 = vweird.f32 %v445_v50 }
 0x1cb   :  { %v447_v52 = vmul.f32 %v3007_v51, %v444_v46  ;;  %3010 = vtanh.f32 %v435_v40  ;;  %vm452_vm5 = vweird.f32 %v3007_v51 }
 0x1cc   :  { %vm453_vm8 = vmor %vm451_vm7, %vm452_vm5  ;;  %v473_v11 = vor.u32 1.1754944e-38, %v472_v62  ;;  %vm471_vm12 = vcmp.eq.f32.partialorder %v470_v4, 8.507059e+37 }
 0x1cd   :  { %v448_v53 = vsub.f32 1.0, %v447_v52 }
 0x1cf   :  { %v449_v55 = vmul.f32 %v3007_v51, %v448_v53 }
 0x1d0   :  { %v3009_v54 = vpop.eup %3008 }
 0x1d1   :  { %v462_v56 = vmul.f32 %v3009_v54, %v445_v50  ;;  %v450_v61 = vadd.f32 %v3007_v51, %v449_v55  ;;  %vm467_vm6 = vweird.f32 %v3009_v54  ;;  %v3011_v10 = vpop.eup %3010 }
 0x1d2   :  { %vm468_vm11 = vmor %vm466_vm9, %vm467_vm6 }
 0x1d3   :  { %v463_v60 = vsub.f32 1.0, %v462_v56  ;;  %v454_v7 = vsel %vm453_vm8, %v3007_v51, %v450_v61 }
 0x1d4   :  { %v459_v13 = vsel %vm456_vm13, %v458_v8, %v454_v7 }
 0x1d5   :  { %v464_v3 = vmul.f32 %v3009_v54, %v463_v60  ;;  %v478_v18 = vmul.f32 0.0, %v459_v13 }
 0x1d7   :  { %v465_v6 = vadd.f32 %v3009_v54, %v464_v3 }
 0x1d9   :  { %v469_v9 = vsel %vm468_vm11, %v3009_v54, %v465_v6 }
 0x1da   :  { %v474_v12 = vsel %vm471_vm12, %v473_v11, %v469_v9 }
 0x1db   :  { %v477_v14 = vsel %vm230_vm10, %v3011_v10, %v474_v12 }
 0x1dc   :  { %v479_v17 = vmul.f32 %v477_v14, %v459_v13 }
 0x1de   :  { %481 = vrot.lane.b32.xlu1 %v479_v17, %s3447_s23 }
 0x250   :  { %v482_v19 = vpop.permute.xlu1 %481 }
 0x251   :  { %v3800_v20 = vadd.f32 %v482_v19, %v478_v18 }
 0x253   :  { %3012 = vtanh.f32 %v3800_v20  ;;  %v577_v7 = vrot.slane %v3800_v20, 6 }
 0x259   :  { %v3013_v21 = vpop.eup %3012 }
 0x25a   :  { %v3803_v22 = vmul.f32 %v3013_v21, %v477_v14 }
 0x25c   :  { %v493_v23 = vpack.c.bf16 %v3803_v22, %v3803_v22 }
 0x25e   :  { %495 = vrot.lane.b32.xlu1 %v493_v23, %s3447_s23 }
 0x2d0   :  { %v496_v24 = vpop.permute.xlu1 %495 }
 0x2d1   :  { %2687 = vmatmul.msk.bf16.vlgmr.msrb.gmra.mxu0 %vm404_vm14, %v496_v24  ;;  %2688 = vmatmul.msk.bf16.vlgmr.msra.gmra.mxu1 %vm404_vm14, %v496_v24 }
 0x2d2   :  { %908 = vmatpush.bf16.msra.mxu1 %v3669_v42  ;;  %895 = vmatpush.bf16.msrb.mxu0 %v3658_v38 }
 0x2d6   :  { %909 = vmatpush.bf16.msra.mxu1 %v3688_v49  ;;  %896 = vmatpush.bf16.msrb.mxu0 %v3686_v48 }
 0x2da   :  { %910 = vmatpush.bf16.msra.mxu1 %v3713_v58  ;;  %897 = vmatpush.bf16.msrb.mxu0 %v3709_v57 }
 0x2de   :  { %911 = vmatpush.bf16.msra.mxu1 %v3732_v1  ;;  %898 = vmatpush.bf16.msrb.mxu0 %v3728_v63 }
 0x34e   :  { %v509_v26 = vpop.f32.mrf.mxu0  ;;  %v522_v31 = vpop.f32.mrf.mxu1 }
 0x34f   :  { %v528_v33 = vrot.slane %v509_v26, 6  ;;  %v529_v36 = vrot.slane %v522_v31, 6 }
 0x351   :  { %v532_v37 = vadd.f32 %v528_v33, %v3775_v27  ;;  %v533_v40 = vadd.f32 %v529_v36, %v3820_v32 }
 0x353   :  { %v2689_v41 = vmul.f32 -1.442695, %v532_v37  ;;  %v2690_v43 = vmul.f32 -1.442695, %v533_v40 }
 0x355   :  { %3014 = vpow2.f32 %v2689_v41 }
 0x356   :  { %3016 = vpow2.f32 %v2690_v43  ;;  %v511_v44 = vpop.f32.mrf.mxu0  ;;  %v524_v45 = vpop.f32.mrf.mxu1 }
 0x35b   :  { %v3015_v46 = vpop.eup %3014 }
 0x35c   :  { %v3017_v47 = vpop.eup %3016  ;;  %v542_v34 = vadd.f32 1.0, %v3015_v46 }
 0x35d   :  { %v543_v50 = vadd.f32 1.0, %v3017_v47 }
 0x35e   :  { %3018 = vrcp.f32 %v542_v34  ;;  %v555_v55 = vand.u32 2147483648, %v542_v34  ;;  %v553_v61 = vand.u32 2147483647, %v542_v34  ;;  %vm549_vm2 = vweird.f32 %v542_v34 }
 0x35f   :  { %3020 = vrcp.f32 %v543_v50  ;;  %v570_v62 = vand.u32 2147483648, %v543_v50  ;;  %v568_v3 = vand.u32 2147483647, %v543_v50  ;;  %vm564_vm5 = vweird.f32 %v543_v50 }
 0x360   :  { %3022 = vtanh.f32 %v533_v40  ;;  %v556_v5 = vor.u32 1.1754944e-38, %v555_v55  ;;  %vm554_vm6 = vcmp.eq.f32.partialorder %v553_v61, 8.507059e+37 }
 0x361   :  { %v571_v8 = vor.u32 1.1754944e-38, %v570_v62  ;;  %vm569_vm8 = vcmp.eq.f32.partialorder %v568_v3, 8.507059e+37 }
 0x364   :  { %v3019_v35 = vpop.eup %3018 }
 0x365   :  { %v3021_v51 = vpop.eup %3020  ;;  %v545_v52 = vmul.f32 %v3019_v35, %v542_v34  ;;  %vm550_vm15 = vweird.f32 %v3019_v35 }
 0x366   :  { %v560_v53 = vmul.f32 %v3021_v51, %v543_v50  ;;  %vm565_vm1 = vweird.f32 %v3021_v51  ;;  %vm551_vm3 = vmor %vm549_vm2, %vm550_vm15  ;;  %v3023_v9 = vpop.eup %3022 }
 0x367   :  { %v546_v54 = vsub.f32 1.0, %v545_v52  ;;  %vm566_vm7 = vmor %vm564_vm5, %vm565_vm1 }
 0x368   :  { %v561_v56 = vsub.f32 1.0, %v560_v53 }
 0x369   :  { %v547_v60 = vmul.f32 %v3019_v35, %v546_v54 }
 0x36a   :  { %v562_v2 = vmul.f32 %v3021_v51, %v561_v56 }
 0x36b   :  { %v548_v4 = vadd.f32 %v3019_v35, %v547_v60 }
 0x36c   :  { %v563_v6 = vadd.f32 %v3021_v51, %v562_v2 }
 0x36d   :  { %v552_v11 = vsel %vm551_vm3, %v3019_v35, %v548_v4 }
 0x36e   :  { %v557_v10 = vsel %vm554_vm6, %v556_v5, %v552_v11  ;;  %v567_v12 = vsel %vm566_vm7, %v3021_v51, %v563_v6 }
 0x36f   :  { %v572_v13 = vsel %vm569_vm8, %v571_v8, %v567_v12  ;;  %v579_v14 = vmul.f32 %v577_v7, %v557_v10 }
 0x370   :  { %v575_v17 = vsel %vm230_vm10, %v3023_v9, %v572_v13 }
 0x371   :  { %v580_v18 = vmul.f32 %v575_v17, %v557_v10 }
 0x373   :  { %582 = vrot.lane.b32.xlu2 %v580_v18, %s3447_s23 }
 0x3cd   :  { %v583_v19 = vpop.permute.xlu2 %582 }
 0x3ce   :  { %v3828_v21 = vadd.f32 %v583_v19, %v579_v14 }
 0x3d0   :  { %3024 = vtanh.f32 %v3828_v21  ;;  %v673_v6 = vrot.slane %v3828_v21, 6 }
 0x3d6   :  { %v3025_v20 = vpop.eup %3024 }
 0x3d7   :  { %v3831_v23 = vmul.f32 %v3025_v20, %v575_v17 }
 0x3d9   :  { %v588_v24 = vpack.c.bf16 %v3831_v23, %v3831_v23 }
 0x3db   :  { %v590_v25 = vrot.slane %v588_v24, 1 }
 0x3dd   :  { %591 = vrot.lane.b32.xlu2 %v590_v25, %s3447_s23 }
 0x437   :  { %v592_v26 = vpop.permute.xlu2 %591 }
 0x438   :  { %2691 = vmatmul.msk.bf16.vlgmr.msra.gmra.mxu2 %vm404_vm14, %v592_v26  ;;  %2692 = vmatmul.msk.bf16.vlgmr.msra.gmra.mxu3 %vm404_vm14, %v592_v26 }
 0x439   :  { %1004 = vmatpush.bf16.msra.mxu3 %v3669_v42  ;;  %991 = vmatpush.bf16.msra.mxu2 %v3658_v38 }
 0x43d   :  { %1005 = vmatpush.bf16.msra.mxu3 %v3688_v49  ;;  %992 = vmatpush.bf16.msra.mxu2 %v3686_v48 }
 0x441   :  { %1006 = vmatpush.bf16.msra.mxu3 %v3713_v58  ;;  %993 = vmatpush.bf16.msra.mxu2 %v3709_v57 }
 0x445   :  { %1007 = vmatpush.bf16.msra.mxu3 %v3732_v1  ;;  %994 = vmatpush.bf16.msra.mxu2 %v3728_v63 }
 0x4bb   :  { %v605_v31 = vpop.f32.mrf.mxu2  ;;  %v618_v33 = vpop.f32.mrf.mxu3 }
 0x4bc   :  { %v624_v36 = vrot.slane %v605_v31, 4  ;;  %v625_v37 = vrot.slane %v618_v33, 4 }
 0x4be   :  { %v628_v40 = vadd.f32 %v624_v36, %v3781_v30  ;;  %v629_v41 = vadd.f32 %v625_v37, %v3790_v39 }
 0x4c0   :  { %v2693_v43 = vmul.f32 -1.442695, %v628_v40  ;;  %v2694_v44 = vmul.f32 -1.442695, %v629_v41 }
 0x4c2   :  { %3026 = vpow2.f32 %v2693_v43 }
 0x4c3   :  { %3028 = vpow2.f32 %v2694_v44  ;;  %v607_v45 = vpop.f32.mrf.mxu2  ;;  %v620_v46 = vpop.f32.mrf.mxu3 }
 0x4c8   :  { %v3027_v47 = vpop.eup %3026 }
 0x4c9   :  { %v3029_v34 = vpop.eup %3028  ;;  %v638_v50 = vadd.f32 1.0, %v3027_v47 }
 0x4ca   :  { %v639_v35 = vadd.f32 1.0, %v3029_v34 }
 0x4cb   :  { %3030 = vrcp.f32 %v638_v50  ;;  %v651_v30 = vand.u32 2147483648, %v638_v50  ;;  %v649_v60 = vand.u32 2147483647, %v638_v50  ;;  %vm645_vm12 = vweird.f32 %v638_v50 }
 0x4cc   :  { %3032 = vrcp.f32 %v639_v35  ;;  %v666_v61 = vand.u32 2147483648, %v639_v35  ;;  %v664_v2 = vand.u32 2147483647, %v639_v35  ;;  %vm660_vm15 = vweird.f32 %v639_v35 }
 0x4cd   :  { %3034 = vtanh.f32 %v629_v41  ;;  %v652_v4 = vor.u32 1.1754944e-38, %v651_v30  ;;  %vm650_vm1 = vcmp.eq.f32.partialorder %v649_v60, 8.507059e+37 }
 0x4ce   :  { %v667_v11 = vor.u32 1.1754944e-38, %v666_v61  ;;  %vm665_vm3 = vcmp.eq.f32.partialorder %v664_v2, 8.507059e+37 }
 0x4d1   :  { %v3031_v51 = vpop.eup %3030 }
 0x4d2   :  { %v3033_v52 = vpop.eup %3032  ;;  %v641_v53 = vmul.f32 %v3031_v51, %v638_v50  ;;  %vm646_vm9 = vweird.f32 %v3031_v51 }
 0x4d3   :  { %v656_v54 = vmul.f32 %v3033_v52, %v639_v35  ;;  %vm661_vm11 = vweird.f32 %v3033_v52  ;;  %vm647_vm13 = vmor %vm645_vm12, %vm646_vm9  ;;  %v3035_v8 = vpop.eup %3034 }
 0x4d4   :  { %v642_v55 = vsub.f32 1.0, %v641_v53  ;;  %vm662_vm2 = vmor %vm660_vm15, %vm661_vm11 }
 0x4d5   :  { %v657_v39 = vsub.f32 1.0, %v656_v54 }
 0x4d6   :  { %v643_v56 = vmul.f32 %v3031_v51, %v642_v55 }
 0x4d7   :  { %v658_v62 = vmul.f32 %v3033_v52, %v657_v39 }
 0x4d8   :  { %v644_v3 = vadd.f32 %v3031_v51, %v643_v56 }
 0x4d9   :  { %v659_v5 = vadd.f32 %v3033_v52, %v658_v62 }
 0x4da   :  { %v648_v7 = vsel %vm647_vm13, %v3031_v51, %v644_v3 }
 0x4db   :  { %v653_v9 = vsel %vm650_vm1, %v652_v4, %v648_v7  ;;  %v663_v10 = vsel %vm662_vm2, %v3033_v52, %v659_v5 }
 0x4dc   :  { %v668_v12 = vsel %vm665_vm3, %v667_v11, %v663_v10  ;;  %v675_v13 = vmul.f32 %v673_v6, %v653_v9 }
 0x4dd   :  { %v671_v14 = vsel %vm230_vm10, %v3035_v8, %v668_v12 }
 0x4de   :  { %v676_v17 = vmul.f32 %v671_v14, %v653_v9 }
 0x4e0   :  { %678 = vrot.lane.b32.xlu0 %v676_v17, %s3447_s23 }
 0x552   :  { %v679_v18 = vpop.permute.xlu0 %678 }
 0x553   :  { %v3852_v19 = vadd.f32 %v679_v18, %v675_v13 }
 0x555   :  { %3036 = vtanh.f32 %v3852_v19  ;;  %v769_v30 = vrot.slane %v3852_v19, 6 }
 0x55b   :  { %v3037_v21 = vpop.eup %3036 }
 0x55c   :  { %v3855_v20 = vmul.f32 %v3037_v21, %v671_v14 }
 0x55e   :  { %v684_v24 = vpack.c.bf16 %v3855_v20, %v3855_v20 }
 0x560   :  { %v686_v25 = vrot.slane %v684_v24, 2 }
 0x562   :  { %687 = vrot.lane.b32.xlu1 %v686_v25, %s3447_s23 }
 0x5d4   :  { %v688_v26 = vpop.permute.xlu1 %687 }
 0x5d5   :  { %2695 = vmatmul.msk.bf16.vlgmr.msra.gmra.mxu0 %vm404_vm14, %v688_v26  ;;  %2696 = vmatmul.msk.bf16.vlgmr.msrb.gmra.mxu1 %vm404_vm14, %v688_v26 }
 0x5d6   :  { %1100 = vmatpush.bf16.msrb.mxu1 %v3669_v42  ;;  %1087 = vmatpush.bf16.msra.mxu0 %v3658_v38 }
 0x5da   :  { %1101 = vmatpush.bf16.msrb.mxu1 %v3688_v49  ;;  %1088 = vmatpush.bf16.msra.mxu0 %v3686_v48 }
 0x5de   :  { %1102 = vmatpush.bf16.msrb.mxu1 %v3713_v58  ;;  %1089 = vmatpush.bf16.msra.mxu0 %v3709_v57 }
 0x5e2   :  { %1103 = vmatpush.bf16.msrb.mxu1 %v3732_v1  ;;  %1090 = vmatpush.bf16.msra.mxu0 %v3728_v63 }
 0x652   :  { %v701_v31 = vpop.f32.mrf.mxu0  ;;  %v714_v33 = vpop.f32.mrf.mxu1 }
 0x653   :  { %v720_v36 = vrot.slane %v701_v31, 2  ;;  %v721_v37 = vrot.slane %v714_v33, 2 }
 0x655   :  { %v724_v42 = vadd.f32 %v720_v36, %v3775_v27  ;;  %v725_v38 = vadd.f32 %v721_v37, %v3820_v32 }
 0x657   :  { %v2697_v40 = vmul.f32 -1.442695, %v724_v42  ;;  %v2698_v49 = vmul.f32 -1.442695, %v725_v38 }
 0x659   :  { %3038 = vpow2.f32 %v2697_v40 }
 0x65a   :  { %3040 = vpow2.f32 %v2698_v49  ;;  %v703_v48 = vpop.f32.mrf.mxu0  ;;  %v716_v58 = vpop.f32.mrf.mxu1 }
 0x65f   :  { %v3039_v41 = vpop.eup %3038 }
 0x660   :  { %v3041_v57 = vpop.eup %3040  ;;  %v734_v43 = vadd.f32 1.0, %v3039_v41 }
 0x661   :  { %v735_v1 = vadd.f32 1.0, %v3041_v57 }
 0x662   :  { %3042 = vrcp.f32 %v734_v43  ;;  %v747_v27 = vand.u32 2147483648, %v734_v43  ;;  %v745_v50 = vand.u32 2147483647, %v734_v43  ;;  %vm741_vm7 = vweird.f32 %v734_v43 }
 0x663   :  { %3044 = vrcp.f32 %v735_v1  ;;  %v762_v35 = vand.u32 2147483648, %v735_v1  ;;  %v760_v52 = vand.u32 2147483647, %v735_v1  ;;  %vm756_vm9 = vweird.f32 %v735_v1 }
 0x664   :  { %3046 = vtanh.f32 %v725_v38  ;;  %v748_v54 = vor.u32 1.1754944e-38, %v747_v27  ;;  %vm746_vm11 = vcmp.eq.f32.partialorder %v745_v50, 8.507059e+37 }
 0x665   :  { %v763_v56 = vor.u32 1.1754944e-38, %v762_v35  ;;  %vm761_vm13 = vcmp.eq.f32.partialorder %v760_v52, 8.507059e+37 }
 0x668   :  { %v3043_v63 = vpop.eup %3042 }
 0x669   :  { %v3045_v44 = vpop.eup %3044  ;;  %v737_v45 = vmul.f32 %v3043_v63, %v734_v43  ;;  %vm742_vm5 = vweird.f32 %v3043_v63 }
 0x66a   :  { %v752_v46 = vmul.f32 %v3045_v44, %v735_v1  ;;  %vm757_vm6 = vweird.f32 %v3045_v44  ;;  %vm743_vm8 = vmor %vm741_vm7, %vm742_vm5  ;;  %v3047_v60 = vpop.eup %3046 }
 0x66b   :  { %v738_v47 = vsub.f32 1.0, %v737_v45  ;;  %vm758_vm12 = vmor %vm756_vm9, %vm757_vm6 }
 0x66c   :  { %v753_v32 = vsub.f32 1.0, %v752_v46 }
 0x66d   :  { %v739_v34 = vmul.f32 %v3043_v63, %v738_v47 }
 0x66e   :  { %v754_v51 = vmul.f32 %v3045_v44, %v753_v32 }
 0x66f   :  { %v740_v53 = vadd.f32 %v3043_v63, %v739_v34 }
 0x670   :  { %v755_v55 = vadd.f32 %v3045_v44, %v754_v51 }
 0x671   :  { %v744_v39 = vsel %vm743_vm8, %v3043_v63, %v740_v53 }
 0x672   :  { %v749_v61 = vsel %vm746_vm11, %v748_v54, %v744_v39  ;;  %v759_v62 = vsel %vm758_vm12, %v3045_v44, %v755_v55 }
 0x673   :  { %v764_v2 = vsel %vm761_vm13, %v763_v56, %v759_v62  ;;  %v771_v3 = vmul.f32 %v769_v30, %v749_v61 }
 0x674   :  { %v767_v4 = vsel %vm230_vm10, %v3047_v60, %v764_v2 }
 0x675   :  { %v772_v5 = vmul.f32 %v767_v4, %v749_v61 }
 0x677   :  { %774 = vrot.lane.b32.xlu2 %v772_v5, %s3447_s23 }
 0x6d1   :  { %v775_v6 = vpop.permute.xlu2 %774 }
 0x6d2   :  { %v777_v7 = vadd.f32 %v775_v6, %v771_v3 }
 0x6d4   :  { %3048 = vtanh.f32 %v777_v7  ;;  %v867_v47 = vrot.slane %v777_v7, 6 }
 0x6da   :  { %v3049_v11 = vpop.eup %3048 }
 0x6db   :  { %v3876_v8 = vmul.f32 %v3049_v11, %v767_v4 }
 0x6dd   :  { %v788_v9 = vpack.c.bf16 %v3876_v8, %v3876_v8 }
 0x6df   :  { %v790_v10 = vrot.slane %v788_v9, 3 }
 0x6e1   :  { %791 = vrot.lane.b32.xlu0 %v790_v10, %s3447_s23 }
 0x753   :  { %v792_v12 = vpop.permute.xlu0 %791 }
 0x754   :  { %2699 = vmatmul.msk.bf16.vlgmr.msrb.gmra.mxu2 %vm404_vm14, %v792_v12  ;;  %2700 = vmatmul.msk.bf16.vlgmr.msrb.gmra.mxu3 %vm404_vm14, %v792_v12 }
 0x7d7   :  { %v805_v13 = vpop.f32.mrf.mxu2  ;;  %v818_v14 = vpop.f32.mrf.mxu3 }
 0x7d8   :  { %v822_v17 = vadd.f32 %v805_v13, %v3773_v16  ;;  %v823_v18 = vadd.f32 %v818_v14, %v3779_v29 }
 0x7da   :  { %v2701_v19 = vmul.f32 -1.442695, %v822_v17  ;;  %v2702_v21 = vmul.f32 -1.442695, %v823_v18 }
 0x7dc   :  { %3050 = vpow2.f32 %v2701_v19 }
 0x7dd   :  { %3052 = vpow2.f32 %v2702_v21 }
 0x7df   :  { %v807_v24 = vpop.f32.mrf.mxu2  ;;  %v820_v25 = vpop.f32.mrf.mxu3 }
 0x7e2   :  { %v3051_v26 = vpop.eup %3050 }
 0x7e3   :  { %v3053_v31 = vpop.eup %3052  ;;  %v832_v33 = vadd.f32 1.0, %v3051_v26 }
 0x7e4   :  { %v833_v36 = vadd.f32 1.0, %v3053_v31 }
 0x7e5   :  { %3054 = vrcp.f32 %v832_v33  ;;  %v845_v48 = vand.u32 2147483648, %v832_v33  ;;  %v843_v57 = vand.u32 2147483647, %v832_v33  ;;  %vm839_vm2 = vweird.f32 %v832_v33 }
 0x7e6   :  { %3056 = vrcp.f32 %v833_v36  ;;  %v860_v43 = vand.u32 2147483648, %v833_v36  ;;  %v858_v63 = vand.u32 2147483647, %v833_v36  ;;  %vm854_vm5 = vweird.f32 %v833_v36 }
 0x7e7   :  { %3058 = vtanh.f32 %v823_v18  ;;  %v846_v45 = vor.u32 1.1754944e-38, %v845_v48  ;;  %vm844_vm6 = vcmp.eq.f32.partialorder %v843_v57, 8.507059e+37 }
 0x7e8   :  { %v861_v32 = vor.u32 1.1754944e-38, %v860_v43  ;;  %vm859_vm8 = vcmp.eq.f32.partialorder %v858_v63, 8.507059e+37 }
 0x7eb   :  { %v3055_v37 = vpop.eup %3054 }
 0x7ec   :  { %v3057_v42 = vpop.eup %3056  ;;  %v835_v38 = vmul.f32 %v3055_v37, %v832_v33  ;;  %vm840_vm15 = vweird.f32 %v3055_v37 }
 0x7ed   :  { %v850_v40 = vmul.f32 %v3057_v42, %v833_v36  ;;  %vm855_vm1 = vweird.f32 %v3057_v42  ;;  %vm841_vm3 = vmor %vm839_vm2, %vm840_vm15  ;;  %v3059_v34 = vpop.eup %3058 }
 0x7ee   :  { %v836_v49 = vsub.f32 1.0, %v835_v38  ;;  %vm856_vm7 = vmor %vm854_vm5, %vm855_vm1 }
 0x7ef   :  { %v851_v58 = vsub.f32 1.0, %v850_v40 }
 0x7f0   :  { %v837_v41 = vmul.f32 %v3055_v37, %v836_v49 }
 0x7f1   :  { %v852_v1 = vmul.f32 %v3057_v42, %v851_v58 }
 0x7f2   :  { %v838_v44 = vadd.f32 %v3055_v37, %v837_v41 }
 0x7f3   :  { %v853_v46 = vadd.f32 %v3057_v42, %v852_v1 }
 0x7f4   :  { %v842_v27 = vsel %vm841_vm3, %v3055_v37, %v838_v44 }
 0x7f5   :  { %v847_v50 = vsel %vm844_vm6, %v846_v45, %v842_v27  ;;  %v857_v35 = vsel %vm856_vm7, %v3057_v42, %v853_v46 }
 0x7f6   :  { %v862_v51 = vsel %vm859_vm8, %v861_v32, %v857_v35  ;;  %v869_v52 = vmul.f32 %v867_v47, %v847_v50 }
 0x7f7   :  { %v865_v53 = vsel %vm230_vm10, %v3059_v34, %v862_v51 }
 0x7f8   :  { %v870_v54 = vmul.f32 %v865_v53, %v847_v50 }
 0x7fa   :  { %872 = vrot.lane.b32.xlu1 %v870_v54, %s3447_s23 }
 0x86c   :  { %v873_v55 = vpop.permute.xlu1 %872 }
 0x86d   :  { %v875_v30 = vadd.f32 %v873_v55, %v869_v52 }
 0x86f   :  { %3060 = vtanh.f32 %v875_v30  ;;  %v968_v58 = vrot.slane %v875_v30, 6 }
 0x875   :  { %v3061_v39 = vpop.eup %3060 }
 0x876   :  { %v3888_v56 = vmul.f32 %v3061_v39, %v865_v53 }
 0x878   :  { %v884_v60 = vpack.c.bf16 %v3888_v56, %v3888_v56 }
 0x87a   :  { %886 = vrot.lane.b32.xlu2 %v884_v60, %s3447_s23 }
 0x8d4   :  { %v887_v61 = vpop.permute.xlu2 %886 }
 0x8d5   :  { %2703 = vmatmul.msk.bf16.vlgmr.msrb.gmra.mxu0 %vm404_vm14, %v887_v61  ;;  %2704 = vmatmul.msk.bf16.vlgmr.msra.gmra.mxu1 %vm404_vm14, %v887_v61 }
 0x952   :  { %v900_v62 = vpop.f32.mrf.mxu0  ;;  %v913_v2 = vpop.f32.mrf.mxu1 }
 0x953   :  { %v919_v3 = vrot.slane %v900_v62, 6  ;;  %v920_v4 = vrot.slane %v913_v2, 6 }
 0x955   :  { %v923_v5 = vadd.f32 %v919_v3, %v3771_v15  ;;  %v924_v6 = vadd.f32 %v920_v4, %v3777_v28 }
 0x957   :  { %v2705_v7 = vmul.f32 -1.442695, %v923_v5  ;;  %v2706_v11 = vmul.f32 -1.442695, %v924_v6 }
 0x959   :  { %3062 = vpow2.f32 %v2705_v7 }
 0x95a   :  { %3064 = vpow2.f32 %v2706_v11  ;;  %v902_v9 = vpop.f32.mrf.mxu0  ;;  %v915_v10 = vpop.f32.mrf.mxu1 }
 0x95f   :  { %v3063_v12 = vpop.eup %3062 }
 0x960   :  { %v3065_v13 = vpop.eup %3064  ;;  %v933_v14 = vadd.f32 1.0, %v3063_v12 }
 0x961   :  { %v934_v17 = vadd.f32 1.0, %v3065_v13 }
 0x962   :  { %3066 = vrcp.f32 %v933_v14  ;;  %v946_v26 = vand.u32 2147483648, %v933_v14  ;;  %v944_v36 = vand.u32 2147483647, %v933_v14  ;;  %vm940_vm12 = vweird.f32 %v933_v14 }
 0x963   :  { %3068 = vrcp.f32 %v934_v17  ;;  %v961_v37 = vand.u32 2147483648, %v934_v17  ;;  %v959_v38 = vand.u32 2147483647, %v934_v17  ;;  %vm955_vm15 = vweird.f32 %v934_v17 }
 0x964   :  { %3070 = vtanh.f32 %v924_v6  ;;  %v947_v49 = vor.u32 1.1754944e-38, %v946_v26  ;;  %vm945_vm1 = vcmp.eq.f32.partialorder %v944_v36, 8.507059e+37 }
 0x965   :  { %v962_v57 = vor.u32 1.1754944e-38, %v961_v37  ;;  %vm960_vm3 = vcmp.eq.f32.partialorder %v959_v38, 8.507059e+37 }
 0x968   :  { %v3067_v18 = vpop.eup %3066 }
 0x969   :  { %v3069_v19 = vpop.eup %3068  ;;  %v936_v21 = vmul.f32 %v3067_v18, %v933_v14  ;;  %vm941_vm9 = vweird.f32 %v3067_v18 }
 0x96a   :  { %v951_v24 = vmul.f32 %v3069_v19, %v934_v17  ;;  %vm956_vm11 = vweird.f32 %v3069_v19  ;;  %vm942_vm13 = vmor %vm940_vm12, %vm941_vm9  ;;  %v3071_v43 = vpop.eup %3070 }
 0x96b   :  { %v937_v25 = vsub.f32 1.0, %v936_v21  ;;  %vm957_vm2 = vmor %vm955_vm15, %vm956_vm11 }
 0x96c   :  { %v952_v31 = vsub.f32 1.0, %v951_v24 }
 0x96d   :  { %v938_v33 = vmul.f32 %v3067_v18, %v937_v25 }
 0x96e   :  { %v953_v42 = vmul.f32 %v3069_v19, %v952_v31 }
 0x96f   :  { %v939_v40 = vadd.f32 %v3067_v18, %v938_v33 }
 0x970   :  { %v954_v48 = vadd.f32 %v3069_v19, %v953_v42 }
 0x971   :  { %v943_v41 = vsel %vm942_vm13, %v3067_v18, %v939_v40 }
 0x972   :  { %v948_v1 = vsel %vm945_vm1, %v947_v49, %v943_v41  ;;  %v958_v63 = vsel %vm957_vm2, %v3069_v19, %v954_v48  ;;  %v1222_v41 = vrot.slane %v3855_v20, 2 }
 0x973   :  { %v963_v44 = vsel %vm960_vm3, %v962_v57, %v958_v63  ;;  %v970_v45 = vmul.f32 %v968_v58, %v948_v1 }
 0x974   :  { %v966_v46 = vsel %vm230_vm10, %v3071_v43, %v963_v44 }
 0x975   :  { %v971_v47 = vmul.f32 %v966_v46, %v948_v1 }
 0x977   :  { %973 = vrot.lane.b32.xlu0 %v971_v47, %s3447_s23 }
 0x9e9   :  { %v974_v27 = vpop.permute.xlu0 %973 }
 0x9ea   :  { %v976_v32 = vadd.f32 %v974_v27, %v970_v45 }
 0x9ec   :  { %3072 = vtanh.f32 %v976_v32  ;;  %v1064_v31 = vrot.slane %v976_v32, 6 }
 0x9f2   :  { %v3073_v34 = vpop.eup %3072 }
 0x9f3   :  { %v3900_v50 = vmul.f32 %v3073_v34, %v966_v46 }
 0x9f5   :  { %v979_v35 = vpack.c.bf16 %v3900_v50, %v3900_v50  ;;  %v2960_v57 = vpack.i.bf16 %v1222_v41, %v3900_v50  ;;  %v1196_v32 = vrot.slane %v3900_v50, 6 }
 0x9f7   :  { %v981_v51 = vrot.slane %v979_v35, 1  ;;  %v2965_v34 = vpack.i.bf16 %v1196_v32, %v3855_v20 }
 0x9f9   :  { %982 = vrot.lane.b32.xlu1 %v981_v51, %s3447_s23 }
 0xa6b   :  { %v983_v52 = vpop.permute.xlu1 %982 }
 0xa6c   :  { %2707 = vmatmul.msk.bf16.vlgmr.msra.gmra.mxu2 %vm404_vm14, %v983_v52  ;;  %2708 = vmatmul.msk.bf16.vlgmr.msra.gmra.mxu3 %vm404_vm14, %v983_v52 }
 0xaef   :  { %v996_v53 = vpop.f32.mrf.mxu2  ;;  %v1009_v54 = vpop.f32.mrf.mxu3 }
 0xaf0   :  { %v1015_v55 = vrot.slane %v996_v53, 4  ;;  %v1016_v30 = vrot.slane %v1009_v54, 4 }
 0xaf2   :  { %v1019_v39 = vadd.f32 %v1015_v55, %v3773_v16  ;;  %v1020_v60 = vadd.f32 %v1016_v30, %v3779_v29 }
 0xaf4   :  { %v2709_v61 = vmul.f32 -1.442695, %v1019_v39  ;;  %v2710_v62 = vmul.f32 -1.442695, %v1020_v60 }
 0xaf6   :  { %3074 = vpow2.f32 %v2709_v61 }
 0xaf7   :  { %3076 = vpow2.f32 %v2710_v62  ;;  %v998_v2 = vpop.f32.mrf.mxu2  ;;  %v1011_v3 = vpop.f32.mrf.mxu3 }
 0xafc   :  { %v3075_v4 = vpop.eup %3074 }
 0xafd   :  { %v3077_v5 = vpop.eup %3076  ;;  %v1029_v6 = vadd.f32 1.0, %v3075_v4 }
 0xafe   :  { %v1030_v7 = vadd.f32 1.0, %v3077_v5 }
 0xaff   :  { %3078 = vrcp.f32 %v1029_v6  ;;  %v1042_v16 = vand.u32 2147483648, %v1029_v6  ;;  %v1040_v17 = vand.u32 2147483647, %v1029_v6  ;;  %vm1036_vm7 = vweird.f32 %v1029_v6 }
 0xb00   :  { %3080 = vrcp.f32 %v1030_v7  ;;  %v1057_v18 = vand.u32 2147483648, %v1030_v7  ;;  %v1055_v21 = vand.u32 2147483647, %v1030_v7  ;;  %vm1051_vm9 = vweird.f32 %v1030_v7 }
 0xb01   :  { %3082 = vtanh.f32 %v1020_v60  ;;  %v1043_v25 = vor.u32 1.1754944e-38, %v1042_v16  ;;  %vm1041_vm11 = vcmp.eq.f32.partialorder %v1040_v17, 8.507059e+37 }
 0xb02   :  { %v1058_v36 = vor.u32 1.1754944e-38, %v1057_v18  ;;  %vm1056_vm13 = vcmp.eq.f32.partialorder %v1055_v21, 8.507059e+37 }
 0xb05   :  { %v3079_v11 = vpop.eup %3078 }
 0xb06   :  { %v3081_v9 = vpop.eup %3080  ;;  %v1032_v10 = vmul.f32 %v3079_v11, %v1029_v6  ;;  %vm1037_vm5 = vweird.f32 %v3079_v11 }
 0xb07   :  { %v1047_v12 = vmul.f32 %v3081_v9, %v1030_v7  ;;  %vm1052_vm6 = vweird.f32 %v3081_v9  ;;  %vm1038_vm8 = vmor %vm1036_vm7, %vm1037_vm5  ;;  %v3083_v37 = vpop.eup %3082 }
 0xb08   :  { %v1033_v13 = vsub.f32 1.0, %v1032_v10  ;;  %vm1053_vm12 = vmor %vm1051_vm9, %vm1052_vm6  ;;  %vm1244_vm9 = vcmask 1043456  }
 0xb09   :  { %v1048_v29 = vsub.f32 1.0, %v1047_v12 }
 0xb0a   :  { %v1034_v14 = vmul.f32 %v3079_v11, %v1033_v13 }
 0xb0b   :  { %v1049_v19 = vmul.f32 %v3081_v9, %v1048_v29 }
 0xb0c   :  { %v1035_v24 = vadd.f32 %v3079_v11, %v1034_v14 }
 0xb0d   :  { %v1050_v26 = vadd.f32 %v3081_v9, %v1049_v19 }
 0xb0e   :  { %v1039_v33 = vsel %vm1038_vm8, %v3079_v11, %v1035_v24 }
 0xb0f   :  { %v1044_v42 = vsel %vm1041_vm11, %v1043_v25, %v1039_v33  ;;  %v1054_v38 = vsel %vm1053_vm12, %v3081_v9, %v1050_v26  ;;  %vm1246_vm11 = vcmask 1045504  }
 0xb10   :  { %v1059_v40 = vsel %vm1056_vm13, %v1058_v36, %v1054_v38  ;;  %v1066_v49 = vmul.f32 %v1064_v31, %v1044_v42 }
 0xb11   :  { %v1062_v48 = vsel %vm230_vm10, %v3083_v37, %v1059_v40  ;;  %v1230_v40 = vrot.slane %v3831_v23, 6 }
 0xb12   :  { %v1067_v58 = vmul.f32 %v1062_v48, %v1044_v42  ;;  %v1214_v42 = vrot.slane %v3876_v8, 6 }
 0xb14   :  { %1069 = vrot.lane.b32.xlu2 %v1067_v58, %s3447_s23  ;;  %v2955_v38 = vpack.i.bf16 %v1214_v42, %v3888_v56  ;;  %v2917_v42 = vld [vmem:[#allocation10 + $0x34] sm:$0xf] }
 0xb1c   :  { %2961 = vrot.lane.b32.xlu2 %v2960_v57, %s3447_s23 }
 0xb6e   :  { %v1070_v43 = vpop.permute.xlu2 %1069 }
 0xb6f   :  { %v3915_v1 = vadd.f32 %v1070_v43, %v1066_v49  ;;  %v1238_v43 = vrot.slane %v3803_v22, 2 }
 0xb71   :  { %3084 = vtanh.f32 %v3915_v1  ;;  %v1160_v18 = vrot.slane %v3915_v1, 6 }
 0xb77   :  { %v3085_v63 = vpop.eup %3084 }
 0xb78   :  { %v3918_v44 = vmul.f32 %v3085_v63, %v1062_v48 }
 0xb7a   :  { %v1075_v45 = vpack.c.bf16 %v3918_v44, %v3918_v44  ;;  %v1186_v47 = vrot.slane %v3918_v44, 2  ;;  %v2970_v49 = vpack.i.bf16 %v1230_v40, %v3918_v44  ;;  %v2809_v40 = vld [vmem:[#allocation10 + $0x30] sm:$0xf] }
 0xb7c   :  { %v1077_v46 = vrot.slane %v1075_v45, 2  ;;  %v2950_v27 = vpack.i.bf16 %v1186_v47, %v3831_v23  ;;  %v1206_v23 = vrot.slane %v3888_v56, 2  ;;  %v2743_v47 = vld [vmem:[#allocation5 + $0x38] sm:$0xf0]  ;;  %v2733_v56 = vld [vmem:[#allocation5 + $0x20] sm:$0xf] }
 0xb7e   :  { %1078 = vrot.lane.b32.xlu0 %v1077_v46, %s3447_s23  ;;  %v2980_v44 = vpack.i.bf16 %v1206_v23, %v3876_v8  ;;  %v2901_v46 = vld [vmem:[#allocation5 + $0x34] sm:$0xf] }
 0xb7f   :  { %v2746_v32 = vor.u32 %v2901_v46, %v2743_v47  ;;  %v2795_v46 = vld [vmem:[#allocation10 + $0x18] sm:$0xf0]  ;;  %v2793_v47 = vld [vmem:[#allocation10 + $0x10] sm:$0xf] }
 0xb81   :  { %1343 = vmatpush.bf16.msrb.mxu3 %v2746_v32 }
 0xb86   :  { %2951 = vrot.lane.b32.xlu0 %v2950_v27, %s3447_s23  ;;  %v2741_v27 = vld [vmem:[#allocation5 + $0x30] sm:$0xf] }
 0xb8e   :  { %2966 = vrot.lane.b32.xlu0 %v2965_v34, %s3447_s23  ;;  %v2902_v34 = vld [vmem:[#allocation5 + $0x34] sm:$0xf0] }
 0xbf0   :  { %v1079_v35 = vpop.permute.xlu0 %1078 }
 0xbf1   :  { %2711 = vmatmul.msk.bf16.vlgmr.msra.gmra.mxu0 %vm404_vm14, %v1079_v35  ;;  %2712 = vmatmul.msk.bf16.vlgmr.msrb.gmra.mxu1 %vm404_vm14, %v1079_v35  ;;  %v2775_v35 = vld [vmem:[#allocation7 + $0x30] sm:$0xf] }
 0xc6e   :  { %v1092_v51 = vpop.f32.mrf.mxu0  ;;  %v1105_v52 = vpop.f32.mrf.mxu1 }
 0xc6f   :  { %v1111_v53 = vrot.slane %v1092_v51, 2  ;;  %v1112_v54 = vrot.slane %v1105_v52, 2  ;;  %v2910_v51 = vld [vmem:[#allocation7 + $0x34] sm:$0xf0]  ;;  %v2742_v52 = vor.u32 %v2902_v34, %v2741_v27  ;;  %v2952_v34 = vpop.permute.xlu0 %2951 }
 0xc70   :  { %v2914_v27 = vld [vmem:[#allocation10 + $0x14] sm:$0xf0] }
 0xc71   :  { %v1115_v55 = vadd.f32 %v1111_v53, %v3771_v15  ;;  %v1116_v30 = vadd.f32 %v1112_v54, %v3777_v28  ;;  %v2776_v53 = vor.u32 %v2910_v51, %v2775_v35  ;;  %v2909_v54 = vld [vmem:[#allocation7 + $0x34] sm:$0xf]  ;;  %1329 = vmatpush.bf16.msrb.mxu2 %v2742_v52  ;;  %v3967_v35 = vor.u32 %v2914_v27, %v2793_v47  ;;  %v2911_v51 = vld [vmem:[#allocation10 + $0x4] sm:$0xf]  ;;  %v2787_v52 = vld [vmem:[#allocation10 + $0x8] sm:$0xf0] }
 0xc73   :  { %v2713_v39 = vmul.f32 -1.442695, %v1115_v55  ;;  %v2714_v60 = vmul.f32 -1.442695, %v1116_v30  ;;  %v2777_v55 = vld [vmem:[#allocation7 + $0x38] sm:$0xf0]  ;;  %1397 = vmatpush.bf16.msrb.mxu0 %v2776_v53 }
 0xc75   :  { %3086 = vpow2.f32 %v2713_v39  ;;  %v2735_v39 = vld [vmem:[#allocation5 + $0x28] sm:$0xf0] }
 0xc76   :  { %3088 = vpow2.f32 %v2714_v60  ;;  %v1094_v20 = vpop.f32.mrf.mxu0  ;;  %v1107_v50 = vpop.f32.mrf.mxu1  ;;  %v2900_v60 = vld [vmem:[#allocation5 + $0x24] sm:$0xf0] }
 0xc77   :  { %v2734_v20 = vor.u32 %v2900_v60, %v2733_v56  ;;  %v2767_v50 = vld [vmem:[#allocation7 + $0x20] sm:$0xf]  ;;  %v2967_v56 = vpop.permute.xlu0 %2966 }
 0xc79   :  { %1330 = vmatpush.bf16.msrb.mxu2 %v2734_v20 }
 0xc7b   :  { %v3087_v61 = vpop.eup %3086 }
 0xc7c   :  { %v3089_v62 = vpop.eup %3088  ;;  %v1125_v2 = vadd.f32 1.0, %v3087_v61  ;;  %v2908_v61 = vld [vmem:[#allocation7 + $0x24] sm:$0xf0] }
 0xc7d   :  { %v1126_v3 = vadd.f32 1.0, %v3089_v62  ;;  %v2907_v62 = vld [vmem:[#allocation7 + $0x24] sm:$0xf] }
 0xc7e   :  { %3090 = vrcp.f32 %v1125_v2  ;;  %v1138_v15 = vand.u32 2147483648, %v1125_v2  ;;  %v1136_v10 = vand.u32 2147483647, %v1125_v2  ;;  %vm1132_vm2 = vweird.f32 %v1125_v2 }
 0xc7f   :  { %3092 = vrcp.f32 %v1126_v3  ;;  %v1153_v12 = vand.u32 2147483648, %v1126_v3  ;;  %v1151_v16 = vand.u32 2147483647, %v1126_v3  ;;  %vm1147_vm5 = vweird.f32 %v1126_v3 }
 0xc80   :  { %3094 = vtanh.f32 %v1116_v30  ;;  %v1139_v14 = vor.u32 1.1754944e-38, %v1138_v15  ;;  %vm1137_vm6 = vcmp.eq.f32.partialorder %v1136_v10, 8.507059e+37  ;;  %v2780_v30 = vor.u32 %v2909_v54, %v2777_v55  ;;  %v2759_v15 = vld [vmem:[#allocation7 + $0x10] sm:$0xf]  ;;  %v2905_v10 = vld [vmem:[#allocation7 + $0x14] sm:$0xf] }
 0xc81   :  { %v1154_v21 = vor.u32 1.1754944e-38, %v1153_v12  ;;  %vm1152_vm8 = vcmp.eq.f32.partialorder %v1151_v16, 8.507059e+37  ;;  %v2761_v12 = vld [vmem:[#allocation7 + $0x18] sm:$0xf0]  ;;  %v2785_v54 = vld [vmem:[#allocation10] sm:$0xf] }
 0xc82   :  { %1411 = vmatpush.bf16.msra.mxu1 %v2780_v30  ;;  %v2912_v55 = vld [vmem:[#allocation10 + $0x4] sm:$0xf0]  ;;  %v3971_v30 = vor.u32 %v2911_v51, %v2787_v52 }
 0xc84   :  { %v3091_v4 = vpop.eup %3090 }
 0xc85   :  { %v3093_v5 = vpop.eup %3092  ;;  %v1128_v6 = vmul.f32 %v3091_v4, %v1125_v2  ;;  %vm1133_vm15 = vweird.f32 %v3091_v4  ;;  %v2768_v2 = vor.u32 %v2908_v61, %v2767_v50  ;;  %v2954_v61 = vunpack.i.h.bf16 %v2952_v34 }
 0xc86   :  { %v1143_v7 = vmul.f32 %v3093_v5, %v1126_v3  ;;  %vm1148_vm1 = vweird.f32 %v3093_v5  ;;  %vm1134_vm3 = vmor %vm1132_vm2, %vm1133_vm15  ;;  %v3095_v24 = vpop.eup %3094  ;;  %v2769_v3 = vld [vmem:[#allocation7 + $0x28] sm:$0xf0] }
 0xc87   :  { %v1129_v11 = vsub.f32 1.0, %v1128_v6  ;;  %vm1149_vm7 = vmor %vm1147_vm5, %vm1148_vm1  ;;  %v2772_v6 = vor.u32 %v2907_v62, %v2769_v3  ;;  %1398 = vmatpush.bf16.msrb.mxu0 %v2768_v2  ;;  %v2953_v62 = vunpack.i.l.bf16 %v2952_v34 }
 0xc88   :  { %v1144_v28 = vsub.f32 1.0, %v1143_v7  ;;  %v2725_v7 = vld [vmem:[#allocation5 + $0x10] sm:$0xf] }
 0xc89   :  { %v1130_v9 = vmul.f32 %v3091_v4, %v1129_v11  ;;  %v2898_v11 = vld [vmem:[#allocation5 + $0x14] sm:$0xf0]  ;;  %1412 = vmatpush.bf16.msra.mxu1 %v2772_v6 }
 0xc8a   :  { %v1145_v13 = vmul.f32 %v3093_v5, %v1144_v28 }
 0xc8b   :  { %v1131_v29 = vadd.f32 %v3091_v4, %v1130_v9  ;;  %v2906_v9 = vld [vmem:[#allocation7 + $0x14] sm:$0xf0] }
 0xc8c   :  { %v1146_v17 = vadd.f32 %v3093_v5, %v1145_v13  ;;  %v2726_v13 = vor.u32 %v2898_v11, %v2725_v7  ;;  %v2760_v16 = vor.u32 %v2906_v9, %v2759_v15  ;;  %v2969_v9 = vunpack.i.h.bf16 %v2967_v56 }
 0xc8d   :  { %v1135_v19 = vsel %vm1134_vm3, %v3091_v4, %v1131_v29  ;;  %v2897_v4 = vld [vmem:[#allocation5 + $0x14] sm:$0xf]  ;;  %v2764_v29 = vor.u32 %v2905_v10, %v2761_v12  ;;  %v2968_v10 = vunpack.i.l.bf16 %v2967_v56  ;;  %v1190_v12 = vsel %vm276_vm4, %v2953_v62, %v2954_v61 }
 0xc8e   :  { %v1140_v25 = vsel %vm1137_vm6, %v1139_v14, %v1135_v19  ;;  %v1150_v26 = vsel %vm1149_vm7, %v3093_v5, %v1146_v17  ;;  %v2727_v5 = vld [vmem:[#allocation5 + $0x18] sm:$0xf0]  ;;  %1331 = vmatpush.bf16.msrb.mxu2 %v2726_v13  ;;  %1399 = vmatpush.bf16.msrb.mxu0 %v2760_v16  ;;  %v2895_v14 = vld [vmem:[#allocation5 + $0x4] sm:$0xf]  ;;  %v2719_v17 = vld [vmem:[#allocation5 + $0x8] sm:$0xf0] }
 0xc8f   :  { %v1155_v31 = vsel %vm1152_vm8, %v1154_v21, %v1150_v26  ;;  %v1162_v33 = vmul.f32 %v1160_v18, %v1140_v25  ;;  %v2730_v28 = vor.u32 %v2897_v4, %v2727_v5  ;;  %v2717_v18 = vld [vmem:[#allocation5] sm:$0xf]  ;;  %1413 = vmatpush.bf16.msra.mxu1 %v2764_v29  ;;  %v2722_v19 = vor.u32 %v2895_v14, %v2719_v17  ;;  %v2896_v21 = vld [vmem:[#allocation5 + $0x4] sm:$0xf0] }
 0xc90   :  { %v1158_v36 = vsel %vm230_vm10, %v3095_v24, %v1155_v31  ;;  %v2751_v24 = vld [vmem:[#allocation7] sm:$0xf]  ;;  %v2718_v26 = vor.u32 %v2896_v21, %v2717_v18 }
 0xc91   :  { %v1163_v37 = vmul.f32 %v1158_v36, %v1140_v25  ;;  %v2904_v25 = vld [vmem:[#allocation7 + $0x4] sm:$0xf0] }
 0xc92   :  { %v2752_v31 = vor.u32 %v2904_v25, %v2751_v24  ;;  %1332 = vmatpush.bf16.msrb.mxu2 %v2718_v26  ;;  %v1200_v24 = vsel %vm276_vm4, %v2968_v10, %v2969_v9 }
 0xc93   :  { %1165 = vrot.lane.b32.xlu1 %v1163_v37, %s3447_s23 }
 0xc94   :  { %1400 = vmatpush.bf16.msrb.mxu0 %v2752_v31 }
 0xc9b   :  { %2956 = vrot.lane.b32.xlu1 %v2955_v38, %s3447_s23  ;;  %v2811_v38 = vld [vmem:[#allocation10 + $0x38] sm:$0xf0] }
 0xca3   :  { %2971 = vrot.lane.b32.xlu1 %v2970_v49, %s3447_s23  ;;  %v3950_v49 = vor.u32 %v2917_v42, %v2811_v38 }
 0xd05   :  { %v1166_v48 = vpop.permute.xlu1 %1165 }
 0xd06   :  { %v1168_v58 = vadd.f32 %v1166_v48, %v1162_v33  ;;  %v2903_v33 = vld [vmem:[#allocation7 + $0x4] sm:$0xf]  ;;  %v2918_v48 = vld [vmem:[#allocation10 + $0x34] sm:$0xf0] }
 0xd08   :  { %3096 = vtanh.f32 %v1168_v58  ;;  %v2962_v58 = vpop.permute.xlu2 %2961 }
 0xd09   :  { %v2964_v4 = vunpack.i.h.bf16 %v2962_v58  ;;  %v2963_v5 = vunpack.i.l.bf16 %v2962_v58  ;;  %v1267_v58 = vld [vmem:[#allocation8] sm:$0x3] }
 0xd0b   :  { %v1226_v16 = vsel %vm276_vm4, %v2963_v5, %v2964_v4 }
 0xd0d   :  { %v2957_v53 = vpop.permute.xlu1 %2956 }
 0xd0e   :  { %v3097_v41 = vpop.eup %3096  ;;  %v2959_v2 = vunpack.i.h.bf16 %v2957_v53  ;;  %v2958_v3 = vunpack.i.l.bf16 %v2957_v53 }
 0xd0f   :  { %v1170_v57 = vmul.f32 %v3097_v41, %v1158_v36  ;;  %v2753_v36 = vld [vmem:[#allocation7 + $0x8] sm:$0xf0]  ;;  %v3952_v41 = vor.u32 %v2918_v48, %v2809_v40 }
 0xd10   :  { %v2756_v37 = vor.u32 %v2903_v33, %v2753_v36  ;;  %v1218_v13 = vsel %vm276_vm4, %v2958_v3, %v2959_v2 }
 0xd11   :  { %v2985_v1 = vpack.i.bf16 %v1238_v43, %v1170_v57  ;;  %v1176_v63 = vrot.slane %v1170_v57, 6  ;;  %v2915_v57 = vld [vmem:[#allocation10 + $0x24] sm:$0xf]  ;;  %v2803_v43 = vld [vmem:[#allocation10 + $0x28] sm:$0xf0]  ;;  %1473 = vmatpush.bf16.msra.mxu2 %v3952_v41  ;;  %1565 = vmatpush.bf16.msra.mxu0 %v3952_v41  ;;  %v1248_v25 = vsel %vm199_vm0, %v1218_v13, %v1226_v16 }
 0xd12   :  { %1414 = vmatpush.bf16.msra.mxu1 %v2756_v37 }
 0xd13   :  { %2986 = vrot.lane.b32.xlu0 %v2985_v1, %s3447_s23  ;;  %v2975_v45 = vpack.i.bf16 %v1176_v63, %v3803_v22  ;;  %v2899_v22 = vld [vmem:[#allocation5 + $0x24] sm:$0xf]  ;;  %v3955_v63 = vor.u32 %v2915_v57, %v2803_v43  ;;  %v1278_v57 = vperm.slane %v1267_v58, 0  ;;  %v1279_v43 = vperm.slane %v1267_v58, 1 }
 0xd14   :  { %v2738_v8 = vor.u32 %v2899_v22, %v2735_v39  ;;  %v2801_v1 = vld [vmem:[#allocation10 + $0x20] sm:$0xf]  ;;  %v3975_v39 = vor.u32 %v2912_v55, %v2785_v54 }
 0xd15   :  { %2976 = vrot.lane.b32.xlu2 %v2975_v45, %s3447_s23  ;;  %v2916_v45 = vld [vmem:[#allocation10 + $0x24] sm:$0xf0]  ;;  %v2972_v60 = vpop.permute.xlu1 %2971 }
 0xd16   :  { %1344 = vmatpush.bf16.msrb.mxu3 %v2738_v8  ;;  %1578 = vmatpush.bf16.msrb.mxu1 %v3950_v49  ;;  %v3959_v23 = vor.u32 %v2916_v45, %v2801_v1  ;;  %v2974_v6 = vunpack.i.h.bf16 %v2972_v60  ;;  %v2973_v7 = vunpack.i.l.bf16 %v2972_v60 }
 0xd18   :  { %1474 = vmatpush.bf16.msra.mxu2 %v3959_v23  ;;  %1566 = vmatpush.bf16.msra.mxu0 %v3959_v23  ;;  %v1234_v29 = vsel %vm276_vm4, %v2973_v7, %v2974_v6 }
 0xd19   :  { %v1249_v26 = vsel %vm1244_vm9, %v1248_v25, %v1234_v29 }
 0xd1a   :  { %1345 = vmatpush.bf16.msrb.mxu3 %v2730_v28  ;;  %1579 = vmatpush.bf16.msrb.mxu1 %v3955_v63 }
 0xd1c   :  { %1475 = vmatpush.bf16.msra.mxu2 %v3967_v35  ;;  %1567 = vmatpush.bf16.msra.mxu0 %v3967_v35 }
 0xd1d   :  { %2981 = vrot.lane.b32.xlu2 %v2980_v44, %s3447_s23  ;;  %v2913_v44 = vld [vmem:[#allocation10 + $0x14] sm:$0xf] }
 0xd1e   :  { %1346 = vmatpush.bf16.msrb.mxu3 %v2722_v19  ;;  %v3963_v32 = vor.u32 %v2913_v44, %v2795_v46 }
 0xd20   :  { %1580 = vmatpush.bf16.msrb.mxu1 %v3963_v32  ;;  %1476 = vmatpush.bf16.msra.mxu2 %v3975_v39 }
 0xd21   :  { %1568 = vmatpush.bf16.msra.mxu0 %v3975_v39 }
 0xd22   :  { %1486 = vmatpush.bf16.msra.mxu3 %v3950_v49 }
 0xd24   :  { %1581 = vmatpush.bf16.msrb.mxu1 %v3971_v30 }
 0xd26   :  { %1487 = vmatpush.bf16.msra.mxu3 %v3955_v63 }
 0xd2a   :  { %1488 = vmatpush.bf16.msra.mxu3 %v3963_v32 }
 0xd2e   :  { %1489 = vmatpush.bf16.msra.mxu3 %v3971_v30 }
 0xd6f   :  { %v2977_v22 = vpop.permute.xlu2 %2976 }
 0xd70   :  { %v2979_v8 = vunpack.i.h.bf16 %v2977_v22  ;;  %v2978_v20 = vunpack.i.l.bf16 %v2977_v22 }
 0xd72   :  { %v1180_v11 = vsel %vm276_vm4, %v2978_v20, %v2979_v8 }
 0xd73   :  { %v1243_v14 = vsel %vm199_vm0, %v1180_v11, %v1190_v12 }
 0xd74   :  { %v1245_v31 = vsel %vm1244_vm9, %v1243_v14, %v1200_v24 }
 0xd77   :  { %v2982_v50 = vpop.permute.xlu2 %2981 }
 0xd78   :  { %v2984_v15 = vunpack.i.h.bf16 %v2982_v50  ;;  %v2983_v28 = vunpack.i.l.bf16 %v2982_v50 }
 0xd7a   :  { %v1210_v18 = vsel %vm276_vm4, %v2983_v28, %v2984_v15 }
 0xd7b   :  { %v1247_v36 = vsel %vm1246_vm11, %v1245_v31, %v1210_v18 }
 0xd85   :  { %v2987_v17 = vpop.permute.xlu0 %2986 }
 0xd86   :  { %v2989_v19 = vunpack.i.h.bf16 %v2987_v17  ;;  %v2988_v21 = vunpack.i.l.bf16 %v2987_v17 }
 0xd88   :  { %v1242_v33 = vsel %vm276_vm4, %v2988_v21, %v2989_v19 }
 0xd89   :  { %v1250_v37 = vsel %vm1246_vm11, %v1249_v26, %v1242_v33 }
 0xd8a   :  { %v1276_v42 = vpack.c.bf16 %v1250_v37, %v1247_v36 }
 0xd8c   :  { %2747 = vmatmul.msk.bf16.vlgmr.msrb.gmra.mxu2 %vm404_vm14, %v1276_v42  ;;  %2748 = vmatmul.msk.bf16.vlgmr.msrb.gmra.mxu3 %vm404_vm14, %v1276_v42 }
 0xd8d   :  { %2781 = vmatmul.msk.bf16.vlgmr.msrb.gmra.mxu0 %vm404_vm14, %v1276_v42  ;;  %2782 = vmatmul.msk.bf16.vlgmr.msra.gmra.mxu1 %vm404_vm14, %v1276_v42 }
 0xd8e   :  { %1674 = vmatpush.bf16.msrb.mxu3 %v3950_v49  ;;  %1661 = vmatpush.bf16.msrb.mxu2 %v3952_v41 }
 0xd8f   :  { %1770 = vmatpush.bf16.msra.mxu1 %v3950_v49  ;;  %1757 = vmatpush.bf16.msrb.mxu0 %v3952_v41 }
 0xd92   :  { %1675 = vmatpush.bf16.msrb.mxu3 %v3955_v63  ;;  %1662 = vmatpush.bf16.msrb.mxu2 %v3959_v23 }
 0xd93   :  { %1771 = vmatpush.bf16.msra.mxu1 %v3955_v63  ;;  %1758 = vmatpush.bf16.msrb.mxu0 %v3959_v23 }
 0xd96   :  { %1676 = vmatpush.bf16.msrb.mxu3 %v3963_v32  ;;  %1663 = vmatpush.bf16.msrb.mxu2 %v3967_v35 }
 0xd97   :  { %1772 = vmatpush.bf16.msra.mxu1 %v3963_v32  ;;  %1759 = vmatpush.bf16.msrb.mxu0 %v3967_v35 }
 0xd9a   :  { %1677 = vmatpush.bf16.msrb.mxu3 %v3971_v30  ;;  %1664 = vmatpush.bf16.msrb.mxu2 %v3975_v39 }
 0xd9b   :  { %1773 = vmatpush.bf16.msra.mxu1 %v3971_v30  ;;  %1760 = vmatpush.bf16.msrb.mxu0 %v3975_v39 }
 0xd9c   :  { %1477 = vmatmul.bf16.vlgmr.msra.gmra.mxu2 %v3454_v0  ;;  %1490 = vmatmul.bf16.vlgmr.msra.gmra.mxu3 %v3454_v0 }
 0xd9e   :  { %1874 = vmatpush.bf16.msra.mxu3 %v3950_v49  ;;  %1861 = vmatpush.bf16.msra.mxu2 %v3952_v41 }
 0xda2   :  { %1875 = vmatpush.bf16.msra.mxu3 %v3955_v63  ;;  %1862 = vmatpush.bf16.msra.mxu2 %v3959_v23 }
 0xda6   :  { %1876 = vmatpush.bf16.msra.mxu3 %v3963_v32  ;;  %1863 = vmatpush.bf16.msra.mxu2 %v3967_v35 }
 0xdaa   :  { %1877 = vmatpush.bf16.msra.mxu3 %v3971_v30  ;;  %1864 = vmatpush.bf16.msra.mxu2 %v3975_v39 }
 0xe0a   :  { %v1402_v38 = vpop.f32.mrf.mxu0  ;;  %v1416_v40 = vpop.f32.mrf.mxu1 }
 0xe0b   :  { %v1843_v44 = vrot.slane %v1402_v38, 6  ;;  %v1939_v46 = vrot.slane %v1402_v38, 2  ;;  %v1844_v34 = vrot.slane %v1416_v40, 6  ;;  %v1940_v51 = vrot.slane %v1416_v40, 2 }
 0xe0f   :  { %v1334_v48 = vpop.f32.mrf.mxu2  ;;  %v1348_v0 = vpop.f32.mrf.mxu3 }
 0xe10   :  { %v4036_v20 = vadd.f32 %v1334_v48, %v1278_v57  ;;  %v4038_v50 = vadd.f32 %v1348_v0, %v1279_v43 }
 0xe12   :  { %v4022_v1 = vpop.f32.mrf.mxu0  ;;  %v4024_v45 = vpop.f32.mrf.mxu1 }
 0xe13   :  { %v1423_v54 = vrot.slane %v4022_v1, 6  ;;  %v1424_v55 = vrot.slane %v4024_v45, 6 }
 0xe15   :  { %v4041_v61 = vadd.f32 %v1423_v54, %v4036_v20  ;;  %v4044_v62 = vadd.f32 %v1424_v55, %v4038_v50  ;;  %v1549_v54 = vrot.slane %v4024_v45, 2 }
 0xe17   :  { %v1336_v47 = vpop.f32.mrf.mxu2  ;;  %v1350_v27 = vpop.f32.mrf.mxu3 }
 0xe18   :  { %v1337_v52 = vadd.f32 %v1336_v47, %v1278_v57  ;;  %v1351_v53 = vadd.f32 %v1350_v27, %v1279_v43 }
 0xe1a   :  { %v4028_v22 = vadd.f32 %v1939_v46, %v1337_v52  ;;  %v4030_v56 = vadd.f32 %v1940_v51, %v1351_v53  ;;  %v4032_v60 = vadd.f32 %v1843_v44, %v1337_v52  ;;  %v4034_v8 = vadd.f32 %v1844_v34, %v1351_v53 }
 0xe1b   :  { %v1548_v53 = vrot.slane %v4022_v1, 2 }
 0xe1f   :  { %v1478_v2 = vpop.f32.mrf.mxu2  ;;  %v1491_v3 = vpop.f32.mrf.mxu3 }
 0xe20   :  { %v1495_v4 = vadd.f32 %v1478_v2, %v4041_v61  ;;  %v1496_v5 = vadd.f32 %v1491_v3, %v4044_v62  ;;  %v4072_v3 = vadd.f32 %v1548_v53, %v4036_v20 }
 0xe22   :  { %v2815_v6 = vmul.f32 -1.442695, %v1495_v4  ;;  %v2816_v7 = vmul.f32 -1.442695, %v1496_v5  ;;  %v4075_v4 = vadd.f32 %v1549_v54, %v4038_v50 }
 0xe24   :  { %3098 = vpow2.f32 %v2815_v6 }
 0xe25   :  { %3100 = vpow2.f32 %v2816_v7 }
 0xe27   :  { %v1480_v11 = vpop.f32.mrf.mxu2  ;;  %v1493_v15 = vpop.f32.mrf.mxu3 }
 0xe2a   :  { %v3099_v28 = vpop.eup %3098 }
 0xe2b   :  { %v3101_v9 = vpop.eup %3100  ;;  %v1505_v10 = vadd.f32 1.0, %v3099_v28 }
 0xe2c   :  { %v1506_v12 = vadd.f32 1.0, %v3101_v9 }
 0xe2d   :  { %3102 = vrcp.f32 %v1505_v10  ;;  %v1518_v18 = vand.u32 2147483648, %v1505_v10  ;;  %v1516_v24 = vand.u32 2147483647, %v1505_v10  ;;  %vm1512_vm13 = vweird.f32 %v1505_v10 }
 0xe2e   :  { %3104 = vrcp.f32 %v1506_v12  ;;  %v1533_v25 = vand.u32 2147483648, %v1506_v12  ;;  %v1531_v31 = vand.u32 2147483647, %v1506_v12  ;;  %vm1527_vm1 = vweird.f32 %v1506_v12 }
 0xe2f   :  { %3106 = vtanh.f32 %v1496_v5  ;;  %v1519_v36 = vor.u32 1.1754944e-38, %v1518_v18  ;;  %vm1517_vm2 = vcmp.eq.f32.partialorder %v1516_v24, 8.507059e+37 }
 0xe30   :  { %v1534_v38 = vor.u32 1.1754944e-38, %v1533_v25  ;;  %vm1532_vm5 = vcmp.eq.f32.partialorder %v1531_v31, 8.507059e+37 }
 0xe33   :  { %v3103_v13 = vpop.eup %3102 }
 0xe34   :  { %v3105_v16 = vpop.eup %3104  ;;  %v1508_v29 = vmul.f32 %v3103_v13, %v1505_v10  ;;  %vm1513_vm0 = vweird.f32 %v3103_v13 }
 0xe35   :  { %v1523_v14 = vmul.f32 %v3105_v16, %v1506_v12  ;;  %vm1528_vm12 = vweird.f32 %v3105_v16  ;;  %vm1514_vm15 = vmor %vm1512_vm13, %vm1513_vm0  ;;  %v3107_v40 = vpop.eup %3106 }
 0xe36   :  { %v1509_v17 = vsub.f32 1.0, %v1508_v29  ;;  %vm1529_vm3 = vmor %vm1527_vm1, %vm1528_vm12 }
 0xe37   :  { %v1524_v19 = vsub.f32 1.0, %v1523_v14 }
 0xe38   :  { %v1510_v21 = vmul.f32 %v3103_v13, %v1509_v17 }
 0xe39   :  { %v1525_v26 = vmul.f32 %v3105_v16, %v1524_v19 }
 0xe3a   :  { %v1511_v33 = vadd.f32 %v3103_v13, %v1510_v21 }
 0xe3b   :  { %v1526_v37 = vadd.f32 %v3105_v16, %v1525_v26 }
 0xe3c   :  { %v1515_v42 = vsel %vm1514_vm15, %v3103_v13, %v1511_v33 }
 0xe3d   :  { %v1520_v48 = vsel %vm1517_vm2, %v1519_v36, %v1515_v42  ;;  %v1530_v0 = vsel %vm1529_vm3, %v3105_v16, %v1526_v37 }
 0xe3e   :  { %v1535_v58 = vsel %vm1532_vm5, %v1534_v38, %v1530_v0  ;;  %v1539_v44 = vmul.f32 0.0, %v1520_v48 }
 0xe3f   :  { %v1538_v57 = vsel %vm230_vm10, %v3107_v40, %v1535_v58 }
 0xe40   :  { %v1540_v43 = vmul.f32 %v1538_v57, %v1520_v48 }
 0xe42   :  { %1542 = vrot.lane.b32.xlu1 %v1540_v43, %s3447_s23 }
 0xeb4   :  { %v1543_v46 = vpop.permute.xlu1 %1542 }
 0xeb5   :  { %v4051_v47 = vadd.f32 %v1543_v46, %v1539_v44 }
 0xeb7   :  { %3108 = vtanh.f32 %v4051_v47  ;;  %v1638_v37 = vrot.slane %v4051_v47, 6 }
 0xebd   :  { %v3109_v27 = vpop.eup %3108 }
 0xebe   :  { %v4054_v34 = vmul.f32 %v3109_v27, %v1538_v57 }
 0xec0   :  { %v1554_v51 = vpack.c.bf16 %v4054_v34, %v4054_v34 }
 0xec2   :  { %1556 = vrot.lane.b32.xlu2 %v1554_v51, %s3447_s23 }
 0xf1c   :  { %v1557_v52 = vpop.permute.xlu2 %1556 }
 0xf1d   :  { %2817 = vmatmul.msk.bf16.vlgmr.msra.gmra.mxu0 %vm404_vm14, %v1557_v52  ;;  %2818 = vmatmul.msk.bf16.vlgmr.msrb.gmra.mxu1 %vm404_vm14, %v1557_v52 }
 0xf1e   :  { %1969 = vmatpush.bf16.msrb.mxu1 %v3950_v49  ;;  %1956 = vmatpush.bf16.msra.mxu0 %v3952_v41 }
 0xf22   :  { %1970 = vmatpush.bf16.msrb.mxu1 %v3955_v63  ;;  %1957 = vmatpush.bf16.msra.mxu0 %v3959_v23 }
 0xf26   :  { %1971 = vmatpush.bf16.msrb.mxu1 %v3963_v32  ;;  %1958 = vmatpush.bf16.msra.mxu0 %v3967_v35 }
 0xf2a   :  { %1972 = vmatpush.bf16.msrb.mxu1 %v3971_v30  ;;  %1959 = vmatpush.bf16.msra.mxu0 %v3975_v39 }
 0xf9a   :  { %v1570_v55 = vpop.f32.mrf.mxu0  ;;  %v1583_v2 = vpop.f32.mrf.mxu1 }
 0xf9b   :  { %v1589_v5 = vrot.slane %v1570_v55, 6  ;;  %v1590_v6 = vrot.slane %v1583_v2, 6 }
 0xf9d   :  { %v1593_v7 = vadd.f32 %v1589_v5, %v4072_v3  ;;  %v1594_v11 = vadd.f32 %v1590_v6, %v4075_v4 }
 0xf9f   :  { %v2819_v15 = vmul.f32 -1.442695, %v1593_v7  ;;  %v2820_v28 = vmul.f32 -1.442695, %v1594_v11 }
 0xfa1   :  { %3110 = vpow2.f32 %v2819_v15 }
 0xfa2   :  { %3112 = vpow2.f32 %v2820_v28  ;;  %v1572_v1 = vpop.f32.mrf.mxu0  ;;  %v1585_v45 = vpop.f32.mrf.mxu1 }
 0xfa7   :  { %v3111_v9 = vpop.eup %3110 }
 0xfa8   :  { %v3113_v10 = vpop.eup %3112  ;;  %v1603_v12 = vadd.f32 1.0, %v3111_v9 }
 0xfa9   :  { %v1604_v20 = vadd.f32 1.0, %v3113_v10 }
 0xfaa   :  { %3114 = vrcp.f32 %v1603_v12  ;;  %v1616_v17 = vand.u32 2147483648, %v1603_v12  ;;  %v1614_v21 = vand.u32 2147483647, %v1603_v12  ;;  %vm1610_vm8 = vweird.f32 %v1603_v12 }
 0xfab   :  { %3116 = vrcp.f32 %v1604_v20  ;;  %v1631_v24 = vand.u32 2147483648, %v1604_v20  ;;  %v1629_v26 = vand.u32 2147483647, %v1604_v20  ;;  %vm1625_vm11 = vweird.f32 %v1604_v20 }
 0xfac   :  { %3118 = vtanh.f32 %v1594_v11  ;;  %v1617_v33 = vor.u32 1.1754944e-38, %v1616_v17  ;;  %vm1615_vm0 = vcmp.eq.f32.partialorder %v1614_v21, 8.507059e+37 }
 0xfad   :  { %v1632_v38 = vor.u32 1.1754944e-38, %v1631_v24  ;;  %vm1630_vm13 = vcmp.eq.f32.partialorder %v1629_v26, 8.507059e+37 }
 0xfb0   :  { %v3115_v50 = vpop.eup %3114 }
 0xfb1   :  { %v3117_v13 = vpop.eup %3116  ;;  %v1606_v16 = vmul.f32 %v3115_v50, %v1603_v12  ;;  %vm1611_vm6 = vweird.f32 %v3115_v50 }
 0xfb2   :  { %v1621_v29 = vmul.f32 %v3117_v13, %v1604_v20  ;;  %vm1626_vm7 = vweird.f32 %v3117_v13  ;;  %vm1612_vm9 = vmor %vm1610_vm8, %vm1611_vm6  ;;  %v3119_v40 = vpop.eup %3118 }
 0xfb3   :  { %v1607_v14 = vsub.f32 1.0, %v1606_v16  ;;  %vm1627_vm12 = vmor %vm1625_vm11, %vm1626_vm7 }
 0xfb4   :  { %v1622_v18 = vsub.f32 1.0, %v1621_v29 }
 0xfb5   :  { %v1608_v19 = vmul.f32 %v3115_v50, %v1607_v14 }
 0xfb6   :  { %v1623_v25 = vmul.f32 %v3117_v13, %v1622_v18 }
 0xfb7   :  { %v1609_v31 = vadd.f32 %v3115_v50, %v1608_v19 }
 0xfb8   :  { %v1624_v36 = vadd.f32 %v3117_v13, %v1623_v25 }
 0xfb9   :  { %v1613_v42 = vsel %vm1612_vm9, %v3115_v50, %v1609_v31 }
 0xfba   :  { %v1618_v48 = vsel %vm1615_vm0, %v1617_v33, %v1613_v42  ;;  %v1628_v0 = vsel %vm1627_vm12, %v3117_v13, %v1624_v36 }
 0xfbb   :  { %v1633_v58 = vsel %vm1630_vm13, %v1632_v38, %v1628_v0  ;;  %v1640_v57 = vmul.f32 %v1638_v37, %v1618_v48 }
 0xfbc   :  { %v1636_v43 = vsel %vm230_vm10, %v3119_v40, %v1633_v58 }
 0xfbd   :  { %v1641_v44 = vmul.f32 %v1636_v43, %v1618_v48 }
 0xfbf   :  { %1643 = vrot.lane.b32.xlu0 %v1641_v44, %s3447_s23 }
0x1031   :  { %v1644_v46 = vpop.permute.xlu0 %1643 }
0x1032   :  { %v4083_v27 = vadd.f32 %v1644_v46, %v1640_v57 }
0x1034   :  { %3120 = vtanh.f32 %v4083_v27  ;;  %v1734_v33 = vrot.slane %v4083_v27, 6 }
0x103a   :  { %v3121_v47 = vpop.eup %3120 }
0x103b   :  { %v4086_v51 = vmul.f32 %v3121_v47, %v1636_v43 }
0x103d   :  { %v1649_v52 = vpack.c.bf16 %v4086_v51, %v4086_v51 }
0x103f   :  { %v1651_v53 = vrot.slane %v1649_v52, 1 }
0x1041   :  { %1652 = vrot.lane.b32.xlu1 %v1651_v53, %s3447_s23 }
0x10b3   :  { %v1653_v54 = vpop.permute.xlu1 %1652 }
0x10b4   :  { %2821 = vmatmul.msk.bf16.vlgmr.msrb.gmra.mxu2 %vm404_vm14, %v1653_v54  ;;  %2822 = vmatmul.msk.bf16.vlgmr.msrb.gmra.mxu3 %vm404_vm14, %v1653_v54 }
0x10b5   :  { %2065 = vmatpush.bf16.msrb.mxu3 %v3950_v49  ;;  %2052 = vmatpush.bf16.msrb.mxu2 %v3952_v41 }
0x10b9   :  { %2066 = vmatpush.bf16.msrb.mxu3 %v3955_v63  ;;  %2053 = vmatpush.bf16.msrb.mxu2 %v3959_v23 }
0x10bd   :  { %2067 = vmatpush.bf16.msrb.mxu3 %v3963_v32  ;;  %2054 = vmatpush.bf16.msrb.mxu2 %v3967_v35 }
0x10c1   :  { %2068 = vmatpush.bf16.msrb.mxu3 %v3971_v30  ;;  %2055 = vmatpush.bf16.msrb.mxu2 %v3975_v39 }
0x1137   :  { %v1666_v55 = vpop.f32.mrf.mxu2  ;;  %v1679_v2 = vpop.f32.mrf.mxu3 }
0x1138   :  { %v1685_v5 = vrot.slane %v1666_v55, 4  ;;  %v1686_v6 = vrot.slane %v1679_v2, 4 }
0x113a   :  { %v1689_v7 = vadd.f32 %v1685_v5, %v4041_v61  ;;  %v1690_v11 = vadd.f32 %v1686_v6, %v4044_v62 }
0x113c   :  { %v2823_v15 = vmul.f32 -1.442695, %v1689_v7  ;;  %v2824_v28 = vmul.f32 -1.442695, %v1690_v11 }
0x113e   :  { %3122 = vpow2.f32 %v2823_v15 }
0x113f   :  { %3124 = vpow2.f32 %v2824_v28  ;;  %v1668_v1 = vpop.f32.mrf.mxu2  ;;  %v1681_v45 = vpop.f32.mrf.mxu3 }
0x1144   :  { %v3123_v9 = vpop.eup %3122 }
0x1145   :  { %v3125_v10 = vpop.eup %3124  ;;  %v1699_v12 = vadd.f32 1.0, %v3123_v9 }
0x1146   :  { %v1700_v20 = vadd.f32 1.0, %v3125_v10 }
0x1147   :  { %3126 = vrcp.f32 %v1699_v12  ;;  %v1712_v61 = vand.u32 2147483648, %v1699_v12  ;;  %v1710_v18 = vand.u32 2147483647, %v1699_v12  ;;  %vm1706_vm2 = vweird.f32 %v1699_v12 }
0x1148   :  { %3128 = vrcp.f32 %v1700_v20  ;;  %v1727_v19 = vand.u32 2147483648, %v1700_v20  ;;  %v1725_v24 = vand.u32 2147483647, %v1700_v20  ;;  %vm1721_vm5 = vweird.f32 %v1700_v20 }
0x1149   :  { %3130 = vtanh.f32 %v1690_v11  ;;  %v1713_v26 = vor.u32 1.1754944e-38, %v1712_v61  ;;  %vm1711_vm6 = vcmp.eq.f32.partialorder %v1710_v18, 8.507059e+37 }
0x114a   :  { %v1728_v37 = vor.u32 1.1754944e-38, %v1727_v19  ;;  %vm1726_vm8 = vcmp.eq.f32.partialorder %v1725_v24, 8.507059e+37 }
0x114d   :  { %v3127_v50 = vpop.eup %3126 }
0x114e   :  { %v3129_v13 = vpop.eup %3128  ;;  %v1702_v16 = vmul.f32 %v3127_v50, %v1699_v12  ;;  %vm1707_vm15 = vweird.f32 %v3127_v50 }
0x114f   :  { %v1717_v29 = vmul.f32 %v3129_v13, %v1700_v20  ;;  %vm1722_vm1 = vweird.f32 %v3129_v13  ;;  %vm1708_vm3 = vmor %vm1706_vm2, %vm1707_vm15  ;;  %v3131_v42 = vpop.eup %3130 }
0x1150   :  { %v1703_v14 = vsub.f32 1.0, %v1702_v16  ;;  %vm1723_vm7 = vmor %vm1721_vm5, %vm1722_vm1 }
0x1151   :  { %v1718_v62 = vsub.f32 1.0, %v1717_v29 }
0x1152   :  { %v1704_v17 = vmul.f32 %v3127_v50, %v1703_v14 }
0x1153   :  { %v1719_v21 = vmul.f32 %v3129_v13, %v1718_v62 }
0x1154   :  { %v1705_v25 = vadd.f32 %v3127_v50, %v1704_v17 }
0x1155   :  { %v1720_v31 = vadd.f32 %v3129_v13, %v1719_v21 }
0x1156   :  { %v1709_v36 = vsel %vm1708_vm3, %v3127_v50, %v1705_v25 }
0x1157   :  { %v1714_v38 = vsel %vm1711_vm6, %v1713_v26, %v1709_v36  ;;  %v1724_v40 = vsel %vm1723_vm7, %v3129_v13, %v1720_v31 }
0x1158   :  { %v1729_v48 = vsel %vm1726_vm8, %v1728_v37, %v1724_v40  ;;  %v1736_v0 = vmul.f32 %v1734_v33, %v1714_v38 }
0x1159   :  { %v1732_v58 = vsel %vm230_vm10, %v3131_v42, %v1729_v48 }
0x115a   :  { %v1737_v57 = vmul.f32 %v1732_v58, %v1714_v38 }
0x115c   :  { %1739 = vrot.lane.b32.xlu2 %v1737_v57, %s3447_s23 }
0x11b6   :  { %v1740_v43 = vpop.permute.xlu2 %1739 }
0x11b7   :  { %v4107_v44 = vadd.f32 %v1740_v43, %v1736_v0 }
0x11b9   :  { %3132 = vtanh.f32 %v4107_v44  ;;  %v1830_v14 = vrot.slane %v4107_v44, 6 }
0x11bf   :  { %v3133_v46 = vpop.eup %3132 }
0x11c0   :  { %v4110_v27 = vmul.f32 %v3133_v46, %v1732_v58 }
0x11c2   :  { %v1745_v47 = vpack.c.bf16 %v4110_v27, %v4110_v27 }
0x11c4   :  { %v1747_v52 = vrot.slane %v1745_v47, 2 }
0x11c6   :  { %1748 = vrot.lane.b32.xlu0 %v1747_v52, %s3447_s23 }
0x1238   :  { %v1749_v53 = vpop.permute.xlu0 %1748 }
0x1239   :  { %2825 = vmatmul.msk.bf16.vlgmr.msrb.gmra.mxu0 %vm404_vm14, %v1749_v53  ;;  %2826 = vmatmul.msk.bf16.vlgmr.msra.gmra.mxu1 %vm404_vm14, %v1749_v53 }
0x123a   :  { %2161 = vmatpush.bf16.msra.mxu1 %v3950_v49  ;;  %2148 = vmatpush.bf16.msrb.mxu0 %v3952_v41 }
0x123e   :  { %2162 = vmatpush.bf16.msra.mxu1 %v3955_v63  ;;  %2149 = vmatpush.bf16.msrb.mxu0 %v3959_v23 }
0x1242   :  { %2163 = vmatpush.bf16.msra.mxu1 %v3963_v32  ;;  %2150 = vmatpush.bf16.msrb.mxu0 %v3967_v35 }
0x1246   :  { %2164 = vmatpush.bf16.msra.mxu1 %v3971_v30  ;;  %2151 = vmatpush.bf16.msrb.mxu0 %v3975_v39 }
0x12b6   :  { %v1762_v54 = vpop.f32.mrf.mxu0  ;;  %v1775_v55 = vpop.f32.mrf.mxu1 }
0x12b7   :  { %v1781_v2 = vrot.slane %v1762_v54, 2  ;;  %v1782_v5 = vrot.slane %v1775_v55, 2 }
0x12b9   :  { %v1785_v49 = vadd.f32 %v1781_v2, %v4072_v3  ;;  %v1786_v41 = vadd.f32 %v1782_v5, %v4075_v4 }
0x12bb   :  { %v2827_v6 = vmul.f32 -1.442695, %v1785_v49  ;;  %v2828_v63 = vmul.f32 -1.442695, %v1786_v41 }
0x12bd   :  { %3134 = vpow2.f32 %v2827_v6 }
0x12be   :  { %3136 = vpow2.f32 %v2828_v63  ;;  %v1764_v23 = vpop.f32.mrf.mxu0  ;;  %v1777_v32 = vpop.f32.mrf.mxu1 }
0x12c3   :  { %v3135_v7 = vpop.eup %3134 }
0x12c4   :  { %v3137_v35 = vpop.eup %3136  ;;  %v1795_v11 = vadd.f32 1.0, %v3135_v7 }
0x12c5   :  { %v1796_v30 = vadd.f32 1.0, %v3137_v35 }
0x12c6   :  { %3138 = vrcp.f32 %v1795_v11  ;;  %v1808_v3 = vand.u32 2147483648, %v1795_v11  ;;  %v1806_v10 = vand.u32 2147483647, %v1795_v11  ;;  %vm1802_vm0 = vweird.f32 %v1795_v11 }
0x12c7   :  { %3140 = vrcp.f32 %v1796_v30  ;;  %v1823_v12 = vand.u32 2147483648, %v1796_v30  ;;  %v1821_v50 = vand.u32 2147483647, %v1796_v30  ;;  %vm1817_vm13 = vweird.f32 %v1796_v30 }
0x12c8   :  { %3142 = vtanh.f32 %v1786_v41  ;;  %v1809_v16 = vor.u32 1.1754944e-38, %v1808_v3  ;;  %vm1807_vm15 = vcmp.eq.f32.partialorder %v1806_v10, 8.507059e+37 }
0x12c9   :  { %v1824_v62 = vor.u32 1.1754944e-38, %v1823_v12  ;;  %vm1822_vm2 = vcmp.eq.f32.partialorder %v1821_v50, 8.507059e+37 }
0x12cc   :  { %v3139_v39 = vpop.eup %3138 }
0x12cd   :  { %v3141_v15 = vpop.eup %3140  ;;  %v1798_v28 = vmul.f32 %v3139_v39, %v1795_v11  ;;  %vm1803_vm9 = vweird.f32 %v3139_v39 }
0x12ce   :  { %v1813_v1 = vmul.f32 %v3141_v15, %v1796_v30  ;;  %vm1818_vm11 = vweird.f32 %v3141_v15  ;;  %vm1804_vm12 = vmor %vm1802_vm0, %vm1803_vm9  ;;  %v3143_v17 = vpop.eup %3142 }
0x12cf   :  { %v1799_v45 = vsub.f32 1.0, %v1798_v28  ;;  %vm1819_vm1 = vmor %vm1817_vm13, %vm1818_vm11 }
0x12d0   :  { %v1814_v4 = vsub.f32 1.0, %v1813_v1 }
0x12d1   :  { %v1800_v9 = vmul.f32 %v3139_v39, %v1799_v45 }
0x12d2   :  { %v1815_v20 = vmul.f32 %v3141_v15, %v1814_v4 }
0x12d3   :  { %v1801_v13 = vadd.f32 %v3139_v39, %v1800_v9 }
0x12d4   :  { %v1816_v29 = vadd.f32 %v3141_v15, %v1815_v20 }
0x12d5   :  { %v1805_v61 = vsel %vm1804_vm12, %v3139_v39, %v1801_v13 }
0x12d6   :  { %v1810_v18 = vsel %vm1807_vm15, %v1809_v16, %v1805_v61  ;;  %v1820_v19 = vsel %vm1819_vm1, %v3141_v15, %v1816_v29 }
0x12d7   :  { %v1825_v21 = vsel %vm1822_vm2, %v1824_v62, %v1820_v19  ;;  %v1832_v24 = vmul.f32 %v1830_v14, %v1810_v18 }
0x12d8   :  { %v1828_v25 = vsel %vm230_vm10, %v3143_v17, %v1825_v21 }
0x12d9   :  { %v1833_v26 = vmul.f32 %v1828_v25, %v1810_v18 }
0x12db   :  { %1835 = vrot.lane.b32.xlu1 %v1833_v26, %s3447_s23 }
0x134d   :  { %v1836_v31 = vpop.permute.xlu1 %1835 }
0x134e   :  { %v1838_v33 = vadd.f32 %v1836_v31, %v1832_v24 }
0x1350   :  { %3144 = vtanh.f32 %v1838_v33  ;;  %v1928_v1 = vrot.slane %v1838_v33, 6 }
0x1356   :  { %v3145_v36 = vpop.eup %3144 }
0x1357   :  { %v4131_v37 = vmul.f32 %v3145_v36, %v1828_v25 }
0x1359   :  { %v1849_v42 = vpack.c.bf16 %v4131_v37, %v4131_v37 }
0x135b   :  { %v1851_v38 = vrot.slane %v1849_v42, 3 }
0x135d   :  { %1852 = vrot.lane.b32.xlu2 %v1851_v38, %s3447_s23 }
0x13b7   :  { %v1853_v40 = vpop.permute.xlu2 %1852 }
0x13b8   :  { %2829 = vmatmul.msk.bf16.vlgmr.msra.gmra.mxu2 %vm404_vm14, %v1853_v40  ;;  %2830 = vmatmul.msk.bf16.vlgmr.msra.gmra.mxu3 %vm404_vm14, %v1853_v40 }
0x143b   :  { %v1866_v48 = vpop.f32.mrf.mxu2  ;;  %v1879_v0 = vpop.f32.mrf.mxu3 }
0x143c   :  { %v1883_v58 = vadd.f32 %v1866_v48, %v4032_v60  ;;  %v1884_v57 = vadd.f32 %v1879_v0, %v4034_v8 }
0x143e   :  { %v2831_v43 = vmul.f32 -1.442695, %v1883_v58  ;;  %v2832_v44 = vmul.f32 -1.442695, %v1884_v57 }
0x1440   :  { %3146 = vpow2.f32 %v2831_v43 }
0x1441   :  { %3148 = vpow2.f32 %v2832_v44 }
0x1443   :  { %v1868_v46 = vpop.f32.mrf.mxu2  ;;  %v1881_v47 = vpop.f32.mrf.mxu3 }
0x1446   :  { %v3147_v52 = vpop.eup %3146 }
0x1447   :  { %v3149_v53 = vpop.eup %3148  ;;  %v1893_v54 = vadd.f32 1.0, %v3147_v52 }
0x1448   :  { %v1894_v55 = vadd.f32 1.0, %v3149_v53 }
0x1449   :  { %3150 = vrcp.f32 %v1893_v54  ;;  %v1906_v63 = vand.u32 2147483648, %v1893_v54  ;;  %v1904_v7 = vand.u32 2147483647, %v1893_v54  ;;  %vm1900_vm6 = vweird.f32 %v1893_v54 }
0x144a   :  { %3152 = vrcp.f32 %v1894_v55  ;;  %v1921_v35 = vand.u32 2147483648, %v1894_v55  ;;  %v1919_v30 = vand.u32 2147483647, %v1894_v55  ;;  %vm1915_vm8 = vweird.f32 %v1894_v55 }
0x144b   :  { %3154 = vtanh.f32 %v1884_v57  ;;  %v1907_v15 = vor.u32 1.1754944e-38, %v1906_v63  ;;  %vm1905_vm9 = vcmp.eq.f32.partialorder %v1904_v7, 8.507059e+37 }
0x144c   :  { %v1922_v3 = vor.u32 1.1754944e-38, %v1921_v35  ;;  %vm1920_vm0 = vcmp.eq.f32.partialorder %v1919_v30, 8.507059e+37 }
0x144f   :  { %v3151_v2 = vpop.eup %3150 }
0x1450   :  { %v3153_v5 = vpop.eup %3152  ;;  %v1896_v49 = vmul.f32 %v3151_v2, %v1893_v54  ;;  %vm1901_vm3 = vweird.f32 %v3151_v2 }
0x1451   :  { %v1911_v41 = vmul.f32 %v3153_v5, %v1894_v55  ;;  %vm1916_vm5 = vweird.f32 %v3153_v5  ;;  %vm1902_vm7 = vmor %vm1900_vm6, %vm1901_vm3  ;;  %v3155_v4 = vpop.eup %3154 }
0x1452   :  { %v1897_v6 = vsub.f32 1.0, %v1896_v49  ;;  %vm1917_vm11 = vmor %vm1915_vm8, %vm1916_vm5 }
0x1453   :  { %v1912_v23 = vsub.f32 1.0, %v1911_v41 }
0x1454   :  { %v1898_v32 = vmul.f32 %v3151_v2, %v1897_v6 }
0x1455   :  { %v1913_v11 = vmul.f32 %v3153_v5, %v1912_v23 }
0x1456   :  { %v1899_v39 = vadd.f32 %v3151_v2, %v1898_v32 }
0x1457   :  { %v1914_v28 = vadd.f32 %v3153_v5, %v1913_v11 }
0x1458   :  { %v1903_v45 = vsel %vm1902_vm7, %v3151_v2, %v1899_v39 }
0x1459   :  { %v1908_v9 = vsel %vm1905_vm9, %v1907_v15, %v1903_v45  ;;  %v1918_v10 = vsel %vm1917_vm11, %v3153_v5, %v1914_v28 }
0x145a   :  { %v1923_v12 = vsel %vm1920_vm0, %v1922_v3, %v1918_v10  ;;  %v1930_v20 = vmul.f32 %v1928_v1, %v1908_v9 }
0x145b   :  { %v1926_v50 = vsel %vm230_vm10, %v3155_v4, %v1923_v12 }
0x145c   :  { %v1931_v13 = vmul.f32 %v1926_v50, %v1908_v9 }
0x145e   :  { %1933 = vrot.lane.b32.xlu0 %v1931_v13, %s3447_s23 }
0x14d0   :  { %v1934_v16 = vpop.permute.xlu0 %1933 }
0x14d1   :  { %v1936_v29 = vadd.f32 %v1934_v16, %v1930_v20 }
0x14d3   :  { %3156 = vtanh.f32 %v1936_v29  ;;  %v2029_v63 = vrot.slane %v1936_v29, 6 }
0x14d9   :  { %v3157_v14 = vpop.eup %3156 }
0x14da   :  { %v4143_v61 = vmul.f32 %v3157_v14, %v1926_v50 }
0x14dc   :  { %v1945_v62 = vpack.c.bf16 %v4143_v61, %v4143_v61 }
0x14de   :  { %1947 = vrot.lane.b32.xlu1 %v1945_v62, %s3447_s23 }
0x1550   :  { %v1948_v17 = vpop.permute.xlu1 %1947 }
0x1551   :  { %2833 = vmatmul.msk.bf16.vlgmr.msra.gmra.mxu0 %vm404_vm14, %v1948_v17  ;;  %2834 = vmatmul.msk.bf16.vlgmr.msrb.gmra.mxu1 %vm404_vm14, %v1948_v17 }
0x15ce   :  { %v1961_v18 = vpop.f32.mrf.mxu0  ;;  %v1974_v19 = vpop.f32.mrf.mxu1 }
0x15cf   :  { %v1980_v21 = vrot.slane %v1961_v18, 6  ;;  %v1981_v24 = vrot.slane %v1974_v19, 6 }
0x15d1   :  { %v1984_v25 = vadd.f32 %v1980_v21, %v4028_v22  ;;  %v1985_v26 = vadd.f32 %v1981_v24, %v4030_v56 }
0x15d3   :  { %v2835_v31 = vmul.f32 -1.442695, %v1984_v25  ;;  %v2836_v33 = vmul.f32 -1.442695, %v1985_v26 }
0x15d5   :  { %3158 = vpow2.f32 %v2835_v31 }
0x15d6   :  { %3160 = vpow2.f32 %v2836_v33  ;;  %v1963_v36 = vpop.f32.mrf.mxu0  ;;  %v1976_v42 = vpop.f32.mrf.mxu1 }
0x15db   :  { %v3159_v38 = vpop.eup %3158 }
0x15dc   :  { %v3161_v40 = vpop.eup %3160  ;;  %v1994_v48 = vadd.f32 1.0, %v3159_v38 }
0x15dd   :  { %v1995_v0 = vadd.f32 1.0, %v3161_v40 }
0x15de   :  { %3162 = vrcp.f32 %v1994_v48  ;;  %v2007_v47 = vand.u32 2147483648, %v1994_v48  ;;  %v2005_v54 = vand.u32 2147483647, %v1994_v48  ;;  %vm2001_vm15 = vweird.f32 %v1994_v48 }
0x15df   :  { %3164 = vrcp.f32 %v1995_v0  ;;  %v2022_v55 = vand.u32 2147483648, %v1995_v0  ;;  %v2020_v5 = vand.u32 2147483647, %v1995_v0  ;;  %vm2016_vm2 = vweird.f32 %v1995_v0 }
0x15e0   :  { %3166 = vtanh.f32 %v1985_v26  ;;  %v2008_v41 = vor.u32 1.1754944e-38, %v2007_v47  ;;  %vm2006_vm3 = vcmp.eq.f32.partialorder %v2005_v54, 8.507059e+37 }
0x15e1   :  { %v2023_v32 = vor.u32 1.1754944e-38, %v2022_v55  ;;  %vm2021_vm6 = vcmp.eq.f32.partialorder %v2020_v5, 8.507059e+37 }
0x15e4   :  { %v3163_v58 = vpop.eup %3162 }
0x15e5   :  { %v3165_v57 = vpop.eup %3164  ;;  %v1997_v43 = vmul.f32 %v3163_v58, %v1994_v48  ;;  %vm2002_vm12 = vweird.f32 %v3163_v58 }
0x15e6   :  { %v2012_v44 = vmul.f32 %v3165_v57, %v1995_v0  ;;  %vm2017_vm13 = vweird.f32 %v3165_v57  ;;  %vm2003_vm1 = vmor %vm2001_vm15, %vm2002_vm12  ;;  %v3167_v7 = vpop.eup %3166 }
0x15e7   :  { %v1998_v46 = vsub.f32 1.0, %v1997_v43  ;;  %vm2018_vm5 = vmor %vm2016_vm2, %vm2017_vm13  ;;  %vm2328_vm2 = vcmask 523270  }
0x15e8   :  { %v2013_v52 = vsub.f32 1.0, %v2012_v44 }
0x15e9   :  { %v1999_v53 = vmul.f32 %v3163_v58, %v1998_v46 }
0x15ea   :  { %v2014_v2 = vmul.f32 %v3165_v57, %v2013_v52 }
0x15eb   :  { %v2000_v49 = vadd.f32 %v3163_v58, %v1999_v53 }
0x15ec   :  { %v2015_v6 = vadd.f32 %v3165_v57, %v2014_v2 }
0x15ed   :  { %v2004_v23 = vsel %vm2003_vm1, %v3163_v58, %v2000_v49  ;;  %vm2316_vm1 = vcmask 519170  }
0x15ee   :  { %v2009_v35 = vsel %vm2006_vm3, %v2008_v41, %v2004_v23  ;;  %v2019_v11 = vsel %vm2018_vm5, %v3165_v57, %v2015_v6  ;;  %v2283_v23 = vrot.slane %v4110_v27, 2 }
0x15ef   :  { %v2024_v30 = vsel %vm2021_vm6, %v2023_v32, %v2019_v11  ;;  %v2031_v39 = vmul.f32 %v2029_v63, %v2009_v35 }
0x15f0   :  { %v2027_v15 = vsel %vm230_vm10, %v3167_v7, %v2024_v30 }
0x15f1   :  { %v2032_v28 = vmul.f32 %v2027_v15, %v2009_v35 }
0x15f3   :  { %2034 = vrot.lane.b32.xlu2 %v2032_v28, %s3447_s23 }
0x164d   :  { %v2035_v1 = vpop.permute.xlu2 %2034 }
0x164e   :  { %v2037_v45 = vadd.f32 %v2035_v1, %v2031_v39  ;;  %v2267_v1 = vrot.slane %v4143_v61, 2 }
0x1650   :  { %3168 = vtanh.f32 %v2037_v45  ;;  %v2125_v47 = vrot.slane %v2037_v45, 6  ;;  %v2291_v45 = vrot.slane %v4086_v51, 6 }
0x1656   :  { %v3169_v3 = vpop.eup %3168 }
0x1657   :  { %v4155_v4 = vmul.f32 %v3169_v3, %v2027_v15  ;;  %v2299_v15 = vrot.slane %v4054_v34, 2 }
0x1659   :  { %v2040_v9 = vpack.c.bf16 %v4155_v4, %v4155_v4  ;;  %v2257_v63 = vrot.slane %v4155_v4, 6 }
0x165b   :  { %v2042_v10 = vrot.slane %v2040_v9, 1 }
0x165d   :  { %2043 = vrot.lane.b32.xlu0 %v2042_v10, %s3447_s23 }
0x16cf   :  { %v2044_v12 = vpop.permute.xlu0 %2043 }
0x16d0   :  { %2837 = vmatmul.msk.bf16.vlgmr.msrb.gmra.mxu2 %vm404_vm14, %v2044_v12  ;;  %2838 = vmatmul.msk.bf16.vlgmr.msrb.gmra.mxu3 %vm404_vm14, %v2044_v12 }
0x1753   :  { %v2057_v20 = vpop.f32.mrf.mxu2  ;;  %v2070_v50 = vpop.f32.mrf.mxu3 }
0x1754   :  { %v2076_v13 = vrot.slane %v2057_v20, 4  ;;  %v2077_v16 = vrot.slane %v2070_v50, 4 }
0x1756   :  { %v2080_v29 = vadd.f32 %v2076_v13, %v4032_v60  ;;  %v2081_v14 = vadd.f32 %v2077_v16, %v4034_v8 }
0x1758   :  { %v2839_v62 = vmul.f32 -1.442695, %v2080_v29  ;;  %v2840_v17 = vmul.f32 -1.442695, %v2081_v14 }
0x175a   :  { %3170 = vpow2.f32 %v2839_v62 }
0x175b   :  { %3172 = vpow2.f32 %v2840_v17  ;;  %v2059_v18 = vpop.f32.mrf.mxu2  ;;  %v2072_v19 = vpop.f32.mrf.mxu3 }
0x1760   :  { %v3171_v21 = vpop.eup %3170 }
0x1761   :  { %v3173_v24 = vpop.eup %3172  ;;  %v2090_v25 = vadd.f32 1.0, %v3171_v21 }
0x1762   :  { %v2091_v26 = vadd.f32 1.0, %v3173_v24 }
0x1763   :  { %3174 = vrcp.f32 %v2090_v25  ;;  %v2103_v60 = vand.u32 2147483648, %v2090_v25  ;;  %v2101_v48 = vand.u32 2147483647, %v2090_v25  ;;  %vm2097_vm9 = vweird.f32 %v2090_v25 }
0x1764   :  { %3176 = vrcp.f32 %v2091_v26  ;;  %v2118_v0 = vand.u32 2147483648, %v2091_v26  ;;  %v2116_v57 = vand.u32 2147483647, %v2091_v26  ;;  %vm2112_vm0 = vweird.f32 %v2091_v26 }
0x1765   :  { %3178 = vtanh.f32 %v2081_v14  ;;  %v2104_v44 = vor.u32 1.1754944e-38, %v2103_v60  ;;  %vm2102_vm12 = vcmp.eq.f32.partialorder %v2101_v48, 8.507059e+37 }
0x1766   :  { %v2119_v53 = vor.u32 1.1754944e-38, %v2118_v0  ;;  %vm2117_vm15 = vcmp.eq.f32.partialorder %v2116_v57, 8.507059e+37 }
0x1769   :  { %v3175_v31 = vpop.eup %3174 }
0x176a   :  { %v3177_v33 = vpop.eup %3176  ;;  %v2093_v36 = vmul.f32 %v3175_v31, %v2090_v25  ;;  %vm2098_vm7 = vweird.f32 %v3175_v31 }
0x176b   :  { %v2108_v42 = vmul.f32 %v3177_v33, %v2091_v26  ;;  %vm2113_vm8 = vweird.f32 %v3177_v33  ;;  %vm2099_vm11 = vmor %vm2097_vm9, %vm2098_vm7  ;;  %v3179_v54 = vpop.eup %3178 }
0x176c   :  { %v2094_v38 = vsub.f32 1.0, %v2093_v36  ;;  %vm2114_vm13 = vmor %vm2112_vm0, %vm2113_vm8 }
0x176d   :  { %v2109_v8 = vsub.f32 1.0, %v2108_v42 }
0x176e   :  { %v2095_v40 = vmul.f32 %v3175_v31, %v2094_v38 }
0x176f   :  { %v2110_v58 = vmul.f32 %v3177_v33, %v2109_v8 }
0x1770   :  { %v2096_v43 = vadd.f32 %v3175_v31, %v2095_v40 }
0x1771   :  { %v2111_v46 = vadd.f32 %v3177_v33, %v2110_v58 }
0x1772   :  { %v2100_v52 = vsel %vm2099_vm11, %v3175_v31, %v2096_v43 }
0x1773   :  { %v2105_v55 = vsel %vm2102_vm12, %v2104_v44, %v2100_v52  ;;  %v2115_v2 = vsel %vm2114_vm13, %v3177_v33, %v2111_v46  ;;  %vm2310_vm12 = vcmask 517120   ;;  %vm2372_vm13 = vcmask 15360  }
0x1774   :  { %v2120_v5 = vsel %vm2117_vm15, %v2119_v53, %v2115_v2  ;;  %v2127_v49 = vmul.f32 %v2125_v47, %v2105_v55  ;;  %vm2374_vm15 = vcmask 23552  }
0x1775   :  { %v2123_v41 = vsel %vm230_vm10, %v3179_v54, %v2120_v5 }
0x1776   :  { %v2128_v6 = vmul.f32 %v2123_v41, %v2105_v55 }
0x1778   :  { %2130 = vrot.lane.b32.xlu1 %v2128_v6, %s3447_s23 }
0x1780   :  { %2243 = vrot.lane.b32.xlu1 %v4086_v51, %s3447_s23 }
0x1788   :  { %2258 = vrot.lane.b32.xlu1 %v2257_v63, %s3447_s23 }
0x1790   :  { %2263 = vrot.lane.b32.xlu1 %v4131_v37, %s3447_s23 }
0x1798   :  { %2284 = vrot.lane.b32.xlu1 %v2283_v23, %s3447_s23 }
0x17ea   :  { %v2131_v32 = vpop.permute.xlu1 %2130 }
0x17eb   :  { %v4175_v7 = vadd.f32 %v2131_v32, %v2127_v49 }
0x17ed   :  { %3180 = vtanh.f32 %v4175_v7  ;;  %v2221_v49 = vrot.slane %v4175_v7, 6  ;;  %v2275_v7 = vrot.slane %v4131_v37, 6 }
0x17f2   :  { %v2244_v9 = vpop.permute.xlu1 %2243 }
0x17f3   :  { %v3181_v35 = vpop.eup %3180 }
0x17f4   :  { %v2135_v11 = vmul.f32 %v3181_v35, %v2123_v41 }
0x17f6   :  { %2288 = vrot.lane.b32.xlu1 %v2135_v11, %s3447_s23  ;;  %v2136_v30 = vpack.c.bf16 %v2135_v11, %v2135_v11  ;;  %v2247_v28 = vrot.slane %v2135_v11, 2 }
0x17f8   :  { %v2138_v39 = vrot.slane %v2136_v30, 2 }
0x17fa   :  { %2139 = vrot.lane.b32.xlu2 %v2138_v39, %s3447_s23  ;;  %v4202_v51 = vpop.permute.xlu1 %2258 }
0x17fe   :  { %2300 = vrot.lane.b32.xlu1 %v2299_v15, %s3447_s23 }
0x1802   :  { %2248 = vrot.lane.b32.xlu2 %v2247_v28, %s3447_s23  ;;  %v2264_v16 = vpop.permute.xlu1 %2263 }
0x180a   :  { %2233 = vrot.lane.b32.xlu2 %v4054_v34, %s3447_s23 }
0x1812   :  { %2268 = vrot.lane.b32.xlu2 %v2267_v1, %s3447_s23 }
0x181a   :  { %2272 = vrot.lane.b32.xlu2 %v4143_v61, %s3447_s23  ;;  %v4200_v61 = vld [vmem:[%s4301_s10] ss:$0 sm:$0xff] }
0x1822   :  { %2292 = vrot.lane.b32.xlu2 %v2291_v45, %s3447_s23 }
0x1854   :  { %v2140_v3 = vpop.permute.xlu2 %2139 }
0x1855   :  { %2841 = vmatmul.msk.bf16.vlgmr.msrb.gmra.mxu0 %vm404_vm14, %v2140_v3  ;;  %2842 = vmatmul.msk.bf16.vlgmr.msra.gmra.mxu1 %vm404_vm14, %v2140_v3 }
0x185c   :  { %v2249_v10 = vpop.permute.xlu2 %2248 }
0x185d   :  { %v4194_v34 = vsel %vm276_vm4, %v2244_v9, %v2249_v10  ;;  %v2285_v9 = vpop.permute.xlu1 %2284 }
0x185e   :  { %3182 = vtanh.f32 %v4194_v34 }
0x1864   :  { %v3183_v12 = vpop.eup %3182  ;;  %v4204_v20 = vpop.permute.xlu2 %2233 }
0x1865   :  { %v2315_v50 = vmul.f32 %v3183_v12, %v4200_v61 }
0x1867   :  { %v2317_v13 = vsel %vm2316_vm1, %v2315_v50, 0.0 }
0x1868   :  { %2318 = vadd.xlane.f32.xlu2 %v2317_v13 }
0x186c   :  { %v2269_v29 = vpop.permute.xlu2 %2268 }
0x186d   :  { %v4209_v14 = vsel %vm276_vm4, %v2264_v16, %v2269_v29 }
0x186e   :  { %3184 = vtanh.f32 %v4209_v14 }
0x1874   :  { %v3185_v62 = vpop.eup %3184  ;;  %v2273_v16 = vpop.permute.xlu2 %2272 }
0x1875   :  { %v2327_v17 = vmul.f32 %v3185_v62, %v4200_v61 }
0x1877   :  { %v2329_v18 = vsel %vm2328_vm2, %v2327_v17, 0.0 }
0x1878   :  { %2330 = vadd.xlane.f32.xlu2 %v2329_v18 }
0x18d2   :  { %v2153_v19 = vpop.f32.mrf.mxu0  ;;  %v2166_v21 = vpop.f32.mrf.mxu1 }
0x18d3   :  { %v2172_v24 = vrot.slane %v2153_v19, 2  ;;  %v2173_v25 = vrot.slane %v2166_v21, 2 }
0x18d5   :  { %v2176_v26 = vadd.f32 %v2172_v24, %v4028_v22  ;;  %v2177_v31 = vadd.f32 %v2173_v25, %v4030_v56  ;;  %v2289_v24 = vpop.permute.xlu1 %2288  ;;  %v2293_v25 = vpop.permute.xlu2 %2292 }
0x18d7   :  { %v2843_v33 = vmul.f32 -1.442695, %v2176_v26  ;;  %v2844_v36 = vmul.f32 -1.442695, %v2177_v31 }
0x18d9   :  { %3186 = vpow2.f32 %v2843_v33  ;;  %v4253_v33 = vsel %vm276_vm4, %v2289_v24, %v2293_v25  ;;  %v3459_v24 = vmov 7   ;;  %v3460_v25 = vmov 3  }
0x18da   :  { %3188 = vpow2.f32 %v2844_v36  ;;  %v2155_v42 = vpop.f32.mrf.mxu0  ;;  %v2168_v38 = vpop.f32.mrf.mxu1 }
0x18dd   :  { %v2301_v42 = vpop.permute.xlu1 %2300 }
0x18df   :  { %v3187_v60 = vpop.eup %3186 }
0x18e0   :  { %v3189_v8 = vpop.eup %3188  ;;  %v2186_v40 = vadd.f32 1.0, %v3187_v60 }
0x18e1   :  { %v2187_v48 = vadd.f32 1.0, %v3189_v8 }
0x18e2   :  { %3190 = vrcp.f32 %v2186_v40  ;;  %v2199_v22 = vand.u32 2147483648, %v2186_v40  ;;  %v2197_v47 = vand.u32 2147483647, %v2186_v40  ;;  %vm2193_vm6 = vweird.f32 %v2186_v40 }
0x18e3   :  { %3192 = vrcp.f32 %v2187_v48  ;;  %v2214_v52 = vand.u32 2147483648, %v2187_v48  ;;  %v2212_v54 = vand.u32 2147483647, %v2187_v48  ;;  %vm2208_vm8 = vweird.f32 %v2187_v48 }
0x18e4   :  { %3194 = vtanh.f32 %v2177_v31  ;;  %v2200_v2 = vor.u32 1.1754944e-38, %v2199_v22  ;;  %vm2198_vm9 = vcmp.eq.f32.partialorder %v2197_v47, 8.507059e+37 }
0x18e5   :  { %v2215_v6 = vor.u32 1.1754944e-38, %v2214_v52  ;;  %vm2213_vm0 = vcmp.eq.f32.partialorder %v2212_v54, 8.507059e+37 }
0x18e8   :  { %v3191_v0 = vpop.eup %3190 }
0x18e9   :  { %v3193_v58 = vpop.eup %3192  ;;  %v2189_v57 = vmul.f32 %v3191_v0, %v2186_v40  ;;  %vm2194_vm3 = vweird.f32 %v3191_v0 }
0x18ea   :  { %v2204_v43 = vmul.f32 %v3193_v58, %v2187_v48  ;;  %vm2209_vm5 = vweird.f32 %v3193_v58  ;;  %vm2195_vm7 = vmor %vm2193_vm6, %vm2194_vm3  ;;  %v3195_v63 = vpop.eup %3194  ;;  %vm2380_vm3 = vcmask 48128   ;;  %vm2384_vm6 = vcmask 58368  }
0x18eb   :  { %v2190_v44 = vsub.f32 1.0, %v2189_v57  ;;  %vm2210_vm11 = vmor %vm2208_vm8, %vm2209_vm5  ;;  %vm2382_vm5 = vcmask 56320  }
0x18ec   :  { %v2205_v56 = vsub.f32 1.0, %v2204_v43 }
0x18ed   :  { %v2191_v46 = vmul.f32 %v3191_v0, %v2190_v44  ;;  %v2319_v44 = vpop.xlane.xlu2 %2318 }
0x18ee   :  { %v2206_v53 = vmul.f32 %v3193_v58, %v2205_v56 }
0x18ef   :  { %v2192_v55 = vadd.f32 %v3191_v0, %v2191_v46  ;;  %v2353_v46 = vrot.slane %v2319_v44, 2  ;;  %v2926_v44 = vld [vmem:[%s4304_s13 + $0x18] sm:$0xff] }
0x18f0   :  { %v2207_v5 = vadd.f32 %v3193_v58, %v2206_v53  ;;  %2580 = vmatpush.bf16.msra.mxu3 %v2926_v44 }
0x18f1   :  { %v2196_v41 = vsel %vm2195_vm7, %v3191_v0, %v2192_v55 }
0x18f2   :  { %v2201_v23 = vsel %vm2198_vm9, %v2200_v2, %v2196_v41  ;;  %v2211_v32 = vsel %vm2210_vm11, %v3193_v58, %v2207_v5 }
0x18f3   :  { %v2216_v35 = vsel %vm2213_vm0, %v2215_v6, %v2211_v32  ;;  %v2223_v11 = vmul.f32 %v2221_v49, %v2201_v23  ;;  %vm2589_vm0 = vcmask 33792  }
0x18f4   :  { %v2219_v30 = vsel %vm230_vm10, %v3195_v63, %v2216_v35  ;;  %vm2322_vm10 = vcmask 521220  }
0x18f5   :  { %v2224_v39 = vmul.f32 %v2219_v30, %v2201_v23  ;;  %v2331_v22 = vpop.xlane.xlu2 %2330 }
0x18f6   :  { %v2359_v55 = vrot.slane %v2331_v22, 6  ;;  %v2925_v22 = vld [vmem:[%s4304_s13 + $0x10] sm:$0xff] }
0x18f7   :  { %2226 = vrot.lane.b32.xlu0 %v2224_v39, %s3447_s23  ;;  %2581 = vmatpush.bf16.msra.mxu3 %v2925_v22 }
0x18ff   :  { %2253 = vrot.lane.b32.xlu0 %v4110_v27, %s3447_s23 }
0x1907   :  { %2280 = vrot.lane.b32.xlu0 %v4155_v4, %s3447_s23 }
0x190f   :  { %2276 = vrot.lane.b32.xlu0 %v2275_v7, %s3447_s23 }
0x1969   :  { %v2227_v15 = vpop.permute.xlu0 %2226 }
0x196a   :  { %v2229_v28 = vadd.f32 %v2227_v15, %v2223_v11 }
0x196c   :  { %3196 = vtanh.f32 %v2229_v28 }
0x1971   :  { %v2254_v1 = vpop.permute.xlu0 %2253 }
0x1972   :  { %v3197_v45 = vpop.eup %3196  ;;  %v4236_v50 = vsel %vm276_vm4, %v2254_v1, %v4202_v51 }
0x1973   :  { %v2231_v59 = vmul.f32 %v3197_v45, %v2219_v30 }
0x1975   :  { %v2237_v3 = vrot.slane %v2231_v59, 6 }
0x1977   :  { %2238 = vrot.lane.b32.xlu0 %v2237_v3, %s3447_s23  ;;  %v3457_v3 = vmov 2  }
0x1978   :  { %2991 = vset.pattern.permute.xlu0 %v3457_v3 }
0x1979   :  { %v2281_v10 = vpop.permute.xlu0 %2280 }
0x197a   :  { %v4228_v27 = vsel %vm276_vm4, %v2281_v10, %v2285_v9 }
0x197b   :  { %3198 = vtanh.f32 %v4228_v27 }
0x197c   :  { %3200 = vtanh.f32 %v4236_v50 }
0x197f   :  { %2296 = vrot.lane.b32.xlu0 %v2231_v59, %s3447_s23  ;;  %v3456_v59 = vmov 1  }
0x1980   :  { %2990 = vset.pattern.permute.xlu2 %v3456_v59 }
0x1981   :  { %v3199_v37 = vpop.eup %3198  ;;  %v2277_v13 = vpop.permute.xlu0 %2276 }
0x1982   :  { %v2338_v4 = vmul.f32 %v3199_v37, %v4200_v61  ;;  %v4240_v29 = vsel %vm276_vm4, %v2273_v16, %v2277_v13  ;;  %v3201_v62 = vpop.eup %3200 }
0x1983   :  { %3202 = vtanh.f32 %v4240_v29  ;;  %v2321_v17 = vmul.f32 %v3201_v62, %v4200_v61 }
0x1984   :  { %v2339_v12 = vsel %vm2316_vm1, %v2338_v4, 0.0  ;;  %vm2376_vm1 = vcmask 31744  }
0x1985   :  { %2340 = vadd.xlane.f32.xlu2 %v2339_v12  ;;  %v2323_v18 = vsel %vm2322_vm10, %v2321_v17, 0.0 }
0x1989   :  { %v3203_v19 = vpop.eup %3202 }
0x198a   :  { %v2333_v51 = vmul.f32 %v3203_v19, %v4200_v61 }
0x198c   :  { %v2334_v21 = vsel %vm2310_vm12, %v2333_v51, 0.0 }
0x19a9   :  { %2324 = vadd.xlane.f32.xlu0 %v2323_v18 }
0x19b1   :  { %2335 = vadd.xlane.f32.xlu0 %v2334_v21  ;;  %v3458_v21 = vmov 5  }
0x19e9   :  { %v2239_v26 = vpop.permute.xlu0 %2238 }
0x19ea   :  { %v4249_v31 = vsel %vm276_vm4, %v4204_v20, %v2239_v26  ;;  %v3461_v26 = vmov 6  }
0x19eb   :  { %3204 = vtanh.f32 %v4249_v31 }
0x19ec   :  { %3206 = vtanh.f32 %v4253_v33 }
0x19f1   :  { %v3205_v36 = vpop.eup %3204  ;;  %v2297_v38 = vpop.permute.xlu0 %2296 }
0x19f2   :  { %v4257_v60 = vsel %vm276_vm4, %v2297_v38, %v2301_v42  ;;  %v2309_v8 = vmul.f32 %v3205_v36, %v4200_v61  ;;  %v3207_v40 = vpop.eup %3206  ;;  %vm2370_vm4 = vcmask 7168   ;;  %v3462_v36 = vmov 4   ;;  %v2922_v38 = vld [vmem:[#allocation11 + $0x18] sm:$0xff] }
0x19f3   :  { %3208 = vtanh.f32 %v4257_v60  ;;  %v2343_v48 = vmul.f32 %v3207_v40, %v4200_v61  ;;  %2527 = vmatpush.bf16.msra.mxu2 %v2922_v38 }
0x19f4   :  { %v2311_v20 = vsel %vm2310_vm12, %v2309_v8, 0.0  ;;  %v2921_v8 = vld [vmem:[#allocation11 + $0x10] sm:$0xff] }
0x19f5   :  { %2312 = vadd.xlane.f32.xlu1 %v2311_v20  ;;  %v2344_v57 = vsel %vm2322_vm10, %v2343_v48, 0.0  ;;  %v2920_v20 = vld [vmem:[#allocation11 + $0x8] sm:$0xff]  ;;  %v2919_v48 = vld [vmem:[#allocation11] sm:$0xff] }
0x19f7   :  { %2528 = vmatpush.bf16.msra.mxu2 %v2921_v8 }
0x19f8   :  { %v2341_v47 = vpop.xlane.xlu2 %2340 }
0x19f9   :  { %v3209_v0 = vpop.eup %3208  ;;  %v2362_v41 = vrot.slane %v2341_v47, 2 }
0x19fa   :  { %v2348_v58 = vmul.f32 %v3209_v0, %v4200_v61 }
0x19fb   :  { %2529 = vmatpush.bf16.msra.mxu2 %v2920_v20 }
0x19fc   :  { %v2349_v43 = vsel %vm2328_vm2, %v2348_v58, 0.0  ;;  %vm2378_vm2 = vcmask 39936  }
0x19fd   :  { %2345 = vadd.xlane.f32.xlu1 %v2344_v57  ;;  %2350 = vadd.xlane.f32.xlu2 %v2349_v43 }
0x19ff   :  { %2530 = vmatpush.bf16.msra.mxu2 %v2919_v48 }
0x1a1c   :  { %v2325_v56 = vpop.xlane.xlu0 %2324 }
0x1a1d   :  { %v2356_v52 = vrot.slane %v2325_v56, 4 }
0x1a24   :  { %v2336_v5 = vpop.xlane.xlu0 %2335 }
0x1a68   :  { %v2313_v53 = vpop.xlane.xlu1 %2312 }
0x1a69   :  { %v2371_v54 = vsel %vm2370_vm4, %v2313_v53, %v2353_v46 }
0x1a6a   :  { %v2373_v2 = vsel %vm2372_vm13, %v2371_v54, %v2356_v52  ;;  %v2924_v54 = vld [vmem:[%s4304_s13 + $0x8] sm:$0xff] }
0x1a6b   :  { %v2375_v61 = vsel %vm2374_vm15, %v2373_v2, %v2359_v55  ;;  %2582 = vmatpush.bf16.msra.mxu3 %v2924_v54 }
0x1a6c   :  { %v2377_v49 = vsel %vm2376_vm1, %v2375_v61, %v2336_v5 }
0x1a6d   :  { %v2379_v35 = vsel %vm2378_vm2, %v2377_v49, %v2362_v41 }
0x1a70   :  { %v2346_v6 = vpop.xlane.xlu1 %2345  ;;  %v2351_v63 = vpop.xlane.xlu2 %2350 }
0x1a71   :  { %v2365_v23 = vrot.slane %v2346_v6, 4  ;;  %v2368_v32 = vrot.slane %v2351_v63, 6 }
0x1a73   :  { %v2381_v11 = vsel %vm2380_vm3, %v2379_v35, %v2365_v23 }
0x1a74   :  { %v2383_v30 = vsel %vm2382_vm5, %v2381_v11, %v2368_v32 }
0x1a75   :  { %v2385_v39 = vsel %vm2384_vm6, %v2383_v30, -inf }
0x1a76   :  { %2386 = vmax.xlane.f32.xlu0 %v2385_v39 }
0x1ae9   :  { %v2387_v7 = vpop.xlane.xlu0 %2386 }
0x1aea   :  { %v2388_v15 = vsub.f32 %v2383_v30, %v2387_v7 }
0x1aec   :  { %v2389_v28 = vmul.f32 1.442695, %v2388_v15 }
0x1aee   :  { %3210 = vpow2.f32 %v2389_v28 }
0x1af4   :  { %v3211_v1 = vpop.eup %3210 }
0x1af5   :  { %v2391_v45 = vsel %vm2384_vm6, %v3211_v1, 0.0 }
0x1af6   :  { %2392 = vadd.xlane.f32.xlu1 %v2391_v45 }
0x1b69   :  { %v2393_v9 = vpop.xlane.xlu1 %2392 }
0x1b6a   :  { %3212 = vrcp.f32 %v2393_v9  ;;  %v2405_v12 = vand.u32 2147483648, %v2393_v9  ;;  %v2403_v16 = vand.u32 2147483647, %v2393_v9  ;;  %vm2399_vm8 = vweird.f32 %v2393_v9 }
0x1b6c   :  { %v2406_v17 = vor.u32 1.1754944e-38, %v2405_v12  ;;  %vm2404_vm11 = vcmp.eq.f32.partialorder %v2403_v16, 8.507059e+37 }
0x1b70   :  { %v3213_v10 = vpop.eup %3212 }
0x1b71   :  { %v2395_v37 = vmul.f32 %v3213_v10, %v2393_v9  ;;  %vm2400_vm7 = vweird.f32 %v3213_v10 }
0x1b72   :  { %vm2401_vm9 = vmor %vm2399_vm8, %vm2400_vm7 }
0x1b73   :  { %v2396_v4 = vsub.f32 1.0, %v2395_v37 }
0x1b75   :  { %v2397_v13 = vmul.f32 %v3213_v10, %v2396_v4  ;;  %v3001_v4 = vld [vmem:[#allocation14] ss:$0 sm:$0xff] }
0x1b77   :  { %v2398_v62 = vadd.f32 %v3213_v10, %v2397_v13 }
0x1b79   :  { %v2402_v18 = vsel %vm2401_vm9, %v3213_v10, %v2398_v62 }
0x1b7a   :  { %v2407_v19 = vsel %vm2404_vm11, %v2406_v17, %v2402_v18 }
0x1b7b   :  { %v2408_v51 = vmul.f32 %v3211_v1, %v2407_v19 }
0x1b7d   :  { %2411 = vperm.xlu1 %2992, %v2408_v51   ;;  %2427 = vperm.xlu0 %2991, %v2408_v51  }
0x1b7e   :  { %2417 = vperm.xlu2 %2990, %v2408_v51  }
0x1b85   :  { %2994 = vset.pattern.permute.xlu1 %v3458_v21  ;;  %2998 = vset.pattern.permute.xlu0 %v3459_v24 }
0x1b86   :  { %2993 = vset.pattern.permute.xlu2 %v3460_v25  ;;  %2453 = vperm.xlu1 %2994, %v2408_v51  }
0x1b87   :  { %2437 = vperm.xlu2 %2993, %v2408_v51  }
0x1b8e   :  { %2996 = vset.pattern.permute.xlu1 %v3461_v26 }
0x1b8f   :  { %2995 = vset.pattern.permute.xlu2 %v3462_v36  ;;  %2463 = vperm.xlu1 %2996, %v2408_v51  }
0x1b90   :  { %2447 = vperm.xlu2 %2995, %v2408_v51  }
0x1b98   :  { %2997 = vset.pattern.permute.xlu2 %v3459_v24 }
0x1b99   :  { %2473 = vperm.xlu2 %2997, %v2408_v51  }
0x1bd8   :  { %v2418_v42 = vpop.permute.xlu2 %2417 }
0x1bd9   :  { %v2419_v57 = vrot.slane %v2418_v42, 6 }
0x1bdb   :  { %v2421_v46 = vmul.f32 %v2419_v57, %v4194_v34 }
0x1bdd   :  { %v2423_v55 = vrot.slane %v2421_v46, 2 }
0x1be1   :  { %v2438_v40 = vpop.permute.xlu2 %2437 }
0x1be2   :  { %v2439_v52 = vrot.slane %v2438_v40, 2 }
0x1be4   :  { %v2441_v5 = vmul.f32 %v2439_v52, %v4209_v14 }
0x1be6   :  { %v2443_v63 = vrot.slane %v2441_v5, 6 }
0x1bea   :  { %v2448_v56 = vpop.permute.xlu2 %2447 }
0x1beb   :  { %v2450_v35 = vmul.f32 %v2448_v56, %v4240_v29  ;;  %v3000_v29 = vld [vmem:[#allocation13] ss:$0 sm:$0xff] }
0x1bef   :  { %v2412_v0 = vpop.permute.xlu1 %2411  ;;  %v2428_v58 = vpop.permute.xlu0 %2427 }
0x1bf0   :  { %v2429_v43 = vrot.slane %v2428_v58, 4  ;;  %v2414_v53 = vmul.f32 %v2412_v0, %v4249_v31 }
0x1bf2   :  { %v2431_v47 = vmul.f32 %v2429_v43, %v4236_v50  ;;  %v2425_v49 = vadd.f32 %v2423_v55, %v2414_v53 }
0x1bf3   :  { %v2474_v34 = vpop.permute.xlu2 %2473 }
0x1bf4   :  { %v2433_v2 = vrot.slane %v2431_v47, 4  ;;  %v2475_v31 = vrot.slane %v2474_v34, 2 }
0x1bf6   :  { %v2435_v6 = vadd.f32 %v2433_v2, %v2425_v49  ;;  %v2477_v39 = vmul.f32 %v2475_v31, %v4257_v60 }
0x1bf8   :  { %v2454_v61 = vpop.permute.xlu1 %2453  ;;  %v2445_v23 = vadd.f32 %v2443_v63, %v2435_v6  ;;  %v2479_v1 = vrot.slane %v2477_v39, 6 }
0x1bf9   :  { %v2455_v41 = vrot.slane %v2454_v61, 6 }
0x1bfa   :  { %v2451_v7 = vadd.f32 %v2450_v35, %v2445_v23 }
0x1bfb   :  { %v2457_v50 = vmul.f32 %v2455_v41, %v4228_v27  ;;  %v2923_v27 = vld [vmem:[%s4304_s13] sm:$0xff] }
0x1bfc   :  { %2583 = vmatpush.bf16.msra.mxu3 %v2923_v27 }
0x1bfd   :  { %v2459_v11 = vrot.slane %v2457_v50, 2 }
0x1bff   :  { %v2461_v15 = vadd.f32 %v2459_v11, %v2451_v7 }
0x1c01   :  { %v2464_v32 = vpop.permute.xlu1 %2463 }
0x1c02   :  { %v2465_v30 = vrot.slane %v2464_v32, 4 }
0x1c04   :  { %v2467_v14 = vmul.f32 %v2465_v30, %v4253_v33 }
0x1c06   :  { %v2469_v28 = vrot.slane %v2467_v14, 4 }
0x1c08   :  { %v2471_v45 = vadd.f32 %v2469_v28, %v2461_v15 }
0x1c0a   :  { %v2481_v59 = vadd.f32 %v2479_v1, %v2471_v45 }
0x1c0c   :  { %v2482_v3 = vmax.f32 %v2481_v59, 0.0 }
0x1c0e   :  { %v2483_v9 = vpack.c.bf16 %v2482_v3, %v2482_v3 }
0x1c10   :  { %2861 = vmatmul.msk.bf16.vlgmr.msra.gmra.mxu2 %vm404_vm14, %v2483_v9 }
0x1c93   :  { %v2532_v10 = vpop.f32.mrf.mxu2 }
0x1c94   :  { %v2533_v60 = vadd.f32 %v3000_v29, %v2532_v10 }
0x1c96   :  { %v2536_v37 = vpack.c.bf16 %v2533_v60, %v2533_v60 }
0x1c98   :  { %2878 = vmatmul.msk.bf16.vlgmr.msra.gmra.mxu3 %vm404_vm14, %v2536_v37 }
0x1c9b   :  { %v2534_v33 = vpop.f32.mrf.mxu2 }
0x1d1b   :  { %v2585_v12 = vpop.f32.mrf.mxu3 }
0x1d1c   :  { %v2586_v13 = vadd.f32 %v3001_v4, %v2585_v12 }
0x1d1e   :  { %2590 = vst.msk [vmem:[#allocation16] sm:$0x3] %vm2589_vm0, %v2586_v13 }
0x1d1f   :  { %2601 = dma.vmem_to_hbm [thread:$0]  %s2597_s9, 32, %s2599_s0, [#allocation4]  }
0x1d23   :  { %v2587_v16 = vpop.f32.mrf.mxu3 }
0x1d24   :  { %3440 = dma.done.wait [#allocation4], 32  }
0x1d25   :  { %3441 = vsyncadd [#allocation4], 4294967264 }
0x1d26   :  { %2606 = vsyncpa [#allocation3], 1 }
0x1d27   :  { %2607 = vsyncpa [#allocation6], 1 }
0x1d28   :  { %2608 = vsyncpa [#allocation9], 1 }
0x1d29   :  { %2609 = vsyncpa [#allocation12], 1 }
0x1d2a   :  { %2610 = vsyncpa [#allocation15], 1 }
0x1d2b   :  { %2611 = vsyncpa [#allocation4], 1 }

</bundles_post_ra>
